<compile_context>
chip_gen: v7x
topology: tpu7x:2x2x1
jax: 0.10.0
libtpu: 0.0.40
codegen_flags: <defaults>
</compile_context>

<pallas_src>
import functools

import jax
import jax.numpy as jnp
from jax import lax
from jax.experimental import pallas as pl
from jax.experimental.pallas import tpu as pltpu


def _supcon_kernel(q_ref, k_ref, lab_r_ref, lab_c_ref,        # inputs
                   loss_ref, single_ref,                       # per-row outputs
                   qs_sc, ones_sc, m_sc, l_sc, ps_sc, cnt_sc,  # VMEM scratch
                   *, inv_temp, b_real, has_pad, reduce_on_mxu):
    i = pl.program_id(0)          # anchor-row tile index
    j = pl.program_id(1)          # contrast-column tile index
    n_col = pl.num_programs(1)

    tm = q_ref.shape[0]
    tk = k_ref.shape[0]

    # ---- per-row-tile init (first column step): running stats + hoisted
    #      query scaling (temperature folded into q once, reused n_col times).
    @pl.when(j == 0)
    def _init():
        q = q_ref[...]
        qs_sc[...] = (q.astype(jnp.float32) * inv_temp).astype(qs_sc.dtype)
        if reduce_on_mxu:
            ones_sc[...] = jnp.ones(ones_sc.shape, dtype=ones_sc.dtype)
        m_sc[...] = jnp.full(m_sc.shape, -jnp.inf, dtype=jnp.float32)
        l_sc[...] = jnp.zeros(l_sc.shape, jnp.float32)
        ps_sc[...] = jnp.zeros(ps_sc.shape, jnp.float32)
        cnt_sc[...] = jnp.zeros(cnt_sc.shape, jnp.float32)

    # ---- similarity tile (tm, tk): q_scaled @ k^T on the MXU, f32 accumulate.
    s = lax.dot_general(qs_sc[...], k_ref[...], (((1,), (1,)), ((), ())),
                        preferred_element_type=jnp.float32)

    # ---- boolean positive mask (label equality); diagonal handled separately.
    lab_eq = lab_r_ref[...] == lab_c_ref[...]        # (tm,1)==(1,tk) -> (tm,tk)

    # ---- online softmax stats (common path is diagonal/padding free).
    m_prev = m_sc[...]
    m_new = jnp.maximum(m_prev, jnp.max(s, axis=1, keepdims=True))   # (tm, 1)
    alpha = jnp.exp(m_prev - m_new)                                  # (tm, 1)
    p = jnp.exp(s - m_new)                                           # (tm, tk)
    if has_pad:
        # Zero-padded contrast columns must not contribute to the denominator.
        col_ids = j * tk + lax.broadcasted_iota(jnp.int32, (1, tk), 1)
        p = jnp.where(col_ids < b_real, p, 0.0)
    ps_terms = jnp.where(lab_eq, s, 0.0)                             # (tm, tk)

    if reduce_on_mxu:
        # Offload the three lane-axis sums to the (mostly idle) MXU.
        ones_rhs = ones_sc[...]                                      # (tk, 128)
        dims = (((1,), (0,)), ((), ()))
        sum_p = lax.dot_general(p, ones_rhs, dims,
                                preferred_element_type=jnp.float32)[:, :1]
        sum_ps = lax.dot_general(ps_terms, ones_rhs, dims,
                                 preferred_element_type=jnp.float32)[:, :1]
        sum_cnt = lax.dot_general(lab_eq.astype(jnp.float32), ones_rhs, dims,
                                  preferred_element_type=jnp.float32)[:, :1]
    else:
        sum_p = jnp.sum(p, axis=1, keepdims=True)
        sum_ps = jnp.sum(ps_terms, axis=1, keepdims=True)
        sum_cnt = jnp.sum(lab_eq.astype(jnp.float32), axis=1, keepdims=True)

    l_sc[...] = alpha * l_sc[...] + sum_p
    ps_sc[...] = ps_sc[...] + sum_ps
    cnt_sc[...] = cnt_sc[...] + sum_cnt
    m_sc[...] = m_new

    # ---- self-contrast (diagonal) correction: only tiles that intersect the
    #      diagonal pay for the iota/compare/select work.
    has_diag = jnp.logical_and(j * tk < (i + 1) * tm, (j + 1) * tk > i * tm)

    @pl.when(has_diag)
    def _fix_diag():
        row_ids = i * tm + lax.broadcasted_iota(jnp.int32, (tm, 1), 0)
        col_ids_d = j * tk + lax.broadcasted_iota(jnp.int32, (1, tk), 1)
        is_diag = row_ids == col_ids_d                               # (tm, tk)
        diag_cnt = jnp.sum(is_diag.astype(jnp.float32), axis=1, keepdims=True)
        diag_s = jnp.sum(jnp.where(is_diag, s, 0.0), axis=1, keepdims=True)
        # Remove the diagonal term from denominator / positive-sum / count.
        l_sc[...] = l_sc[...] - diag_cnt * jnp.exp(diag_s - m_new)
        ps_sc[...] = ps_sc[...] - diag_s
        cnt_sc[...] = cnt_sc[...] - diag_cnt

    # ---- finalize per-row loss on the last column step.
    @pl.when(j == n_col - 1)
    def _finalize():
        cnt = cnt_sc[...]                                            # (tm, 1)
        single = (cnt == 0.0).astype(jnp.float32)
        log_denom = jnp.log(l_sc[...])
        # mean_log_prob_pos = (sum(mask*s) - cnt*(max + log(denom))) / (cnt + single)
        mlpp = (ps_sc[...] - cnt * (m_sc[...] + log_denom)) / (cnt + single)
        loss_ref[...] = (-mlpp * (1.0 - single)).astype(loss_ref.dtype)
        single_ref[...] = single.astype(single_ref.dtype)


def _pick_tile(dim, target, align):
    """Largest divisor t of `dim` with t <= target and (t % align == 0 or t == dim)."""
    t = min(target, dim)
    while t >= 1:
        if dim % t == 0 and (t % align == 0 or t == dim):
            return t
        t -= 1
    return dim  # block == full dim is always a valid BlockSpec


def supcon_loss_clear(features, labels, temperature=0.07, *,
                      block_m=256, block_k=512, compute_dtype=None,
                      reduce_on_mxu=True, vmem_limit_bytes=None):
    """features: (B, D) float, labels: (B,) int -> scalar f32 loss."""
    features = jnp.asarray(features)
    labels = jnp.asarray(labels).astype(jnp.int32)
    B, D = features.shape

    if compute_dtype is not None:
        features = features.astype(compute_dtype)    # e.g. bf16 MXU operands
    elif features.dtype not in (jnp.float32, jnp.bfloat16):
        features = features.astype(jnp.float32)

    # Pad the batch to a multiple of 128 so both tiling axes stay (8,128)
    # aligned for any batch size.  Padded rows get zero features and unique
    # sentinel labels -> they are singletons (zero loss) and they add 1 each
    # to sum(singles), so the final mean over real samples is unchanged.
    b_pad = -(-B // 128) * 128
    n_pad = b_pad - B
    has_pad = n_pad > 0
    if has_pad:
        features = jnp.concatenate(
            [features, jnp.zeros((n_pad, D), features.dtype)], axis=0)
        sentinels = jnp.max(labels) + 1 + jnp.arange(n_pad, dtype=jnp.int32)
        labels = jnp.concatenate([labels, sentinels], axis=0)

    labels_row = labels.reshape(b_pad, 1)
    labels_col = labels.reshape(1, b_pad)

    # Row tiles: multiple of 8 sublanes, and keep n_row >= 2 so the "parallel"
    # row axis shards across both v7x TensorCores.  Column tiles: multiple of
    # 128 lanes (or the full dim) so all loads stay unmasked.
    target_m = min(block_m, max(b_pad // 2, 8))
    tm = _pick_tile(b_pad, target_m, 8)
    tk = _pick_tile(b_pad, block_k, 128)
    n_row = b_pad // tm
    n_col = b_pad // tk

    if vmem_limit_bytes is None:
        itemsize = jnp.dtype(features.dtype).itemsize
        est = (2 * tk * D * itemsize      # double-buffered contrast tiles
               + 2 * tm * D * itemsize    # double-buffered anchor tiles
               + tm * D * itemsize        # hoisted scaled-q scratch
               + tk * 128 * 4             # ones operand for MXU reductions
               + 8 * tm * tk * 4          # in-flight (tm, tk) f32 temporaries
               + 8 * tm * 4)              # per-row accumulators / outputs
        # >= 32 MiB (raises v5e's 16 MiB default), capped for v7x's 64 MiB VMEM.
        vmem_limit_bytes = max(32 << 20, min(est + (8 << 20), 64 << 20))

    kernel = functools.partial(
        _supcon_kernel,
        inv_temp=1.0 / temperature,
        b_real=B,
        has_pad=has_pad,
        reduce_on_mxu=reduce_on_mxu,
    )

    loss_rows, singles = pl.pallas_call(
        kernel,
        out_shape=(
            jax.ShapeDtypeStruct((b_pad, 1), jnp.float32),   # per-row loss term
            jax.ShapeDtypeStruct((b_pad, 1), jnp.float32),   # per-row singleton flag
        ),
        grid_spec=pltpu.PrefetchScalarGridSpec(
            num_scalar_prefetch=0,
            grid=(n_row, n_col),
            in_specs=[
                pl.BlockSpec((tm, D), lambda i, j: (i, 0)),   # anchor features
                pl.BlockSpec((tk, D), lambda i, j: (j, 0)),   # contrast features
                pl.BlockSpec((tm, 1), lambda i, j: (i, 0)),   # labels (column vec)
                pl.BlockSpec((1, tk), lambda i, j: (0, j)),   # labels (row vec)
            ],
            out_specs=[
                pl.BlockSpec((tm, 1), lambda i, j: (i, 0)),
                pl.BlockSpec((tm, 1), lambda i, j: (i, 0)),
            ],
            scratch_shapes=[
                pltpu.VMEM((tm, D), features.dtype),   # hoisted q * (1/temperature)
                pltpu.VMEM((tk, 128), jnp.float32),    # ones operand (MXU row-sums)
                pltpu.VMEM((tm, 1), jnp.float32),      # running row max
                pltpu.VMEM((tm, 1), jnp.float32),      # running denominator
                pltpu.VMEM((tm, 1), jnp.float32),      # running sum(mask * s)
                pltpu.VMEM((tm, 1), jnp.float32),      # running mask count
            ],
        ),
        compiler_params=pltpu.CompilerParams(
            dimension_semantics=("parallel", "arbitrary"),
            vmem_limit_bytes=int(vmem_limit_bytes),
        ),
    )(features, features, labels_row, labels_col)

    # O(B) finalization (matches the reference's last two lines).  Padded rows
    # contribute loss 0 and single 1, so b_pad - sum(singles) == B - #real singletons.
    # TODO(synk): like the PyTorch reference, this divides by zero if every
    # real sample is a singleton.
    n_valid = b_pad - jnp.sum(singles)
    return jnp.sum(loss_rows) / n_valid


def _reference_jax(features, labels, temperature=0.07):
    # Pure-JAX mirror of the PyTorch module, for sanity checking.
    f = features.astype(jnp.float32)
    B = f.shape[0]
    lab = labels.reshape(-1, 1)
    mask = (lab == lab.T).astype(jnp.float32)
    adc = (f @ f.T) / temperature
    logits = adc - jnp.max(adc, axis=1, keepdims=True)
    logits_mask = 1.0 - jnp.eye(B, dtype=jnp.float32)
    mask = mask * logits_mask
    single = (mask.sum(1) == 0).astype(jnp.float32)
    exp_logits = jnp.exp(logits) * logits_mask
    log_prob = logits - jnp.log(exp_logits.sum(1, keepdims=True))
    mean_log_prob_pos = (mask * log_prob).sum(1) / (mask.sum(1) + single)
    loss = -mean_log_prob_pos * (1 - single)
    return loss.sum() / (B - single.sum())


if __name__ == "__main__":
    key = jax.random.PRNGKey(0)
    k1, k2, k3, k4 = jax.random.split(key, 4)

    # ---- case 1: aligned batch, exercises the (2, 2) tile grid + streaming ----
    B, D = 256, 32
    feats = jax.random.normal(k1, (B, D), dtype=jnp.float32)
    feats = feats / jnp.linalg.norm(feats, axis=1, keepdims=True)
    # Snap onto the bf16 grid so kernel/reference matmul precision paths agree.
    feats = feats.astype(jnp.bfloat16).astype(jnp.float32)
    labs = jax.random.randint(k2, (B,), 0, 4, dtype=jnp.int32)
    labs = labs.at[0].set(1000)   # force one singleton sample

    loss1 = supcon_loss_clear(feats, labs, temperature=0.07,
                              block_m=128, block_k=128)   # grid (2, 2)
    jax.block_until_ready(loss1)
    ref1 = _reference_jax(feats, labs, temperature=0.07)
    assert jnp.allclose(loss1, ref1, rtol=1e-4, atol=1e-4), (loss1, ref1)

    # ---- case 2: ragged batch (200 -> padded to 256), default tile heuristics ----
    B2 = 200
    feats2 = jax.random.normal(k3, (B2, D), dtype=jnp.float32)
    feats2 = feats2 / jnp.linalg.norm(feats2, axis=1, keepdims=True)
    feats2 = feats2.astype(jnp.bfloat16).astype(jnp.float32)
    labs2 = jax.random.randint(k4, (B2,), 0, 4, dtype=jnp.int32)

    loss2 = supcon_loss_clear(feats2, labs2, temperature=0.07)
    jax.block_until_ready(loss2)
    ref2 = _reference_jax(feats2, labs2, temperature=0.07)
    assert jnp.allclose(loss2, ref2, rtol=1e-4, atol=1e-4), (loss2, ref2)

    print("KERNEL_OK")
</pallas_src>

<mosaic_0001>
module attributes {stable_mosaic.version = 11 : i64} {
  func.func @_supcon_kernel(%arg0: i32, %arg1: i32, %arg2: memref<128x32xf32, #tpu.memory_space<vmem>>, %arg3: memref<128x32xf32, #tpu.memory_space<vmem>>, %arg4: memref<128x1xi32, #tpu.memory_space<vmem>>, %arg5: memref<1x128xi32, #tpu.memory_space<vmem>>, %arg6: memref<128x1xf32, #tpu.memory_space<vmem>>, %arg7: memref<128x1xf32, #tpu.memory_space<vmem>>, %arg8: memref<128x32xf32, #tpu.memory_space<vmem>>, %arg9: memref<128x128xf32, #tpu.memory_space<vmem>>, %arg10: memref<128x1xf32, #tpu.memory_space<vmem>>, %arg11: memref<128x1xf32, #tpu.memory_space<vmem>>, %arg12: memref<128x1xf32, #tpu.memory_space<vmem>>, %arg13: memref<128x1xf32, #tpu.memory_space<vmem>>) attributes {dimension_semantics = [#tpu.dimension_semantics<parallel>, #tpu.dimension_semantics<arbitrary>], iteration_bounds = array<i64: 2, 2>, scalar_prefetch = 0 : i64, scratch_operands = 6 : i64, tpu.core_type = #tpu.core_type<tc>, window_params = [{transform_indices = @transform_0, window_bounds = array<i64: 128, 32>}, {transform_indices = @transform_1, window_bounds = array<i64: 128, 32>}, {transform_indices = @transform_2, window_bounds = array<i64: 128, 1>}, {transform_indices = @transform_3, window_bounds = array<i64: 1, 128>}, {transform_indices = @transform_4, window_bounds = array<i64: 128, 1>}, {transform_indices = @transform_5, window_bounds = array<i64: 128, 1>}]} {
    %c0_i32 = arith.constant 0 : i32
    %0 = arith.cmpi eq, %arg1, %c0_i32 : i32
    %1 = arith.extui %0 : i1 to i32
    %c0_i32_0 = arith.constant 0 : i32
    %2 = arith.cmpi ne, %1, %c0_i32_0 : i32
    scf.if %2 {
      %c0_38 = arith.constant 0 : index
      %c0_39 = arith.constant 0 : index
      %56 = vector.load %arg2[%c0_38, %c0_39] : memref<128x32xf32, #tpu.memory_space<vmem>>, vector<128x32xf32>
      %cst_40 = arith.constant 14.2857141 : f32
      %57 = vector.broadcast %cst_40 : f32 to vector<128x32xf32>
      %58 = arith.mulf %56, %57 : vector<128x32xf32>
      %c0_41 = arith.constant 0 : index
      %c0_42 = arith.constant 0 : index
      %59 = vector.load %arg8[%c0_41, %c0_42] : memref<128x32xf32, #tpu.memory_space<vmem>>, vector<128x32xf32>
      tpu.vector_store %arg8[%c0_41, %c0_42], %58 {strides = array<i32>} : memref<128x32xf32, #tpu.memory_space<vmem>>, vector<128x32xf32>,
      %cst_43 = arith.constant 1.000000e+00 : f32
      %60 = vector.broadcast %cst_43 : f32 to vector<128x128xf32>
      %c0_44 = arith.constant 0 : index
      %c0_45 = arith.constant 0 : index
      %61 = vector.load %arg9[%c0_44, %c0_45] : memref<128x128xf32, #tpu.memory_space<vmem>>, vector<128x128xf32>
      tpu.vector_store %arg9[%c0_44, %c0_45], %60 {strides = array<i32>} : memref<128x128xf32, #tpu.memory_space<vmem>>, vector<128x128xf32>,
      %cst_46 = arith.constant 0xFF800000 : f32
      %62 = vector.broadcast %cst_46 : f32 to vector<128x1xf32>
      %c0_47 = arith.constant 0 : index
      %c0_48 = arith.constant 0 : index
      %63 = vector.load %arg10[%c0_47, %c0_48] : memref<128x1xf32, #tpu.memory_space<vmem>>, vector<128x1xf32>
      tpu.vector_store %arg10[%c0_47, %c0_48], %62 {strides = array<i32>} : memref<128x1xf32, #tpu.memory_space<vmem>>, vector<128x1xf32>,
      %cst_49 = arith.constant 0.000000e+00 : f32
      %64 = vector.broadcast %cst_49 : f32 to vector<128x1xf32>
      %c0_50 = arith.constant 0 : index
      %c0_51 = arith.constant 0 : index
      %65 = vector.load %arg11[%c0_50, %c0_51] : memref<128x1xf32, #tpu.memory_space<vmem>>, vector<128x1xf32>
      tpu.vector_store %arg11[%c0_50, %c0_51], %64 {strides = array<i32>} : memref<128x1xf32, #tpu.memory_space<vmem>>, vector<128x1xf32>,
      %cst_52 = arith.constant 0.000000e+00 : f32
      %66 = vector.broadcast %cst_52 : f32 to vector<128x1xf32>
      %c0_53 = arith.constant 0 : index
      %c0_54 = arith.constant 0 : index
      %67 = vector.load %arg12[%c0_53, %c0_54] : memref<128x1xf32, #tpu.memory_space<vmem>>, vector<128x1xf32>
      tpu.vector_store %arg12[%c0_53, %c0_54], %66 {strides = array<i32>} : memref<128x1xf32, #tpu.memory_space<vmem>>, vector<128x1xf32>,
      %cst_55 = arith.constant 0.000000e+00 : f32
      %68 = vector.broadcast %cst_55 : f32 to vector<128x1xf32>
      %c0_56 = arith.constant 0 : index
      %c0_57 = arith.constant 0 : index
      %69 = vector.load %arg13[%c0_56, %c0_57] : memref<128x1xf32, #tpu.memory_space<vmem>>, vector<128x1xf32>
      tpu.vector_store %arg13[%c0_56, %c0_57], %68 {strides = array<i32>} : memref<128x1xf32, #tpu.memory_space<vmem>>, vector<128x1xf32>,
    } else {
    }
    %c0 = arith.constant 0 : index
    %c0_1 = arith.constant 0 : index
    %3 = vector.load %arg8[%c0, %c0_1] : memref<128x32xf32, #tpu.memory_space<vmem>>, vector<128x32xf32>
    %c0_2 = arith.constant 0 : index
    %c0_3 = arith.constant 0 : index
    %4 = vector.load %arg3[%c0_2, %c0_3] : memref<128x32xf32, #tpu.memory_space<vmem>>, vector<128x32xf32>
    %cst = arith.constant dense<0.000000e+00> : vector<128x128xf32>
    %5 = tpu.matmul %3, %4, %cst {dimension_numbers = #tpu.dot_dimension_numbers<[1], [1], [0], [0], [0, 0, 1, 0], [], []>} : vector<128x32xf32>, vector<128x32xf32>, vector<128x128xf32> -> vector<128x128xf32>
    %c0_4 = arith.constant 0 : index
    %c0_5 = arith.constant 0 : index
    %6 = vector.load %arg4[%c0_4, %c0_5] : memref<128x1xi32, #tpu.memory_space<vmem>>, vector<128x1xi32>
    %c0_6 = arith.constant 0 : index
    %c0_7 = arith.constant 0 : index
    %7 = vector.load %arg5[%c0_6, %c0_7] : memref<1x128xi32, #tpu.memory_space<vmem>>, vector<1x128xi32>
    %8 = vector.broadcast %6 : vector<128x1xi32> to vector<128x128xi32>
    %9 = vector.broadcast %7 : vector<1x128xi32> to vector<128x128xi32>
    %10 = arith.cmpi eq, %8, %9 : vector<128x128xi32>
    %c0_8 = arith.constant 0 : index
    %c0_9 = arith.constant 0 : index
    %11 = vector.load %arg10[%c0_8, %c0_9] : memref<128x1xf32, #tpu.memory_space<vmem>>, vector<128x1xf32>
    %cst_10 = arith.constant dense<0xFF800000> : vector<128xf32>
    %12 = vector.multi_reduction <maximumf>, %5, %cst_10 [1] : vector<128x128xf32> to vector<128xf32>
    %13 = vector.shape_cast %12 : vector<128xf32> to vector<128x1xf32>
    %14 = arith.maximumf %11, %13 : vector<128x1xf32>
    %15 = arith.subf %11, %14 : vector<128x1xf32>
    %16 = math.exp %15 : vector<128x1xf32>
    %17 = vector.broadcast %14 : vector<128x1xf32> to vector<128x128xf32>
    %18 = arith.subf %5, %17 : vector<128x128xf32>
    %19 = math.exp %18 : vector<128x128xf32>
    %cst_11 = arith.constant 0.000000e+00 : f32
    %20 = vector.broadcast %cst_11 : f32 to vector<128x128xf32>
    %21 = arith.select %10, %5, %20 : vector<128x128xi1>, vector<128x128xf32>
    %c0_12 = arith.constant 0 : index
    %c0_13 = arith.constant 0 : index
    %22 = vector.load %arg9[%c0_12, %c0_13] : memref<128x128xf32, #tpu.memory_space<vmem>>, vector<128x128xf32>
    %cst_14 = arith.constant dense<0.000000e+00> : vector<128x128xf32>
    %23 = tpu.matmul %19, %22, %cst_14 {dimension_numbers = #tpu.dot_dimension_numbers<[1], [0], [0], [1], [0, 0, 1, 1], [], []>} : vector<128x128xf32>, vector<128x128xf32>, vector<128x128xf32> -> vector<128x128xf32>
    %24 = vector.extract_strided_slice %23 {offsets = [0, 0], sizes = [128, 1], strides = [1, 1]} : vector<128x128xf32> to vector<128x1xf32>
    %cst_15 = arith.constant dense<0.000000e+00> : vector<128x128xf32>
    %25 = tpu.matmul %21, %22, %cst_15 {dimension_numbers = #tpu.dot_dimension_numbers<[1], [0], [0], [1], [0, 0, 1, 1], [], []>} : vector<128x128xf32>, vector<128x128xf32>, vector<128x128xf32> -> vector<128x128xf32>
    %26 = vector.extract_strided_slice %25 {offsets = [0, 0], sizes = [128, 1], strides = [1, 1]} : vector<128x128xf32> to vector<128x1xf32>
    %27 = arith.extui %10 : vector<128x128xi1> to vector<128x128xi32>
    %28 = arith.sitofp %27 : vector<128x128xi32> to vector<128x128xf32>
    %cst_16 = arith.constant dense<0.000000e+00> : vector<128x128xf32>
    %29 = tpu.matmul %28, %22, %cst_16 {dimension_numbers = #tpu.dot_dimension_numbers<[1], [0], [0], [1], [0, 0, 1, 1], [], []>} : vector<128x128xf32>, vector<128x128xf32>, vector<128x128xf32> -> vector<128x128xf32>
    %30 = vector.extract_strided_slice %29 {offsets = [0, 0], sizes = [128, 1], strides = [1, 1]} : vector<128x128xf32> to vector<128x1xf32>
    %c0_17 = arith.constant 0 : index
    %c0_18 = arith.constant 0 : index
    %31 = vector.load %arg11[%c0_17, %c0_18] : memref<128x1xf32, #tpu.memory_space<vmem>>, vector<128x1xf32>
    %32 = arith.mulf %16, %31 : vector<128x1xf32>
    %33 = arith.addf %32, %24 : vector<128x1xf32>
    %c0_19 = arith.constant 0 : index
    %c0_20 = arith.constant 0 : index
    %34 = vector.load %arg11[%c0_19, %c0_20] : memref<128x1xf32, #tpu.memory_space<vmem>>, vector<128x1xf32>
    tpu.vector_store %arg11[%c0_19, %c0_20], %33 {strides = array<i32>} : memref<128x1xf32, #tpu.memory_space<vmem>>, vector<128x1xf32>,
    %c0_21 = arith.constant 0 : index
    %c0_22 = arith.constant 0 : index
    %35 = vector.load %arg12[%c0_21, %c0_22] : memref<128x1xf32, #tpu.memory_space<vmem>>, vector<128x1xf32>
    %36 = arith.addf %35, %26 : vector<128x1xf32>
    %c0_23 = arith.constant 0 : index
    %c0_24 = arith.constant 0 : index
    %37 = vector.load %arg12[%c0_23, %c0_24] : memref<128x1xf32, #tpu.memory_space<vmem>>, vector<128x1xf32>
    tpu.vector_store %arg12[%c0_23, %c0_24], %36 {strides = array<i32>} : memref<128x1xf32, #tpu.memory_space<vmem>>, vector<128x1xf32>,
    %c0_25 = arith.constant 0 : index
    %c0_26 = arith.constant 0 : index
    %38 = vector.load %arg13[%c0_25, %c0_26] : memref<128x1xf32, #tpu.memory_space<vmem>>, vector<128x1xf32>
    %39 = arith.addf %38, %30 : vector<128x1xf32>
    %c0_27 = arith.constant 0 : index
    %c0_28 = arith.constant 0 : index
    %40 = vector.load %arg13[%c0_27, %c0_28] : memref<128x1xf32, #tpu.memory_space<vmem>>, vector<128x1xf32>
    tpu.vector_store %arg13[%c0_27, %c0_28], %39 {strides = array<i32>} : memref<128x1xf32, #tpu.memory_space<vmem>>, vector<128x1xf32>,
    %c0_29 = arith.constant 0 : index
    %c0_30 = arith.constant 0 : index
    %41 = vector.load %arg10[%c0_29, %c0_30] : memref<128x1xf32, #tpu.memory_space<vmem>>, vector<128x1xf32>
    tpu.vector_store %arg10[%c0_29, %c0_30], %14 {strides = array<i32>} : memref<128x1xf32, #tpu.memory_space<vmem>>, vector<128x1xf32>,
    %c128_i32 = arith.constant 128 : i32
    %42 = arith.muli %arg1, %c128_i32 : i32
    %c1_i32 = arith.constant 1 : i32
    %43 = arith.addi %arg0, %c1_i32 : i32
    %c128_i32_31 = arith.constant 128 : i32
    %44 = arith.muli %43, %c128_i32_31 : i32
    %45 = arith.cmpi slt, %42, %44 : i32
    %c1_i32_32 = arith.constant 1 : i32
    %46 = arith.addi %arg1, %c1_i32_32 : i32
    %c128_i32_33 = arith.constant 128 : i32
    %47 = arith.muli %46, %c128_i32_33 : i32
    %c128_i32_34 = arith.constant 128 : i32
    %48 = arith.muli %arg0, %c128_i32_34 : i32
    %49 = arith.cmpi sgt, %47, %48 : i32
    %50 = arith.andi %45, %49 : i1
    %51 = arith.extui %50 : i1 to i32
    %c0_i32_35 = arith.constant 0 : i32
    %52 = arith.cmpi ne, %51, %c0_i32_35 : i32
    scf.if %52 {
      %c128_i32_38 = arith.constant 128 : i32
      %56 = arith.muli %arg0, %c128_i32_38 : i32
      %57 = tpu.iota {dimensions = array<i32: 0>} : vector<128x1xi32>
      %58 = vector.broadcast %56 : i32 to vector<128x1xi32>
      %59 = arith.addi %58, %57 : vector<128x1xi32>
      %c128_i32_39 = arith.constant 128 : i32
      %60 = arith.muli %arg1, %c128_i32_39 : i32
      %61 = tpu.iota {dimensions = array<i32: 1>} : vector<1x128xi32>
      %62 = vector.broadcast %60 : i32 to vector<1x128xi32>
      %63 = arith.addi %62, %61 : vector<1x128xi32>
      %64 = vector.broadcast %59 : vector<128x1xi32> to vector<128x128xi32>
      %65 = vector.broadcast %63 : vector<1x128xi32> to vector<128x128xi32>
      %66 = arith.cmpi eq, %64, %65 : vector<128x128xi32>
      %67 = arith.extui %66 : vector<128x128xi1> to vector<128x128xi32>
      %68 = arith.sitofp %67 : vector<128x128xi32> to vector<128x128xf32>
      %cst_40 = arith.constant dense<0.000000e+00> : vector<128xf32>
      %69 = vector.multi_reduction <add>, %68, %cst_40 [1] : vector<128x128xf32> to vector<128xf32>
      %70 = vector.shape_cast %69 : vector<128xf32> to vector<128x1xf32>
      %cst_41 = arith.constant 0.000000e+00 : f32
      %71 = vector.broadcast %cst_41 : f32 to vector<128x128xf32>
      %72 = arith.select %66, %5, %71 : vector<128x128xi1>, vector<128x128xf32>
      %cst_42 = arith.constant dense<0.000000e+00> : vector<128xf32>
      %73 = vector.multi_reduction <add>, %72, %cst_42 [1] : vector<128x128xf32> to vector<128xf32>
      %74 = vector.shape_cast %73 : vector<128xf32> to vector<128x1xf32>
      %c0_43 = arith.constant 0 : index
      %c0_44 = arith.constant 0 : index
      %75 = vector.load %arg11[%c0_43, %c0_44] : memref<128x1xf32, #tpu.memory_space<vmem>>, vector<128x1xf32>
      %76 = arith.subf %74, %14 : vector<128x1xf32>
      %77 = math.exp %76 : vector<128x1xf32>
      %78 = arith.mulf %70, %77 : vector<128x1xf32>
      %79 = arith.subf %75, %78 : vector<128x1xf32>
      %c0_45 = arith.constant 0 : index
      %c0_46 = arith.constant 0 : index
      %80 = vector.load %arg11[%c0_45, %c0_46] : memref<128x1xf32, #tpu.memory_space<vmem>>, vector<128x1xf32>
      tpu.vector_store %arg11[%c0_45, %c0_46], %79 {strides = array<i32>} : memref<128x1xf32, #tpu.memory_space<vmem>>, vector<128x1xf32>,
      %c0_47 = arith.constant 0 : index
      %c0_48 = arith.constant 0 : index
      %81 = vector.load %arg12[%c0_47, %c0_48] : memref<128x1xf32, #tpu.memory_space<vmem>>, vector<128x1xf32>
      %82 = arith.subf %81, %74 : vector<128x1xf32>
      %c0_49 = arith.constant 0 : index
      %c0_50 = arith.constant 0 : index
      %83 = vector.load %arg12[%c0_49, %c0_50] : memref<128x1xf32, #tpu.memory_space<vmem>>, vector<128x1xf32>
      tpu.vector_store %arg12[%c0_49, %c0_50], %82 {strides = array<i32>} : memref<128x1xf32, #tpu.memory_space<vmem>>, vector<128x1xf32>,
      %c0_51 = arith.constant 0 : index
      %c0_52 = arith.constant 0 : index
      %84 = vector.load %arg13[%c0_51, %c0_52] : memref<128x1xf32, #tpu.memory_space<vmem>>, vector<128x1xf32>
      %85 = arith.subf %84, %70 : vector<128x1xf32>
      %c0_53 = arith.constant 0 : index
      %c0_54 = arith.constant 0 : index
      %86 = vector.load %arg13[%c0_53, %c0_54] : memref<128x1xf32, #tpu.memory_space<vmem>>, vector<128x1xf32>
      tpu.vector_store %arg13[%c0_53, %c0_54], %85 {strides = array<i32>} : memref<128x1xf32, #tpu.memory_space<vmem>>, vector<128x1xf32>,
    } else {
    }
    %c1_i32_36 = arith.constant 1 : i32
    %53 = arith.cmpi eq, %arg1, %c1_i32_36 : i32
    %54 = arith.extui %53 : i1 to i32
    %c0_i32_37 = arith.constant 0 : i32
    %55 = arith.cmpi ne, %54, %c0_i32_37 : i32
    scf.if %55 {
      %c0_38 = arith.constant 0 : index
      %c0_39 = arith.constant 0 : index
      %56 = vector.load %arg13[%c0_38, %c0_39] : memref<128x1xf32, #tpu.memory_space<vmem>>, vector<128x1xf32>
      %cst_40 = arith.constant 0.000000e+00 : f32
      %57 = vector.broadcast %cst_40 : f32 to vector<128x1xf32>
      %58 = arith.cmpf oeq, %56, %57 : vector<128x1xf32>
      %59 = arith.extui %58 : vector<128x1xi1> to vector<128x1xi32>
      %60 = arith.sitofp %59 : vector<128x1xi32> to vector<128x1xf32>
      %c0_41 = arith.constant 0 : index
      %c0_42 = arith.constant 0 : index
      %61 = vector.load %arg11[%c0_41, %c0_42] : memref<128x1xf32, #tpu.memory_space<vmem>>, vector<128x1xf32>
      %62 = math.log %61 : vector<128x1xf32>
      %c0_43 = arith.constant 0 : index
      %c0_44 = arith.constant 0 : index
      %63 = vector.load %arg12[%c0_43, %c0_44] : memref<128x1xf32, #tpu.memory_space<vmem>>, vector<128x1xf32>
      %c0_45 = arith.constant 0 : index
      %c0_46 = arith.constant 0 : index
      %64 = vector.load %arg10[%c0_45, %c0_46] : memref<128x1xf32, #tpu.memory_space<vmem>>, vector<128x1xf32>
      %65 = arith.addf %64, %62 : vector<128x1xf32>
      %66 = arith.mulf %56, %65 : vector<128x1xf32>
      %67 = arith.subf %63, %66 : vector<128x1xf32>
      %68 = arith.addf %56, %60 : vector<128x1xf32>
      %69 = arith.divf %67, %68 : vector<128x1xf32>
      %cst_47 = arith.constant 0.000000e+00 : f32
      %70 = vector.broadcast %cst_47 : f32 to vector<128x1xf32>
      %71 = arith.subf %70, %69 : vector<128x1xf32>
      %cst_48 = arith.constant 1.000000e+00 : f32
      %72 = vector.broadcast %cst_48 : f32 to vector<128x1xf32>
      %73 = arith.subf %72, %60 : vector<128x1xf32>
      %74 = arith.mulf %71, %73 : vector<128x1xf32>
      %c0_49 = arith.constant 0 : index
      %c0_50 = arith.constant 0 : index
      %75 = vector.load %arg6[%c0_49, %c0_50] : memref<128x1xf32, #tpu.memory_space<vmem>>, vector<128x1xf32>
      tpu.vector_store %arg6[%c0_49, %c0_50], %74 {strides = array<i32>} : memref<128x1xf32, #tpu.memory_space<vmem>>, vector<128x1xf32>,
      %c0_51 = arith.constant 0 : index
      %c0_52 = arith.constant 0 : index
      %76 = vector.load %arg7[%c0_51, %c0_52] : memref<128x1xf32, #tpu.memory_space<vmem>>, vector<128x1xf32>
      tpu.vector_store %arg7[%c0_51, %c0_52], %60 {strides = array<i32>} : memref<128x1xf32, #tpu.memory_space<vmem>>, vector<128x1xf32>,
    } else {
    }
    return
  }
  func.func @transform_0(%arg0: i32, %arg1: i32) -> (i32, i32) {
    %c0_i32 = arith.constant 0 : i32
    %c0_i32_0 = arith.constant 0 : i32
    return %arg0, %c0_i32 : i32, i32
  }
  func.func @transform_1(%arg0: i32, %arg1: i32) -> (i32, i32) {
    %c0_i32 = arith.constant 0 : i32
    %c0_i32_0 = arith.constant 0 : i32
    return %arg1, %c0_i32 : i32, i32
  }
  func.func @transform_2(%arg0: i32, %arg1: i32) -> (i32, i32) {
    %c0_i32 = arith.constant 0 : i32
    %c0_i32_0 = arith.constant 0 : i32
    return %arg0, %c0_i32 : i32, i32
  }
  func.func @transform_3(%arg0: i32, %arg1: i32) -> (i32, i32) {
    %c0_i32 = arith.constant 0 : i32
    %c0_i32_0 = arith.constant 0 : i32
    return %c0_i32, %arg1 : i32, i32
  }
  func.func @transform_4(%arg0: i32, %arg1: i32) -> (i32, i32) {
    %c0_i32 = arith.constant 0 : i32
    %c0_i32_0 = arith.constant 0 : i32
    return %arg0, %c0_i32 : i32, i32
  }
  func.func @transform_5(%arg0: i32, %arg1: i32) -> (i32, i32) {
    %c0_i32 = arith.constant 0 : i32
    %c0_i32_0 = arith.constant 0 : i32
    return %arg0, %c0_i32 : i32, i32
  }
}

</mosaic_0001>

<bundles_post_ra>
// kernel: tpu_custom_call.1
= control target key start
LH: loop header
LB: loop body
LE: loop exit
PB: predicated region body
PF: predicated region fallthrough
CT: control target
= control target key end

     0   :  { %s3504_s18 = smov 0   ;;  %s3506_s19 = smov 0   ;;  %s4837_s0 = inlined_call_operand.vmem [shape: f32[256,32], index: 0, kind: input, shape index: {}]   ;;  %s4838_s1 = inlined_call_operand.vmem [shape: f32[256,32], index: 1, kind: input, shape index: {}]   ;;  %s4839_s2 = inlined_call_operand.vmem [shape: s32[256,1], index: 2, kind: input, shape index: {}]   ;;  %s4840_s3 = inlined_call_operand.vmem [shape: s32[1,256], index: 3, kind: input, shape index: {}]   ;;  %s4841_s4 = inlined_call_operand.vmem [shape: f32[256,1], index: 4, kind: output, shape index: {0}]   ;;  %s4842_s5 = inlined_call_operand.vmem [shape: f32[256,1], index: 5, kind: output, shape index: {1}]  }
   0x1   :  { %s3508_s20 = smov 0   ;;  %s3510_s21 = smov 0  }
   0x2   :  { %s3512_s22 = smov 0  }
   0x3 LB: > { %s25_s23 = sadd.s32 1, %s3457_s20  ;;  %s28_s24 = sadd.s32 1, %s3461_s21  ;;  %s3465_s22 = sphi %s3512_s22, %s16_s22   ;;  %s3461_s21 = sphi %s3510_s21, %s4969_s21   ;;  %s3457_s20 = sphi %s3508_s20, %s4968_s20   ;;  %s3453_s19 = sphi %s3506_s19, %s4967_s19   ;;  %s3449_s18 = sphi %s3504_s18, %s4966_s18  }
   0x4   : > { %p26_p0 = scmp.ge.s32.totalorder %s25_s23, 2  ;;  %p2570_p1 = scmp.ge.s32.totalorder %s3465_s22, 1 }
   0x5   : > { %p233_p2 = scmp.lt.s32.totalorder %s3465_s22, 5 }
   0x6   : > { %s4971_s23 = smov (%p26_p0, %s25_s23), 0  ;;  %s4973_s24 = smov (!%p26_p0, %s28_s24), %s3461_s21 }
   0x7   : > { %p234_p3 = pnand %p2570_p1, %p233_p2  ;;  %p30_p4 = scmp.ge.s32.totalorder %s4973_s24, 2 }
   0x9   : > { %s4975_s24 = smov (%p30_p4, %s4973_s24), 0  ;;  %237 = sbr.rel (%p234_p3) target bundleno = 1213 (0x4bd), region = 36 }
  0x10   : > { %s2571_s25 = sshll.u32 %s3453_s19, 4  ;;  %s2573_s26 = sshll.u32 %s3449_s18, 4 }
  0x11   : > { %p280_p5 = scmp.lt.s32.totalorder %s2571_s25, 31  ;;  %p286_p6 = scmp.lt.s32.totalorder %s2573_s26, 31 }
  0x12   : > { %p297_p7 = scmp.lt.s32.totalorder %s3449_s18, 1  ;;  %p2581_p8 = scmp.ne.s32.totalorder %s3449_s18, 0 }
  0x13   : > { %s4977_s25 = smov (!%p280_p5, %s2571_s25), 31  ;;  %s4979_s26 = smov (!%p286_p6, %s2573_s26), 31 }
  0x14   : > { %s2572_s27 = sshll.u32 %s4977_s25, 3  ;;  %s2574_s6 = sshll.u32 %s4979_s26, 3  ;;  %vm348_vm0 = vcmask (!%p2581_p8), 261120   ;;  %vm381_vm1 = vcmask (!%p2581_p8), 7168   ;;  %v3467_v6 = vmov (!%p2581_p8), 1.0   ;;  %v3468_v13 = vmov (!%p2581_p8), -inf  }
  0x15   : > { %s3544_s30 = scalar_lea.vmem %s4837_s0, %s2572_s27  ;;  %s3549_s9 = scalar_lea.vmem %s4838_s1, %s2574_s6  ;;  %365 = vst [vmem:[#allocation3] sm:$0xff] (!%p2581_p8), %v3467_v6  ;;  %366 = vst [vmem:[#allocation3 + $0x8] sm:$0xff] (!%p2581_p8), %v3467_v6  ;;  %v3469_v14 = vmov (!%p2581_p8), 0.0  }
  0x16   : > { %s3554_s12 = scalar_lea.vmem %s4839_s2, %s2572_s27  ;;  %s3562_s16 = scalar_lea.vmem %s4841_s4, %s2572_s27  ;;  %v316_v0 = vld [vmem:[%s3544_s30] sm:$0xff] (!%p2581_p8)  ;;  %v317_v1 = vld [vmem:[%s3544_s30 + $0x8] sm:$0xff] (!%p2581_p8)  ;;  %v318_v2 = vld [vmem:[%s3544_s30 + $0x10] sm:$0xff] (!%p2581_p8)  ;;  %367 = vst [vmem:[#allocation3 + $0x10] sm:$0xff] (!%p2581_p8), %v3467_v6 }
  0x17   : > { %s3557_s13 = scalar_select %p297_p7, %s3449_s18, 1 }
  0x18   : > { %s3567_s26 = scalar_lea.vmem %s4842_s5, %s2572_s27  ;;  %315 = sbr.rel (%p2581_p8) target bundleno = 71 (0x47), region = 40  ;;  %v332_v3 = vmul.f32 (!%p2581_p8), 14.285714, %v316_v0  ;;  %v333_v4 = vmul.f32 (!%p2581_p8), 14.285714, %v317_v1  ;;  %368 = vst [vmem:[#allocation3 + $0x18] sm:$0xff] (!%p2581_p8), %v3467_v6 }
  0x19   : > { %s299_s6 = scalar_lea.vmem %s4840_s3, %s3557_s13  ;;  %v334_v5 = vmul.f32 (!%p2581_p8), 14.285714, %v318_v2  ;;  %369 = vst [vmem:[#allocation3 + $0x20] sm:$0xff] (!%p2581_p8), %v3467_v6  ;;  %370 = vst [vmem:[#allocation3 + $0x28] sm:$0xff] (!%p2581_p8), %v3467_v6  ;;  %v319_v7 = vld [vmem:[%s3544_s30 + $0x18] sm:$0xff] (!%p2581_p8)  ;;  %v320_v8 = vld [vmem:[%s3544_s30 + $0x20] sm:$0xff] (!%p2581_p8) }
  0x1a   : > { %371 = vst [vmem:[#allocation3 + $0x30] sm:$0xff] (!%p2581_p8), %v3467_v6  ;;  %372 = vst [vmem:[#allocation3 + $0x38] sm:$0xff] (!%p2581_p8), %v3467_v6  ;;  %v321_v9 = vld [vmem:[%s3544_s30 + $0x28] sm:$0xff] (!%p2581_p8)  ;;  %v3583_v10 = vmul.f32 (!%p2581_p8), 14.285714, %v319_v7  ;;  %v322_v15 = vld [vmem:[%s3544_s30 + $0x30] sm:$0xff] (!%p2581_p8) }
  0x1b   : > { %373 = vst [vmem:[#allocation3 + $0x40] sm:$0xff] (!%p2581_p8), %v3467_v6  ;;  %374 = vst [vmem:[#allocation3 + $0x48] sm:$0xff] (!%p2581_p8), %v3467_v6  ;;  %v3585_v11 = vmul.f32 (!%p2581_p8), 14.285714, %v320_v8  ;;  %v3587_v12 = vmul.f32 (!%p2581_p8), 14.285714, %v321_v9 }
  0x1c   : > { %375 = vst [vmem:[#allocation3 + $0x50] sm:$0xff] (!%p2581_p8), %v3467_v6  ;;  %376 = vst [vmem:[#allocation3 + $0x58] sm:$0xff] (!%p2581_p8), %v3467_v6  ;;  %v323_v16 = vld [vmem:[%s3544_s30 + $0x38] sm:$0xff] (!%p2581_p8)  ;;  %v324_v17 = vld [vmem:[%s3544_s30 + $0x40] sm:$0xff] (!%p2581_p8)  ;;  %v338_v18 = vmul.f32 (!%p2581_p8), 14.285714, %v322_v15 }
  0x1d   : > { %377 = vst [vmem:[#allocation3 + $0x60] sm:$0xff] (!%p2581_p8), %v3467_v6  ;;  %378 = vst [vmem:[#allocation3 + $0x68] sm:$0xff] (!%p2581_p8), %v3467_v6  ;;  %v339_v19 = vmul.f32 (!%p2581_p8), 14.285714, %v323_v16  ;;  %v340_v20 = vmul.f32 (!%p2581_p8), 14.285714, %v324_v17 }
  0x1e   : > { %379 = vst [vmem:[#allocation3 + $0x70] sm:$0xff] (!%p2581_p8), %v3467_v6  ;;  %380 = vst [vmem:[#allocation3 + $0x78] sm:$0xff] (!%p2581_p8), %v3467_v6  ;;  %v325_v21 = vld [vmem:[%s3544_s30 + $0x48] sm:$0xff] (!%p2581_p8)  ;;  %v326_v22 = vld [vmem:[%s3544_s30 + $0x50] sm:$0xff] (!%p2581_p8) }
  0x1f   : > { %349 = vst.msk [vmem:[#allocation2] sm:$0xff] %vm348_vm0, %v332_v3  ;;  %350 = vst.msk [vmem:[#allocation2 + $0x8] sm:$0xff] %vm348_vm0, %v333_v4  ;;  %v327_v23 = vld [vmem:[%s3544_s30 + $0x58] sm:$0xff]  ;;  %v341_v24 = vmul.f32 14.285714, %v325_v21  ;;  %v328_v27 = vld [vmem:[%s3544_s30 + $0x60] sm:$0xff] }
  0x20   : > { %351 = vst.msk [vmem:[#allocation2 + $0x10] sm:$0xff] %vm348_vm0, %v334_v5  ;;  %352 = vst.msk [vmem:[#allocation2 + $0x18] sm:$0xff] %vm348_vm0, %v3583_v10  ;;  %v342_v25 = vmul.f32 14.285714, %v326_v22  ;;  %v343_v26 = vmul.f32 14.285714, %v327_v23 }
  0x21   : > { %382 = vst.msk [vmem:[#allocation4] sm:$0xff] %vm381_vm1, %v3468_v13  ;;  %383 = vst.msk [vmem:[#allocation4 + $0x8] sm:$0xff] %vm381_vm1, %v3468_v13  ;;  %v329_v28 = vld [vmem:[%s3544_s30 + $0x68] sm:$0xff]  ;;  %v330_v29 = vld [vmem:[%s3544_s30 + $0x70] sm:$0xff]  ;;  %v344_v30 = vmul.f32 14.285714, %v328_v27 }
  0x22   : > { %384 = vst.msk [vmem:[#allocation4 + $0x10] sm:$0xff] %vm381_vm1, %v3468_v13  ;;  %385 = vst.msk [vmem:[#allocation4 + $0x18] sm:$0xff] %vm381_vm1, %v3468_v13  ;;  %v345_v31 = vmul.f32 14.285714, %v329_v28  ;;  %v346_v32 = vmul.f32 14.285714, %v330_v29 }
  0x23   : > { %386 = vst.msk [vmem:[#allocation4 + $0x20] sm:$0xff] %vm381_vm1, %v3468_v13  ;;  %387 = vst.msk [vmem:[#allocation4 + $0x28] sm:$0xff] %vm381_vm1, %v3468_v13  ;;  %v331_v33 = vld [vmem:[%s3544_s30 + $0x78] sm:$0xff] }
  0x24   : > { %388 = vst.msk [vmem:[#allocation4 + $0x30] sm:$0xff] %vm381_vm1, %v3468_v13  ;;  %389 = vst.msk [vmem:[#allocation4 + $0x38] sm:$0xff] %vm381_vm1, %v3468_v13  ;;  %v347_v34 = vmul.f32 14.285714, %v331_v33 }
  0x25   : > { %390 = vst.msk [vmem:[#allocation4 + $0x40] sm:$0xff] %vm381_vm1, %v3468_v13  ;;  %391 = vst.msk [vmem:[#allocation4 + $0x48] sm:$0xff] %vm381_vm1, %v3468_v13 }
  0x26   : > { %392 = vst.msk [vmem:[#allocation4 + $0x50] sm:$0xff] %vm381_vm1, %v3468_v13  ;;  %393 = vst.msk [vmem:[#allocation4 + $0x58] sm:$0xff] %vm381_vm1, %v3468_v13 }
  0x27   : > { %394 = vst.msk [vmem:[#allocation4 + $0x60] sm:$0xff] %vm381_vm1, %v3468_v13  ;;  %395 = vst.msk [vmem:[#allocation4 + $0x68] sm:$0xff] %vm381_vm1, %v3468_v13 }
  0x28   : > { %396 = vst.msk [vmem:[#allocation4 + $0x70] sm:$0xff] %vm381_vm1, %v3468_v13  ;;  %397 = vst.msk [vmem:[#allocation4 + $0x78] sm:$0xff] %vm381_vm1, %v3468_v13 }
  0x29   : > { %398 = vst.msk [vmem:[#allocation5] sm:$0xff] %vm381_vm1, %v3469_v14  ;;  %399 = vst.msk [vmem:[#allocation5 + $0x8] sm:$0xff] %vm381_vm1, %v3469_v14 }
  0x2a   : > { %400 = vst.msk [vmem:[#allocation5 + $0x10] sm:$0xff] %vm381_vm1, %v3469_v14  ;;  %401 = vst.msk [vmem:[#allocation5 + $0x18] sm:$0xff] %vm381_vm1, %v3469_v14 }
  0x2b   : > { %402 = vst.msk [vmem:[#allocation5 + $0x20] sm:$0xff] %vm381_vm1, %v3469_v14  ;;  %403 = vst.msk [vmem:[#allocation5 + $0x28] sm:$0xff] %vm381_vm1, %v3469_v14 }
  0x2c   : > { %404 = vst.msk [vmem:[#allocation5 + $0x30] sm:$0xff] %vm381_vm1, %v3469_v14  ;;  %405 = vst.msk [vmem:[#allocation5 + $0x38] sm:$0xff] %vm381_vm1, %v3469_v14 }
  0x2d   : > { %406 = vst.msk [vmem:[#allocation5 + $0x40] sm:$0xff] %vm381_vm1, %v3469_v14  ;;  %407 = vst.msk [vmem:[#allocation5 + $0x48] sm:$0xff] %vm381_vm1, %v3469_v14 }
  0x2e   : > { %408 = vst.msk [vmem:[#allocation5 + $0x50] sm:$0xff] %vm381_vm1, %v3469_v14  ;;  %409 = vst.msk [vmem:[#allocation5 + $0x58] sm:$0xff] %vm381_vm1, %v3469_v14 }
  0x2f   : > { %410 = vst.msk [vmem:[#allocation5 + $0x60] sm:$0xff] %vm381_vm1, %v3469_v14  ;;  %411 = vst.msk [vmem:[#allocation5 + $0x68] sm:$0xff] %vm381_vm1, %v3469_v14 }
  0x30   : > { %412 = vst.msk [vmem:[#allocation5 + $0x70] sm:$0xff] %vm381_vm1, %v3469_v14  ;;  %413 = vst.msk [vmem:[#allocation5 + $0x78] sm:$0xff] %vm381_vm1, %v3469_v14 }
  0x31   : > { %414 = vst.msk [vmem:[#allocation6] sm:$0xff] %vm381_vm1, %v3469_v14  ;;  %415 = vst.msk [vmem:[#allocation6 + $0x8] sm:$0xff] %vm381_vm1, %v3469_v14 }
  0x32   : > { %416 = vst.msk [vmem:[#allocation6 + $0x10] sm:$0xff] %vm381_vm1, %v3469_v14  ;;  %417 = vst.msk [vmem:[#allocation6 + $0x18] sm:$0xff] %vm381_vm1, %v3469_v14 }
  0x33   : > { %418 = vst.msk [vmem:[#allocation6 + $0x20] sm:$0xff] %vm381_vm1, %v3469_v14  ;;  %419 = vst.msk [vmem:[#allocation6 + $0x28] sm:$0xff] %vm381_vm1, %v3469_v14 }
  0x34   : > { %420 = vst.msk [vmem:[#allocation6 + $0x30] sm:$0xff] %vm381_vm1, %v3469_v14  ;;  %421 = vst.msk [vmem:[#allocation6 + $0x38] sm:$0xff] %vm381_vm1, %v3469_v14 }
  0x35   : > { %422 = vst.msk [vmem:[#allocation6 + $0x40] sm:$0xff] %vm381_vm1, %v3469_v14  ;;  %423 = vst.msk [vmem:[#allocation6 + $0x48] sm:$0xff] %vm381_vm1, %v3469_v14 }
  0x36   : > { %424 = vst.msk [vmem:[#allocation6 + $0x50] sm:$0xff] %vm381_vm1, %v3469_v14  ;;  %425 = vst.msk [vmem:[#allocation6 + $0x58] sm:$0xff] %vm381_vm1, %v3469_v14 }
  0x37   : > { %426 = vst.msk [vmem:[#allocation6 + $0x60] sm:$0xff] %vm381_vm1, %v3469_v14  ;;  %427 = vst.msk [vmem:[#allocation6 + $0x68] sm:$0xff] %vm381_vm1, %v3469_v14 }
  0x38   : > { %428 = vst.msk [vmem:[#allocation6 + $0x70] sm:$0xff] %vm381_vm1, %v3469_v14  ;;  %429 = vst.msk [vmem:[#allocation6 + $0x78] sm:$0xff] %vm381_vm1, %v3469_v14 }
  0x39   : > { %430 = vst.msk [vmem:[#allocation7] sm:$0xff] %vm381_vm1, %v3469_v14  ;;  %431 = vst.msk [vmem:[#allocation7 + $0x8] sm:$0xff] %vm381_vm1, %v3469_v14 }
  0x3a   : > { %432 = vst.msk [vmem:[#allocation7 + $0x10] sm:$0xff] %vm381_vm1, %v3469_v14  ;;  %433 = vst.msk [vmem:[#allocation7 + $0x18] sm:$0xff] %vm381_vm1, %v3469_v14 }
  0x3b   : > { %434 = vst.msk [vmem:[#allocation7 + $0x20] sm:$0xff] %vm381_vm1, %v3469_v14  ;;  %435 = vst.msk [vmem:[#allocation7 + $0x28] sm:$0xff] %vm381_vm1, %v3469_v14 }
  0x3c   : > { %436 = vst.msk [vmem:[#allocation7 + $0x30] sm:$0xff] %vm381_vm1, %v3469_v14  ;;  %437 = vst.msk [vmem:[#allocation7 + $0x38] sm:$0xff] %vm381_vm1, %v3469_v14 }
  0x3d   : > { %438 = vst.msk [vmem:[#allocation7 + $0x40] sm:$0xff] %vm381_vm1, %v3469_v14  ;;  %439 = vst.msk [vmem:[#allocation7 + $0x48] sm:$0xff] %vm381_vm1, %v3469_v14 }
  0x3e   : > { %440 = vst.msk [vmem:[#allocation7 + $0x50] sm:$0xff] %vm381_vm1, %v3469_v14  ;;  %441 = vst.msk [vmem:[#allocation7 + $0x58] sm:$0xff] %vm381_vm1, %v3469_v14 }
  0x3f   : > { %442 = vst.msk [vmem:[#allocation7 + $0x60] sm:$0xff] %vm381_vm1, %v3469_v14  ;;  %443 = vst.msk [vmem:[#allocation7 + $0x68] sm:$0xff] %vm381_vm1, %v3469_v14 }
  0x40   : > { %444 = vst.msk [vmem:[#allocation7 + $0x70] sm:$0xff] %vm381_vm1, %v3469_v14  ;;  %445 = vst.msk [vmem:[#allocation7 + $0x78] sm:$0xff] %vm381_vm1, %v3469_v14 }
  0x41   : > { %353 = vst.msk [vmem:[#allocation2 + $0x20] sm:$0xff] %vm348_vm0, %v3585_v11  ;;  %354 = vst.msk [vmem:[#allocation2 + $0x28] sm:$0xff] %vm348_vm0, %v3587_v12 }
  0x42   : > { %355 = vst.msk [vmem:[#allocation2 + $0x30] sm:$0xff] %vm348_vm0, %v338_v18  ;;  %356 = vst.msk [vmem:[#allocation2 + $0x38] sm:$0xff] %vm348_vm0, %v339_v19 }
  0x43   : > { %357 = vst.msk [vmem:[#allocation2 + $0x40] sm:$0xff] %vm348_vm0, %v340_v20  ;;  %358 = vst.msk [vmem:[#allocation2 + $0x48] sm:$0xff] %vm348_vm0, %v341_v24 }
  0x44   : > { %359 = vst.msk [vmem:[#allocation2 + $0x50] sm:$0xff] %vm348_vm0, %v342_v25  ;;  %360 = vst.msk [vmem:[#allocation2 + $0x58] sm:$0xff] %vm348_vm0, %v343_v26 }
  0x45   : > { %361 = vst.msk [vmem:[#allocation2 + $0x60] sm:$0xff] %vm348_vm0, %v344_v30  ;;  %362 = vst.msk [vmem:[#allocation2 + $0x68] sm:$0xff] %vm348_vm0, %v345_v31 }
  0x46   : > { %363 = vst.msk [vmem:[#allocation2 + $0x70] sm:$0xff] %vm348_vm0, %v346_v32  ;;  %364 = vst.msk [vmem:[#allocation2 + $0x78] sm:$0xff] %vm348_vm0, %v347_v34 }
  0x47 PF: > { %v462_v35 = vld [vmem:[%s3549_s9] sm:$0xff]  ;;  %v463_v36 = vld [vmem:[%s3549_s9 + $0x8] sm:$0xff]  ;;  %vm478_vm2 = vcmask 261120   ;;  %v464_v37 = vld [vmem:[%s3549_s9 + $0x10] sm:$0xff]  ;;  %v3470_v22 = vmov 0   ;;  %vm4850_vm4 = vcmask 7168  }
  0x48   : > { %v3058_v38 = vpack.c.bf16 %v463_v36, %v462_v35  ;;  %vm3684_vm3 = vmpackc.low %vm478_vm2, %vm478_vm2  ;;  %v465_v40 = vld [vmem:[%s3549_s9 + $0x18] sm:$0xff]  ;;  %v466_v43 = vld [vmem:[%s3549_s9 + $0x20] sm:$0xff]  ;;  %3265 = vset.pattern.permute.xlu0 %v3470_v22  ;;  %3266 = vset.pattern.permute.xlu1 %v3470_v22  ;;  %s4182_s7 = sshll.u32 %s3449_s18, 7  ;;  %s4185_s8 = sshll.u32 %s3453_s19, 7 }
  0x49   : > { %v3064_v41 = vpack.c.bf16 %v465_v40, %v464_v37  ;;  %v467_v44 = vld [vmem:[%s3549_s9 + $0x28] sm:$0xff]  ;;  %v468_v46 = vld [vmem:[%s3549_s9 + $0x30] sm:$0xff]  ;;  %v469_v47 = vld [vmem:[%s3549_s9 + $0x38] sm:$0xff]  ;;  %s2705_s10 = sadd.s32 128, %s4182_s7 }
  0x4a   : > { %3060 = vmatprep.subr.msk.bf16.mxu0 %vm3684_vm3, %v3058_v38  ;;  %v3070_v45 = vpack.c.bf16 %v467_v44, %v466_v43  ;;  %v3076_v48 = vpack.c.bf16 %v469_v47, %v468_v46  ;;  %v470_v49 = vld [vmem:[%s3549_s9 + $0x40] sm:$0xff]  ;;  %v471_v50 = vld [vmem:[%s3549_s9 + $0x48] sm:$0xff]  ;;  %v472_v52 = vld [vmem:[%s3549_s9 + $0x50] sm:$0xff]  ;;  %p4195_p10 = scmp.gt.s32.totalorder %s2705_s10, %s4185_s8 }
  0x4b   : > { %3063 = vmatpush3.bf16.xpose.msk.msra.mxu0 %vm3684_vm3, %v3058_v38  ;;  %v3082_v51 = vpack.c.bf16 %v471_v50, %v470_v49  ;;  %v473_v53 = vld [vmem:[%s3549_s9 + $0x58] sm:$0xff]  ;;  %v474_v55 = vld [vmem:[%s3549_s9 + $0x60] sm:$0xff]  ;;  %v475_v56 = vld [vmem:[%s3549_s9 + $0x68] sm:$0xff] }
  0x4c   : > { %3066 = vmatprep.subr.msk.bf16.mxu0 %vm3684_vm3, %v3064_v41  ;;  %v3088_v54 = vpack.c.bf16 %v473_v53, %v472_v52  ;;  %v3094_v57 = vpack.c.bf16 %v475_v56, %v474_v55  ;;  %v476_v58 = vld [vmem:[%s3549_s9 + $0x70] sm:$0xff]  ;;  %v477_v59 = vld [vmem:[%s3549_s9 + $0x78] sm:$0xff]  ;;  %v450_v0 = vld [vmem:[#allocation2 + $0x20] sm:$0xff]  ;;  %s2703_s9 = sadd.s32 128, %s4185_s8 }
  0x4d   : > { %v3100_v60 = vpack.c.bf16 %v477_v59, %v476_v58  ;;  %v448_v62 = vld [vmem:[#allocation2 + $0x10] sm:$0xff]  ;;  %v449_v63 = vld [vmem:[#allocation2 + $0x18] sm:$0xff]  ;;  %v451_v1 = vld [vmem:[#allocation2 + $0x28] sm:$0xff]  ;;  %p4190_p9 = scmp.lt.s32.totalorder %s4182_s7, %s2703_s9 }
  0x4e   : > { %v446_v42 = vld [vmem:[#allocation2] sm:$0xff]  ;;  %v447_v61 = vld [vmem:[#allocation2 + $0x8] sm:$0xff]  ;;  %v452_v2 = vld [vmem:[#allocation2 + $0x30] sm:$0xff] }
  0x4f   : > { %2866 = vmatprep.mubr.msk.f32.mxu0 %vm478_vm2, %v446_v42  ;;  %v453_v3 = vld [vmem:[#allocation2 + $0x38] sm:$0xff]  ;;  %v454_v4 = vld [vmem:[#allocation2 + $0x40] sm:$0xff]  ;;  %v455_v5 = vld [vmem:[#allocation2 + $0x48] sm:$0xff]  ;;  %p1729_p11 = pnand %p4195_p10, %p4190_p9 }
  0x50   : > { %v456_v6 = vld [vmem:[#allocation2 + $0x50] sm:$0xff]  ;;  %v457_v7 = vld [vmem:[#allocation2 + $0x58] sm:$0xff]  ;;  %v458_v8 = vld [vmem:[#allocation2 + $0x60] sm:$0xff] }
  0x51   : > { %v459_v9 = vld [vmem:[#allocation2 + $0x68] sm:$0xff]  ;;  %v460_v10 = vld [vmem:[#allocation2 + $0x70] sm:$0xff]  ;;  %v461_v11 = vld [vmem:[#allocation2 + $0x78] sm:$0xff] }
  0x52   : > { %v1061_v29 = vld [vmem:[#allocation3] sm:$0xff]  ;;  %v1062_v30 = vld [vmem:[#allocation3 + $0x8] sm:$0xff]  ;;  %v1063_v31 = vld [vmem:[#allocation3 + $0x10] sm:$0xff] }
  0x53   : > { %3069 = vmatpush3.bf16.xpose.msk.msra.mxu0 %vm3684_vm3, %v3064_v41  ;;  %v3797_v32 = vpack.c.bf16 %v1062_v30, %v1061_v29  ;;  %v1064_v33 = vld [vmem:[#allocation3 + $0x18] sm:$0xff]  ;;  %v1065_v35 = vld [vmem:[#allocation3 + $0x20] sm:$0xff]  ;;  %v1066_v36 = vld [vmem:[#allocation3 + $0x28] sm:$0xff] }
  0x54   : > { %3072 = vmatprep.subr.msk.bf16.mxu0 %vm3684_vm3, %v3070_v45  ;;  %v3799_v34 = vpack.c.bf16 %v1064_v33, %v1063_v31  ;;  %v3806_v37 = vpack.c.bf16 %v1066_v36, %v1065_v35  ;;  %v1067_v38 = vld [vmem:[#allocation3 + $0x30] sm:$0xff]  ;;  %v1068_v39 = vld [vmem:[#allocation3 + $0x38] sm:$0xff]  ;;  %v3821_v41 = vld [vmem:[#allocation4] sm:$0xff] }
  0x55   : > { %3107 = vmatprep.subr.bf16.mxu1 %v3797_v32  ;;  %v3812_v40 = vpack.c.bf16 %v1068_v39, %v1067_v38  ;;  %v3826_v44 = vld [vmem:[#allocation4 + $0x18] sm:$0xff]  ;;  %v1070_v49 = vld [vmem:[#allocation3 + $0x48] sm:$0xff]  ;;  %v3849_v56 = vld [vmem:[#allocation4 + $0x20] sm:$0xff] }
  0x56   : > { %3109 = vmatpush3.bf16.msra.mxu1 %v3797_v32  ;;  %v1071_v59 = vld [vmem:[#allocation3 + $0x50] sm:$0xff]  ;;  %v3899_v30 = vld [vmem:[#allocation4 + $0x40] sm:$0xff]  ;;  %v1076_v36 = vld [vmem:[#allocation3 + $0x78] sm:$0xff] }
  0x57   : > { %3111 = vmatprep.subr.bf16.mxu1 %v3799_v34  ;;  %v1075_v35 = vld [vmem:[#allocation3 + $0x70] sm:$0xff]  ;;  %v3979_v33 = vld [vmem:[#allocation4 + $0x78] sm:$0xff]  ;;  %v724_v46 = vld [vmem:[%s3554_s12 + $0x20] sm:$0xff] }
  0x58   : > { %4857 = vst [vmem:[#allocation12_spill] sm:$0xff] %v3979_v33  ;;  %v727_v29 = vld [vmem:[%s3554_s12 + $0x38] sm:$0xff]  ;;  %v722_v55 = vld [vmem:[%s3554_s12 + $0x10] sm:$0xff] }
  0x5a   : > { %3113 = vmatpush3.bf16.msra.mxu1 %v3799_v34 }
  0x5b   : > { %3075 = vmatpush3.bf16.xpose.msk.msra.mxu0 %vm3684_vm3, %v3070_v45  ;;  %3115 = vmatprep.subr.bf16.mxu1 %v3806_v37  ;;  %v3828_v45 = vld [vmem:[#allocation4 + $0x8] sm:$0xff] }
  0x5c   : > { %3078 = vmatprep.subr.msk.bf16.mxu0 %vm3684_vm3, %v3076_v48 }
  0x5e   : > { %3117 = vmatpush3.bf16.msra.mxu1 %v3806_v37 }
  0x5f   : > { %3119 = vmatprep.subr.bf16.mxu1 %v3812_v40 }
  0x62   : > { %3121 = vmatpush3.bf16.msra.mxu1 %v3812_v40 }
  0x63   : > { %3081 = vmatpush3.bf16.xpose.msk.msra.mxu0 %vm3684_vm3, %v3076_v48  ;;  %v1069_v48 = vld [vmem:[#allocation3 + $0x40] sm:$0xff] }
  0x64   : > { %3084 = vmatprep.subr.msk.bf16.mxu0 %vm3684_vm3, %v3082_v51  ;;  %v3838_v52 = vpack.c.bf16 %v1070_v49, %v1069_v48 }
  0x66   : > { %3123 = vmatprep.subr.bf16.mxu1 %v3838_v52 }
  0x67   : > { %3125 = vmatpush3.bf16.msra.mxu1 %v3838_v52 }
  0x6b   : > { %3087 = vmatpush3.bf16.xpose.msk.msra.mxu0 %vm3684_vm3, %v3082_v51 }
  0x6c   : > { %3090 = vmatprep.subr.msk.bf16.mxu0 %vm3684_vm3, %v3088_v54 }
  0x73   : > { %3093 = vmatpush3.bf16.xpose.msk.msra.mxu0 %vm3684_vm3, %v3088_v54  ;;  %v3843_v54 = vld [vmem:[#allocation4 + $0x10] sm:$0xff] }
  0x74   : > { %3096 = vmatprep.subr.msk.bf16.mxu0 %vm3684_vm3, %v3094_v57 }
  0x7b   : > { %3099 = vmatpush3.bf16.xpose.msk.msra.mxu0 %vm3684_vm3, %v3094_v57  ;;  %v726_v57 = vld [vmem:[%s3554_s12 + $0x30] sm:$0xff] }
  0x7c   : > { %3102 = vmatprep.subr.msk.bf16.mxu0 %vm3684_vm3, %v3100_v60 }
  0x83   : > { %3105 = vmatpush3.bf16.xpose.msk.msra.mxu0 %vm3684_vm3, %v3100_v60  ;;  %v1072_v60 = vld [vmem:[#allocation3 + $0x58] sm:$0xff] }
  0x84   : > { %3171 = vmatprep.subr.bf16.mxu0 %v3797_v32 }
  0x8a   : > { %2867 = vmatmul.mubr.msk.f32.vlgmr.msra.gmra.mrb[0].mxu0 %vm478_vm2, %v447_v61 }
  0x8b   : > { %2869 = vmatprep.mubr.msk.f32.mxu0 %vm478_vm2, %v448_v62  ;;  %3173 = vmatpush3.bf16.msra.mxu0 %v3797_v32 }
  0x8c   : > { %3175 = vmatprep.subr.bf16.mxu0 %v3799_v34 }
  0x8e   : > { %2870 = vmatmul.mubr.msk.f32.gmra.mrb[2].mxu0 %vm478_vm2, %v449_v63  ;;  %v3862_v63 = vpack.c.bf16 %v1072_v60, %v1071_v59 }
  0x8f   : > { %2872 = vmatprep.mubr.msk.f32.mxu0 %vm478_vm2, %v450_v0  ;;  %3177 = vmatpush3.bf16.msra.mxu0 %v3799_v34  ;;  %v3865_v0 = vld [vmem:[#allocation4 + $0x28] sm:$0xff] }
  0x90   : > { %3179 = vmatprep.subr.bf16.mxu0 %v3806_v37  ;;  %3127 = vmatprep.subr.bf16.mxu1 %v3862_v63 }
  0x91   : > { %3129 = vmatpush3.bf16.msra.mxu1 %v3862_v63 }
  0x92   : > { %2873 = vmatmul.mubr.msk.f32.gmra.mrb[4].mxu0 %vm478_vm2, %v451_v1 }
  0x93   : > { %2875 = vmatprep.mubr.msk.f32.mxu0 %vm478_vm2, %v452_v2  ;;  %3181 = vmatpush3.bf16.msra.mxu0 %v3806_v37  ;;  %v720_v2 = vld [vmem:[%s3554_s12] sm:$0xff] }
  0x94   : > { %3183 = vmatprep.subr.bf16.mxu0 %v3812_v40 }
  0x96   : > { %2876 = vmatmul.mubr.msk.f32.gmra.mrb[6].mxu0 %vm478_vm2, %v453_v3  ;;  %v3874_v3 = vld [vmem:[#allocation4 + $0x30] sm:$0xff] }
  0x97   : > { %2878 = vmatprep.mubr.msk.f32.mxu0 %vm478_vm2, %v454_v4  ;;  %3185 = vmatpush3.bf16.msra.mxu0 %v3812_v40 }
  0x98   : > { %3187 = vmatprep.subr.bf16.mxu0 %v3838_v52 }
  0x9a   : > { %2879 = vmatmul.mubr.msk.f32.gmra.mrb[8].mxu0 %vm478_vm2, %v455_v5  ;;  %v725_v5 = vld [vmem:[%s3554_s12 + $0x28] sm:$0xff] }
  0x9b   : > { %2881 = vmatprep.mubr.msk.f32.mxu0 %vm478_vm2, %v456_v6  ;;  %3189 = vmatpush3.bf16.msra.mxu0 %v3838_v52  ;;  %v1073_v6 = vld [vmem:[#allocation3 + $0x60] sm:$0xff] }
  0x9c   : > { %3191 = vmatprep.subr.bf16.mxu0 %v3862_v63 }
  0x9e   : > { %2882 = vmatmul.mubr.msk.f32.gmra.mrb[10].mxu0 %vm478_vm2, %v457_v7  ;;  %v1074_v7 = vld [vmem:[#allocation3 + $0x68] sm:$0xff] }
  0x9f   : > { %2884 = vmatprep.mubr.msk.f32.mxu0 %vm478_vm2, %v458_v8  ;;  %3193 = vmatpush3.bf16.msra.mxu0 %v3862_v63 }
  0xa2   : > { %2885 = vmatmul.mubr.msk.f32.gmra.mrb[12].mxu0 %vm478_vm2, %v459_v9 }
  0xa3   : > { %2887 = vmatprep.mubr.msk.f32.mxu0 %vm478_vm2, %v460_v10  ;;  %v3887_v10 = vpack.c.bf16 %v1074_v7, %v1073_v6 }
  0xa5   : > { %3131 = vmatprep.subr.bf16.mxu1 %v3887_v10  ;;  %3195 = vmatprep.subr.bf16.mxu0 %v3887_v10 }
  0xa6   : > { %2888 = vmatmul.mubr.msk.f32.gmra.mrb[14].mxu0 %vm478_vm2, %v461_v11  ;;  %v3890_v11 = vld [vmem:[#allocation4 + $0x38] sm:$0xff]  ;;  %3133 = vmatpush3.bf16.msra.mxu1 %v3887_v10 }
  0xa7   : > { %3197 = vmatpush3.bf16.msra.mxu0 %v3887_v10 }
 0x15d   : > { %v3749_v12 = vpop.f32.mrb[0].mxu0 }
 0x15e   : > { %v3751_v13 = vpop.f32.mrb[1].mxu0 }
 0x15f   : > { %821 = vmax.xlane.f32.xlu0 %v3751_v13 }
 0x161   : > { %v3754_v14 = vpop.f32.mrb[2].mxu0 }
 0x162   : > { %827 = vmax.xlane.f32.xlu1 %v3754_v14  ;;  %v3757_v15 = vpop.f32.mrb[3].mxu0 }
 0x163   : > { %823 = vmax.xlane.f32.xlu0 %v3749_v12 }
 0x165   : > { %v3760_v16 = vpop.f32.mrb[4].mxu0 }
 0x166   : > { %825 = vmax.xlane.f32.xlu1 %v3757_v15  ;;  %v3763_v17 = vpop.f32.mrb[5].mxu0 }
 0x167   : > { %829 = vmax.xlane.f32.xlu0 %v3763_v17 }
 0x169   : > { %v3766_v18 = vpop.f32.mrb[6].mxu0 }
 0x16a   : > { %831 = vmax.xlane.f32.xlu1 %v3760_v16  ;;  %v3769_v19 = vpop.f32.mrb[7].mxu0 }
 0x16b   : > { %833 = vmax.xlane.f32.xlu0 %v3769_v19 }
 0x16d   : > { %v3772_v20 = vpop.f32.mrb[8].mxu0 }
 0x16e   : > { %835 = vmax.xlane.f32.xlu1 %v3766_v18  ;;  %v3775_v21 = vpop.f32.mrb[9].mxu0 }
 0x16f   : > { %837 = vmax.xlane.f32.xlu0 %v3775_v21 }
 0x171   : > { %v3778_v23 = vpop.f32.mrb[10].mxu0 }
 0x172   : > { %839 = vmax.xlane.f32.xlu1 %v3772_v20  ;;  %v3781_v24 = vpop.f32.mrb[11].mxu0 }
 0x173   : > { %841 = vmax.xlane.f32.xlu0 %v3781_v24 }
 0x175   : > { %v3784_v25 = vpop.f32.mrb[12].mxu0 }
 0x176   : > { %843 = vmax.xlane.f32.xlu1 %v3778_v23  ;;  %v3787_v26 = vpop.f32.mrb[13].mxu0 }
 0x177   : > { %845 = vmax.xlane.f32.xlu0 %v3787_v26 }
 0x179   : > { %v3790_v27 = vpop.f32.mrb[14].mxu0 }
 0x17a   : > { %847 = vmax.xlane.f32.xlu1 %v3784_v25  ;;  %v3793_v28 = vpop.f32.mrb[15].mxu0 }
 0x17b   : > { %849 = vmax.xlane.f32.xlu0 %v3793_v28 }
 0x17e   : > { %851 = vmax.xlane.f32.xlu1 %v3790_v27 }
 0x1ec   : > { %v822_v42 = vpop.xlane.xlu0 %821 }
 0x1ed   : > { %v3824_v43 = vmax.f32 %v3821_v41, %v822_v42  ;;  %v3912_v42 = vpack.c.bf16 %v1076_v36, %v1075_v35  ;;  %v3969_v35 = vld [vmem:[#allocation4 + $0x70] sm:$0xff] }
 0x1ee   : > { %4855 = vst [vmem:[#allocation10_spill] sm:$0xff] %v3969_v35 }
 0x1ef   : > { %1705 = vst.msk [vmem:[#allocation4] sm:$0xff] %vm4850_vm4, %v3824_v43  ;;  %v828_v47 = vpop.xlane.xlu1 %827  ;;  %919 = vperm.xlu0 %3265, %v3824_v43   ;;  %3135 = vmatprep.subr.bf16.mxu1 %v3912_v42 }
 0x1f0   : > { %v3836_v50 = vmax.f32 %v3826_v44, %v828_v47  ;;  %v824_v51 = vpop.xlane.xlu0 %823  ;;  %v3915_v47 = vld [vmem:[#allocation4 + $0x48] sm:$0xff]  ;;  %3199 = vmatprep.subr.bf16.mxu0 %v3912_v42  ;;  %3137 = vmatpush3.bf16.msra.mxu1 %v3912_v42 }
 0x1f1   : > { %v3841_v53 = vmax.f32 %v3828_v45, %v824_v51  ;;  %v3924_v51 = vld [vmem:[#allocation4 + $0x50] sm:$0xff]  ;;  %3139 = vmatprep.subr.bf16.mxu1 %v3797_v32  ;;  %3201 = vmatpush3.bf16.msra.mxu0 %v3912_v42 }
 0x1f2   : > { %1708 = vst.msk [vmem:[#allocation4 + $0x18] sm:$0xff] %vm4850_vm4, %v3836_v50 }
 0x1f3   : > { %1706 = vst.msk [vmem:[#allocation4 + $0x8] sm:$0xff] %vm4850_vm4, %v3841_v53  ;;  %v826_v58 = vpop.xlane.xlu1 %825  ;;  %924 = vperm.xlu1 %3266, %v3841_v53  }
 0x1f4   : > { %v3860_v61 = vmax.f32 %v3843_v54, %v826_v58  ;;  %v830_v62 = vpop.xlane.xlu0 %829 }
 0x1f5   : > { %v3868_v1 = vmax.f32 %v3849_v56, %v830_v62 }
 0x1f6   : > { %1707 = vst.msk [vmem:[#allocation4 + $0x10] sm:$0xff] %vm4850_vm4, %v3860_v61 }
 0x1f7   : > { %v832_v4 = vpop.xlane.xlu1 %831  ;;  %934 = vperm.xlu1 %3266, %v3836_v50   ;;  %1709 = vst.msk [vmem:[#allocation4 + $0x20] sm:$0xff] %vm4850_vm4, %v3868_v1 }
 0x1f8   : > { %v3885_v8 = vmax.f32 %v3865_v0, %v832_v4  ;;  %v834_v9 = vpop.xlane.xlu0 %833  ;;  %v3939_v4 = vld [vmem:[#allocation4 + $0x58] sm:$0xff] }
 0x1f9   : > { %v3893_v22 = vmax.f32 %v3874_v3, %v834_v9  ;;  %v3949_v9 = vld [vmem:[#allocation4 + $0x60] sm:$0xff] }
 0x1fa   : > { %1710 = vst.msk [vmem:[#allocation4 + $0x28] sm:$0xff] %vm4850_vm4, %v3885_v8  ;;  %4853 = vst [vmem:[#allocation8_spill] sm:$0xff] %v3949_v9 }
 0x1fb   : > { %v836_v31 = vpop.xlane.xlu1 %835  ;;  %929 = vperm.xlu1 %3266, %v3860_v61   ;;  %1711 = vst.msk [vmem:[#allocation4 + $0x30] sm:$0xff] %vm4850_vm4, %v3893_v22 }
 0x1fc   : > { %v3910_v38 = vmax.f32 %v3890_v11, %v836_v31  ;;  %v838_v39 = vpop.xlane.xlu0 %837 }
 0x1fd   : > { %v3918_v48 = vmax.f32 %v3899_v30, %v838_v39 }
 0x1fe   : > { %1712 = vst.msk [vmem:[#allocation4 + $0x38] sm:$0xff] %vm4850_vm4, %v3910_v38 }
 0x1ff   : > { %v840_v58 = vpop.xlane.xlu1 %839  ;;  %944 = vperm.xlu1 %3266, %v3885_v8   ;;  %1713 = vst.msk [vmem:[#allocation4 + $0x40] sm:$0xff] %vm4850_vm4, %v3918_v48 }
 0x200   : > { %v3935_v60 = vmax.f32 %v3915_v47, %v840_v58  ;;  %v842_v62 = vpop.xlane.xlu0 %841  ;;  %v3959_v58 = vld [vmem:[#allocation4 + $0x68] sm:$0xff] }
 0x201   : > { %v3942_v6 = vmax.f32 %v3924_v51, %v842_v62 }
 0x202   : > { %1714 = vst.msk [vmem:[#allocation4 + $0x48] sm:$0xff] %vm4850_vm4, %v3935_v60  ;;  %964 = vperm.xlu0 %3265, %v3935_v60  }
 0x203   : > { %v844_v31 = vpop.xlane.xlu1 %843  ;;  %939 = vperm.xlu1 %3266, %v3868_v1   ;;  %1715 = vst.msk [vmem:[#allocation4 + $0x50] sm:$0xff] %vm4850_vm4, %v3942_v6 }
 0x204   : > { %v3957_v36 = vmax.f32 %v3939_v4, %v844_v31  ;;  %v846_v39 = vpop.xlane.xlu0 %845  ;;  %v721_v31 = vld [vmem:[%s3554_s12 + $0x8] sm:$0xff] }
 0x205   : > { %v3962_v62 = vmax.f32 %v3949_v9, %v846_v39 }
 0x206   : > { %1716 = vst.msk [vmem:[#allocation4 + $0x58] sm:$0xff] %vm4850_vm4, %v3957_v36  ;;  %974 = vperm.xlu0 %3265, %v3957_v36  }
 0x207   : > { %4854 = vst [vmem:[#allocation9_spill] sm:$0xff] %v3962_v62  ;;  %v848_v7 = vpop.xlane.xlu1 %847  ;;  %954 = vperm.xlu1 %3266, %v3910_v38   ;;  %1717 = vst.msk [vmem:[#allocation4 + $0x60] sm:$0xff] %vm4850_vm4, %v3962_v62 }
 0x208   : > { %v3977_v39 = vmax.f32 %v3959_v58, %v848_v7  ;;  %v850_v59 = vpop.xlane.xlu0 %849 }
 0x209   : > { %v3982_v49 = vmax.f32 %v3969_v35, %v850_v59  ;;  %v728_v35 = vld [vmem:[%s3554_s12 + $0x40] sm:$0xff] }
 0x20a   : > { %4856 = vst [vmem:[#allocation11_spill] sm:$0xff] %v3977_v39  ;;  %1718 = vst.msk [vmem:[#allocation4 + $0x68] sm:$0xff] %vm4850_vm4, %v3977_v39  ;;  %984 = vperm.xlu0 %3265, %v3977_v39  }
 0x20b   : > { %4858 = vst [vmem:[#allocation13_spill] sm:$0xff] %v3982_v49  ;;  %949 = vperm.xlu1 %3266, %v3893_v22   ;;  %v852_v7 = vpop.xlane.xlu1 %851  ;;  %1719 = vst.msk [vmem:[#allocation4 + $0x70] sm:$0xff] %vm4850_vm4, %v3982_v49 }
 0x20c   : > { %v3995_v59 = vmax.f32 %v3979_v33, %v852_v7  ;;  %v723_v7 = vld [vmem:[%s3554_s12 + $0x18] sm:$0xff] }
 0x20e   : > { %4859 = vst [vmem:[#allocation14_spill] sm:$0xff] %v3995_v59  ;;  %1720 = vst.msk [vmem:[#allocation4 + $0x78] sm:$0xff] %vm4850_vm4, %v3995_v59  ;;  %994 = vperm.xlu0 %3265, %v3995_v59  }
 0x20f   : > { %959 = vperm.xlu1 %3266, %v3918_v48  }
 0x212   : > { %741 = vperm.xlu0 %3265, %v721_v31   ;;  %v729_v31 = vld [vmem:[%s3554_s12 + $0x48] sm:$0xff] }
 0x213   : > { %969 = vperm.xlu1 %3266, %v3942_v6  }
 0x216   : > { %747 = vperm.xlu0 %3265, %v723_v7   ;;  %v731_v7 = vld [vmem:[%s3554_s12 + $0x58] sm:$0xff] }
 0x217   : > { %979 = vperm.xlu1 %3266, %v3962_v62  }
 0x21a   : > { %753 = vperm.xlu0 %3265, %v725_v5   ;;  %v733_v5 = vld [vmem:[%s3554_s12 + $0x68] sm:$0xff] }
 0x21b   : > { %989 = vperm.xlu1 %3266, %v3982_v49   ;;  %v735_v49 = vld [vmem:[%s3554_s12 + $0x78] sm:$0xff] }
 0x21e   : > { %759 = vperm.xlu0 %3265, %v727_v29   ;;  %v732_v29 = vld [vmem:[%s3554_s12 + $0x60] sm:$0xff] }
 0x21f   : > { %738 = vperm.xlu1 %3266, %v720_v2   ;;  %v730_v2 = vld [vmem:[%s3554_s12 + $0x50] sm:$0xff] }
 0x222   : > { %765 = vperm.xlu0 %3265, %v729_v31   ;;  %v734_v31 = vld [vmem:[%s3554_s12 + $0x70] sm:$0xff] }
 0x223   : > { %744 = vperm.xlu1 %3266, %v722_v55  }
 0x226   : > { %771 = vperm.xlu0 %3265, %v731_v7  }
 0x227   : > { %750 = vperm.xlu1 %3266, %v724_v46  }
 0x22a   : > { %777 = vperm.xlu0 %3265, %v733_v5  }
 0x22b   : > { %756 = vperm.xlu1 %3266, %v726_v57  }
 0x22e   : > { %783 = vperm.xlu0 %3265, %v735_v49  }
 0x22f   : > { %762 = vperm.xlu1 %3266, %v728_v35  }
 0x233   : > { %768 = vperm.xlu1 %3266, %v730_v2  }
 0x237   : > { %774 = vperm.xlu1 %3266, %v732_v29  }
 0x23b   : > { %780 = vperm.xlu1 %3266, %v734_v31  }
 0x26e   : > { %v920_v55 = vpop.permute.xlu0 %919 }
 0x26f   : > { %v997_v59 = vsub.f32 %v3751_v13, %v920_v55 }
 0x271   : > { %v1013_v33 = vmul.f32 1.442695, %v997_v59 }
 0x272   : > { %v925_v7 = vpop.permute.xlu1 %924 }
 0x273   : > { %3267 = vpow2.f32 %v1013_v33  ;;  %v998_v46 = vsub.f32 %v3749_v12, %v925_v7 }
 0x275   : > { %v1015_v5 = vmul.f32 1.442695, %v998_v46 }
 0x276   : > { %v935_v57 = vpop.permute.xlu1 %934 }
 0x277   : > { %3269 = vpow2.f32 %v1015_v5  ;;  %v1000_v49 = vsub.f32 %v3754_v14, %v935_v57 }
 0x279   : > { %v1019_v62 = vmul.f32 1.442695, %v1000_v49 }
 0x27a   : > { %v930_v35 = vpop.permute.xlu1 %929 }
 0x27b   : > { %v999_v2 = vsub.f32 %v3757_v15, %v930_v35 }
 0x27d   : > { %v3268_v29 = vpop.eup %3267  ;;  %v1017_v9 = vmul.f32 1.442695, %v999_v2 }
 0x27e   : > { %v945_v31 = vpop.permute.xlu1 %944  ;;  %2922 = vmatprep.mubr.f32.mxu1 %v3268_v29 }
 0x27f   : > { %3271 = vpow2.f32 %v1017_v9  ;;  %v1002_v59 = vsub.f32 %v3760_v16, %v945_v31 }
 0x280   : > { %3273 = vpow2.f32 %v1019_v62 }
 0x281   : > { %v3270_v33 = vpop.eup %3269  ;;  %v965_v55 = vpop.permute.xlu0 %964  ;;  %v1023_v5 = vmul.f32 1.442695, %v1002_v59 }
 0x282   : > { %v940_v7 = vpop.permute.xlu1 %939  ;;  %2923 = vmatmul.mubr.f32.vlgmr.msra.gmra.mrb[0].mxu1 %v3270_v33  ;;  %v1006_v33 = vsub.f32 %v3772_v20, %v965_v55 }
 0x283   : > { %v1001_v46 = vsub.f32 %v3763_v17, %v940_v7  ;;  %3141 = vmatpush3.bf16.msra.mxu1 %v3797_v32 }
 0x284   : > { %3143 = vmatprep.subr.bf16.mxu1 %v3799_v34 }
 0x285   : > { %v1021_v57 = vmul.f32 1.442695, %v1001_v46  ;;  %v975_v49 = vpop.permute.xlu0 %974 }
 0x286   : > { %v955_v35 = vpop.permute.xlu1 %954  ;;  %v1008_v39 = vsub.f32 %v3778_v23, %v975_v49 }
 0x287   : > { %3275 = vpow2.f32 %v1021_v57  ;;  %3145 = vmatpush3.bf16.msra.mxu1 %v3799_v34  ;;  %v1004_v9 = vsub.f32 %v3766_v18, %v955_v35  ;;  %v1031_v35 = vmul.f32 1.442695, %v1006_v33 }
 0x288   : > { %3277 = vpow2.f32 %v1023_v5  ;;  %3147 = vmatprep.subr.bf16.mxu1 %v3806_v37 }
 0x289   : > { %v3272_v62 = vpop.eup %3271  ;;  %v985_v31 = vpop.permute.xlu0 %984  ;;  %v1027_v7 = vmul.f32 1.442695, %v1004_v9 }
 0x28a   : > { %v3274_v2 = vpop.eup %3273  ;;  %v950_v29 = vpop.permute.xlu1 %949  ;;  %2925 = vmatprep.mubr.f32.mxu1 %v3272_v62  ;;  %v1010_v33 = vsub.f32 %v3784_v25, %v985_v31 }
 0x28b   : > { %v1003_v59 = vsub.f32 %v3769_v19, %v950_v29  ;;  %2926 = vmatmul.mubr.f32.gmra.mrb[2].mxu1 %v3274_v2 }
 0x28c   : > { %3149 = vmatpush3.bf16.msra.mxu1 %v3806_v37 }
 0x28d   : > { %v1025_v46 = vmul.f32 1.442695, %v1003_v59  ;;  %3151 = vmatprep.subr.bf16.mxu1 %v3812_v40  ;;  %v995_v2 = vpop.permute.xlu0 %994 }
 0x28e   : > { %v960_v5 = vpop.permute.xlu1 %959 }
 0x28f   : > { %3279 = vpow2.f32 %v1025_v46  ;;  %v1005_v57 = vsub.f32 %v3775_v21, %v960_v5  ;;  %v1035_v46 = vmul.f32 1.442695, %v1008_v39 }
 0x290   : > { %3281 = vpow2.f32 %v1027_v7  ;;  %3153 = vmatpush3.bf16.msra.mxu1 %v3812_v40 }
 0x291   : > { %v3276_v62 = vpop.eup %3275  ;;  %v1029_v29 = vmul.f32 1.442695, %v1005_v57  ;;  %3155 = vmatprep.subr.bf16.mxu1 %v3838_v52  ;;  %v4045_v5 = vpop.permute.xlu0 %741 }
 0x292   : > { %v3278_v55 = vpop.eup %3277  ;;  %v970_v9 = vpop.permute.xlu1 %969  ;;  %2928 = vmatprep.mubr.f32.mxu1 %v3276_v62  ;;  %v1039_v62 = vmul.f32 1.442695, %v1010_v33 }
 0x293   : > { %3283 = vpow2.f32 %v1029_v29  ;;  %v1007_v59 = vsub.f32 %v3781_v24, %v970_v9  ;;  %2929 = vmatmul.mubr.f32.gmra.mrb[4].mxu1 %v3278_v55  ;;  %v1012_v29 = vsub.f32 %v3790_v27, %v995_v2  ;;  %v4058_v2 = vld [vmem:[%s299_s6] ss:$0 sm:$0xff] }
 0x294   : > { %3285 = vpow2.f32 %v1031_v35  ;;  %3157 = vmatpush3.bf16.msra.mxu1 %v3838_v52  ;;  %vm790_vm6 = vcmp.eq.s32.totalorder %v4045_v5, %v4058_v2 }
 0x295   : > { %v1033_v49 = vmul.f32 1.442695, %v1007_v59  ;;  %3159 = vmatprep.subr.bf16.mxu1 %v3862_v63  ;;  %v1043_v59 = vmul.f32 1.442695, %v1012_v29  ;;  %v748_v33 = vpop.permute.xlu0 %747 }
 0x296   : > { %v980_v7 = vpop.permute.xlu1 %979  ;;  %vm792_vm8 = vcmp.eq.s32.totalorder %v748_v33, %v4058_v2 }
 0x297   : > { %3287 = vpow2.f32 %v1033_v49  ;;  %v1009_v57 = vsub.f32 %v3787_v26, %v980_v7 }
 0x298   : > { %3289 = vpow2.f32 %v1035_v46  ;;  %3161 = vmatpush3.bf16.msra.mxu1 %v3862_v63 }
 0x299   : > { %v3280_v39 = vpop.eup %3279  ;;  %v1037_v31 = vmul.f32 1.442695, %v1009_v57  ;;  %3163 = vmatprep.subr.bf16.mxu1 %v3887_v10 }
 0x29a   : > { %v3282_v35 = vpop.eup %3281  ;;  %v990_v55 = vpop.permute.xlu1 %989  ;;  %2931 = vmatprep.mubr.f32.mxu1 %v3280_v39 }
 0x29b   : > { %3291 = vpow2.f32 %v1037_v31  ;;  %v1011_v9 = vsub.f32 %v3793_v28, %v990_v55  ;;  %2932 = vmatmul.mubr.f32.gmra.mrb[6].mxu1 %v3282_v35  ;;  %v754_v35 = vpop.permute.xlu0 %753 }
 0x29c   : > { %3293 = vpow2.f32 %v1039_v62  ;;  %3165 = vmatpush3.bf16.msra.mxu1 %v3887_v10  ;;  %v3471_v62 = vmov 1.0   ;;  %vm794_vm10 = vcmp.eq.s32.totalorder %v754_v35, %v4058_v2 }
 0x29d   : > { %v3284_v46 = vpop.eup %3283  ;;  %v1041_v49 = vmul.f32 1.442695, %v1011_v9  ;;  %3167 = vmatprep.subr.bf16.mxu1 %v3912_v42 }
 0x29e   : > { %v3286_v7 = vpop.eup %3285  ;;  %v739_v57 = vpop.permute.xlu1 %738  ;;  %2934 = vmatprep.mubr.f32.mxu1 %v3284_v46 }
 0x29f   : > { %3295 = vpow2.f32 %v1041_v49  ;;  %vm789_vm5 = vcmp.eq.s32.totalorder %v739_v57, %v4058_v2  ;;  %2935 = vmatmul.mubr.f32.gmra.mrb[8].mxu1 %v3286_v7  ;;  %v760_v49 = vpop.permute.xlu0 %759 }
 0x2a0   : > { %3297 = vpow2.f32 %v1043_v59  ;;  %3034 = vmatprep.mubr.msk.f32.mxu0 %vm789_vm5, %v3471_v62  ;;  %3169 = vmatpush3.bf16.msra.mxu1 %v3912_v42  ;;  %vm796_vm12 = vcmp.eq.s32.totalorder %v760_v49, %v4058_v2 }
 0x2a1   : > { %v3288_v29 = vpop.eup %3287  ;;  %3035 = vmatmul.mubr.msk.f32.vlgmr.msra.gmra.mrb[16].mxu0 %vm790_vm6, %v3471_v62  ;;  %3202 = vmatprep.subr.bf16.mxu1 %v3797_v32 }
 0x2a2   : > { %v3290_v39 = vpop.eup %3289  ;;  %v745_v31 = vpop.permute.xlu1 %744  ;;  %2937 = vmatprep.mubr.f32.mxu1 %v3288_v29 }
 0x2a3   : > { %vm791_vm7 = vcmp.eq.s32.totalorder %v745_v31, %v4058_v2  ;;  %2938 = vmatmul.mubr.f32.gmra.mrb[10].mxu1 %v3290_v39  ;;  %v766_v5 = vpop.permute.xlu0 %765  ;;  %v4865_v31 = vsub.f32 %v3843_v54, %v3860_v61 }
 0x2a4   : > { %3037 = vmatprep.mubr.msk.f32.mxu0 %vm791_vm7, %v3471_v62  ;;  %vm798_vm14 = vcmp.eq.s32.totalorder %v766_v5, %v4058_v2 }
 0x2a5   : > { %v3292_v55 = vpop.eup %3291  ;;  %3038 = vmatmul.mubr.msk.f32.gmra.mrb[18].mxu0 %vm792_vm8, %v3471_v62  ;;  %v889_v35 = vmul.f32 1.442695, %v4865_v31  ;;  %v4870_v31 = vsub.f32 %v3915_v47, %v3935_v60 }
 0x2a6   : > { %v3294_v9 = vpop.eup %3293  ;;  %v751_v59 = vpop.permute.xlu1 %750  ;;  %2940 = vmatprep.mubr.f32.mxu1 %v3292_v55 }
 0x2a7   : > { %vm793_vm9 = vcmp.eq.s32.totalorder %v751_v59, %v4058_v2  ;;  %2941 = vmatmul.mubr.f32.gmra.mrb[12].mxu1 %v3294_v9  ;;  %v1545_v9 = vld [vmem:[#allocation5 + $0x8] sm:$0xff]  ;;  %v1544_v59 = vld [vmem:[#allocation5] sm:$0xff] }
 0x2a8   : > { %3040 = vmatprep.mubr.msk.f32.mxu0 %vm793_vm9, %v3471_v62 }
 0x2a9   : > { %v3296_v46 = vpop.eup %3295  ;;  %3041 = vmatmul.mubr.msk.f32.gmra.mrb[20].mxu0 %vm794_vm10, %v3471_v62 }
 0x2aa   : > { %v3298_v7 = vpop.eup %3297  ;;  %v757_v29 = vpop.permute.xlu1 %756  ;;  %2943 = vmatprep.mubr.f32.mxu1 %v3296_v46 }
 0x2ab   : > { %vm795_vm11 = vcmp.eq.s32.totalorder %v757_v29, %v4058_v2  ;;  %2944 = vmatmul.mubr.f32.gmra.mrb[14].mxu1 %v3298_v7  ;;  %v4867_v7 = vsub.f32 %v3849_v56, %v3868_v1 }
 0x2ac   : > { %2978 = vmatprep.mubr.msk.f32.mxu1 %vm789_vm5, %v3751_v13  ;;  %3043 = vmatprep.mubr.msk.f32.mxu0 %vm795_vm11, %v3471_v62 }
 0x2ad   : > { %3044 = vmatmul.mubr.msk.f32.gmra.mrb[22].mxu0 %vm796_vm12, %v3471_v62 }
 0x2ae   : > { %v763_v57 = vpop.permute.xlu1 %762 }
 0x2af   : > { %2979 = vmatmul.mubr.msk.f32.vlgmr.msra.gmra.mrb[16].mxu1 %vm790_vm6, %v3749_v12  ;;  %vm797_vm13 = vcmp.eq.s32.totalorder %v763_v57, %v4058_v2 }
 0x2b0   : > { %3210 = vmatpush3.bf16.msra.mxu1 %v3797_v32  ;;  %2981 = vmatprep.mubr.msk.f32.mxu1 %vm791_vm7, %v3757_v15 }
 0x2b1   : > { %3203 = vmatprep.subr.bf16.mxu1 %v3799_v34 }
 0x2b2   : > { %v769_v32 = vpop.permute.xlu1 %768 }
 0x2b3   : > { %2982 = vmatmul.mubr.msk.f32.gmra.mrb[18].mxu1 %vm792_vm8, %v3754_v14  ;;  %vm799_vm15 = vcmp.eq.s32.totalorder %v769_v32, %v4058_v2 }
 0x2b4   : > { %3211 = vmatpush3.bf16.msra.mxu1 %v3799_v34  ;;  %2984 = vmatprep.mubr.msk.f32.mxu1 %vm793_vm9, %v3763_v17  ;;  %v772_v34 = vpop.permute.xlu0 %771 }
 0x2b5   : > { %3204 = vmatprep.subr.bf16.mxu1 %v3806_v37  ;;  %vm800_vm0 = vcmp.eq.s32.totalorder %v772_v34, %v4058_v2 }
 0x2b7   : > { %2985 = vmatmul.mubr.msk.f32.gmra.mrb[20].mxu1 %vm794_vm10, %v3760_v16 }
 0x2b8   : > { %3212 = vmatpush3.bf16.msra.mxu1 %v3806_v37  ;;  %2987 = vmatprep.mubr.msk.f32.mxu1 %vm795_vm11, %v3769_v19  ;;  %v775_v37 = vpop.permute.xlu1 %774 }
 0x2b9   : > { %3205 = vmatprep.subr.bf16.mxu1 %v3812_v40  ;;  %vm801_vm1 = vcmp.eq.s32.totalorder %v775_v37, %v4058_v2  ;;  %v1547_v37 = vld [vmem:[#allocation5 + $0x18] sm:$0xff] }
 0x2bb   : > { %2988 = vmatmul.mubr.msk.f32.gmra.mrb[22].mxu1 %vm796_vm12, %v3766_v18 }
 0x2bc   : > { %3213 = vmatpush3.bf16.msra.mxu1 %v3812_v40  ;;  %2990 = vmatprep.mubr.msk.f32.mxu1 %vm797_vm13, %v3775_v21  ;;  %v778_v40 = vpop.permute.xlu0 %777  ;;  %v781_v33 = vpop.permute.xlu1 %780 }
 0x2bd   : > { %3206 = vmatprep.subr.bf16.mxu1 %v3838_v52  ;;  %vm802_vm2 = vcmp.eq.s32.totalorder %v778_v40, %v4058_v2  ;;  %vm803_vm3 = vcmp.eq.s32.totalorder %v781_v33, %v4058_v2  ;;  %v1546_v40 = vld [vmem:[#allocation5 + $0x10] sm:$0xff]  ;;  %v4868_v33 = vsub.f32 %v3890_v11, %v3910_v38  ;;  %v4871_v11 = vsub.f32 %v3899_v30, %v3918_v48 }
 0x2bf   : > { %2991 = vmatmul.mubr.msk.f32.gmra.mrb[24].mxu1 %vm798_vm14, %v3772_v20  ;;  %v899_v56 = vmul.f32 1.442695, %v4868_v33 }
 0x2c0   : > { %3214 = vmatpush3.bf16.msra.mxu1 %v3838_v52  ;;  %2993 = vmatprep.mubr.msk.f32.mxu1 %vm799_vm15, %v3781_v24  ;;  %v784_v52 = vpop.permute.xlu0 %783 }
 0x2c1   : > { %3207 = vmatprep.subr.bf16.mxu1 %v3862_v63  ;;  %vm804_vm5 = vcmp.eq.s32.totalorder %v784_v52, %v4058_v2  ;;  %v4869_v52 = vsub.f32 %v3874_v3, %v3893_v22 }
 0x2c3   : > { %2994 = vmatmul.mubr.msk.f32.gmra.mrb[26].mxu1 %vm800_vm0, %v3778_v23 }
 0x2c4   : > { %3215 = vmatpush3.bf16.msra.mxu1 %v3862_v63  ;;  %2996 = vmatprep.mubr.msk.f32.mxu1 %vm801_vm1, %v3787_v26  ;;  %v4862_v63 = vsub.f32 %v3828_v45, %v3841_v53 }
 0x2c5   : > { %3208 = vmatprep.subr.bf16.mxu1 %v3887_v10 }
 0x2c7   : > { %2997 = vmatmul.mubr.msk.f32.gmra.mrb[28].mxu1 %vm802_vm2, %v3784_v25 }
 0x2c8   : > { %3216 = vmatpush3.bf16.msra.mxu1 %v3887_v10  ;;  %2999 = vmatprep.mubr.msk.f32.mxu1 %vm803_vm3, %v3793_v28  ;;  %v887_v10 = vmul.f32 1.442695, %v4862_v63  ;;  %v897_v63 = vmul.f32 1.442695, %v4869_v52 }
 0x2c9   : > { %3209 = vmatprep.subr.bf16.mxu1 %v3912_v42 }
 0x2ca   : > { %3299 = vpow2.f32 %v887_v10 }
 0x2cb   : > { %3000 = vmatmul.mubr.msk.f32.gmra.mrb[30].mxu1 %vm804_vm5, %v3790_v27 }
 0x2cc   : > { %3217 = vmatpush3.bf16.msra.mxu1 %v3912_v42  ;;  %3046 = vmatprep.mubr.msk.f32.mxu1 %vm797_vm13, %v3471_v62  ;;  %v4863_v42 = vsub.f32 %v3821_v41, %v3824_v43  ;;  %v4866_v41 = vsub.f32 %v3865_v0, %v3885_v8 }
 0x2ce   : > { %v885_v2 = vmul.f32 1.442695, %v4863_v42  ;;  %v895_v46 = vmul.f32 1.442695, %v4866_v41  ;;  %v1548_v41 = vld [vmem:[#allocation5 + $0x20] sm:$0xff] }
 0x2cf   : > { %3047 = vmatmul.mubr.msk.f32.vlgmr.msra.gmra.mrb[32].mxu1 %vm798_vm14, %v3471_v62 }
 0x2d0   : > { %3049 = vmatprep.mubr.msk.f32.mxu1 %vm799_vm15, %v3471_v62  ;;  %3301 = vpow2.f32 %v885_v2 }
 0x2d3   : > { %3050 = vmatmul.mubr.msk.f32.gmra.mrb[34].mxu1 %vm800_vm0, %v3471_v62 }
 0x2d4   : > { %3052 = vmatprep.mubr.msk.f32.mxu1 %vm801_vm1, %v3471_v62  ;;  %v3300_v55 = vpop.eup %3299 }
 0x2d5   : > { %v1561_v49 = vmul.f32 %v3300_v55, %v1545_v9  ;;  %v901_v9 = vmul.f32 1.442695, %v4871_v11 }
 0x2d7   : > { %3053 = vmatmul.mubr.msk.f32.gmra.mrb[36].mxu1 %vm802_vm2, %v3471_v62 }
 0x2d8   : > { %3055 = vmatprep.mubr.msk.f32.mxu1 %vm803_vm3, %v3471_v62 }
 0x2da   : > { %v3302_v45 = vpop.eup %3301 }
 0x2db   : > { %3056 = vmatmul.mubr.msk.f32.gmra.mrb[38].mxu1 %vm804_vm5, %v3471_v62  ;;  %v4864_v62 = vsub.f32 %v3826_v44, %v3836_v50  ;;  %v893_v44 = vmul.f32 1.442695, %v4867_v7  ;;  %v1560_v57 = vmul.f32 %v3302_v45, %v1544_v59  ;;  %v1549_v45 = vld [vmem:[#allocation5 + $0x28] sm:$0xff] }
 0x2dd   : > { %v891_v39 = vmul.f32 1.442695, %v4864_v62 }
 0x2df   : > { %3303 = vpow2.f32 %v891_v39 }
 0x2e0   : > { %3305 = vpow2.f32 %v889_v35  ;;  %v903_v35 = vmul.f32 1.442695, %v4870_v31 }
 0x2e1   : > { %3307 = vpow2.f32 %v895_v46  ;;  %v4872_v46 = vsub.f32 %v3939_v4, %v3957_v36  ;;  %v4877_v4 = vld [vmem:[#allocation9_spill] sm:$0xff] }
 0x2e2   : > { %3309 = vpow2.f32 %v893_v44 }
 0x2e3   : > { %3311 = vpow2.f32 %v899_v56  ;;  %v907_v47 = vmul.f32 1.442695, %v4872_v46  ;;  %v1551_v56 = vld [vmem:[#allocation5 + $0x38] sm:$0xff] }
 0x2e4   : > { %3313 = vpow2.f32 %v897_v63  ;;  %v1550_v63 = vld [vmem:[#allocation5 + $0x30] sm:$0xff] }
 0x2e5   : > { %3315 = vpow2.f32 %v903_v35 }
 0x2e6   : > { %3317 = vpow2.f32 %v901_v9 }
 0x2e7   : > { %3319 = vpow2.f32 %v907_v47  ;;  %v1552_v47 = vld [vmem:[#allocation5 + $0x40] sm:$0xff] }
 0x2e9   : > { %v3304_v34 = vpop.eup %3303 }
 0x2ea   : > { %v3306_v0 = vpop.eup %3305  ;;  %v1563_v10 = vmul.f32 %v3304_v34, %v1547_v37 }
 0x2eb   : > { %v1562_v2 = vmul.f32 %v3306_v0, %v1546_v40  ;;  %v3308_v3 = vpop.eup %3307  ;;  %v4876_v0 = vld [vmem:[#allocation8_spill] sm:$0xff] }
 0x2ec   : > { %v3310_v59 = vpop.eup %3309  ;;  %v1565_v30 = vmul.f32 %v3308_v3, %v1549_v45  ;;  %v4878_v40 = vsub.f32 %v4876_v0, %v4877_v4  ;;  %v1553_v45 = vld [vmem:[#allocation5 + $0x48] sm:$0xff]  ;;  %v1554_v0 = vld [vmem:[#allocation5 + $0x50] sm:$0xff] }
 0x2ee   : > { %v909_v33 = vmul.f32 1.442695, %v4878_v40 }
 0x355   : > { %v2924_v29 = vpop.f32.mrb[0].mxu1 }
 0x356   : > { %v1577_v5 = vadd.f32 %v2924_v29, %v1561_v49  ;;  %v1143_v54 = vpop.f32.mrb[1].mxu1  ;;  %v4873_v49 = vsub.f32 %v3924_v51, %v3942_v6  ;;  %v1564_v29 = vmul.f32 %v3310_v59, %v1548_v41  ;;  %v3312_v51 = vpop.eup %3311 }
 0x357   : > { %v1576_v32 = vadd.f32 %v1560_v57, %v1143_v54  ;;  %v4874_v54 = vld [vmem:[#allocation11_spill] sm:$0xff]  ;;  %v3314_v52 = vpop.eup %3313 }
 0x358   : > { %1594 = vst.msk [vmem:[#allocation5 + $0x8] sm:$0xff] %vm4850_vm4, %v1577_v5  ;;  %v905_v7 = vmul.f32 1.442695, %v4873_v49  ;;  %v3316_v11 = vpop.eup %3315  ;;  %v1566_v3 = vmul.f32 %v3314_v52, %v1550_v63 }
 0x359   : > { %1593 = vst.msk [vmem:[#allocation5] sm:$0xff] %vm4850_vm4, %v1576_v32  ;;  %v4875_v32 = vsub.f32 %v3959_v58, %v4874_v54  ;;  %v3318_v59 = vpop.eup %3317 }
 0x35a   : > { %3321 = vpow2.f32 %v905_v7  ;;  %v1569_v7 = vmul.f32 %v3316_v11, %v1553_v45 }
 0x35b   : > { %v911_v34 = vmul.f32 1.442695, %v4875_v32 }
 0x35d   : > { %3323 = vpow2.f32 %v911_v34 }
 0x35e   : > { %v2927_v42 = vpop.f32.mrb[2].mxu1  ;;  %3325 = vpow2.f32 %v909_v33 }
 0x35f   : > { %v1579_v62 = vadd.f32 %v2927_v42, %v1563_v10  ;;  %v1153_v39 = vpop.f32.mrb[3].mxu1  ;;  %v4879_v10 = vld [vmem:[#allocation12_spill] sm:$0xff]  ;;  %v4880_v42 = vld [vmem:[#allocation14_spill] sm:$0xff] }
 0x360   : > { %v1578_v55 = vadd.f32 %v1562_v2, %v1153_v39  ;;  %v4881_v2 = vsub.f32 %v4879_v10, %v4880_v42  ;;  %v4883_v39 = vld [vmem:[#allocation13_spill] sm:$0xff] }
 0x361   : > { %1596 = vst.msk [vmem:[#allocation5 + $0x18] sm:$0xff] %vm4850_vm4, %v1579_v62  ;;  %v4882_v62 = vld [vmem:[#allocation10_spill] sm:$0xff] }
 0x362   : > { %1595 = vst.msk [vmem:[#allocation5 + $0x10] sm:$0xff] %vm4850_vm4, %v1578_v55  ;;  %v915_v58 = vmul.f32 1.442695, %v4881_v2  ;;  %v4884_v31 = vsub.f32 %v4882_v62, %v4883_v39  ;;  %v1567_v55 = vmul.f32 %v3312_v51, %v1551_v56  ;;  %v1660_v2 = vld [vmem:[#allocation7 + $0x18] sm:$0xff] }
 0x364   : > { %v913_v35 = vmul.f32 1.442695, %v4884_v31  ;;  %3327 = vpow2.f32 %v915_v58  ;;  %v1557_v58 = vld [vmem:[#allocation5 + $0x68] sm:$0xff] }
 0x366   : > { %v2930_v44 = vpop.f32.mrb[4].mxu1  ;;  %3329 = vpow2.f32 %v913_v35  ;;  %v1659_v35 = vld [vmem:[#allocation7 + $0x10] sm:$0xff] }
 0x367   : > { %v1581_v57 = vadd.f32 %v2930_v44, %v1565_v30  ;;  %v1163_v5 = vpop.f32.mrb[5].mxu1  ;;  %v3320_v30 = vpop.eup %3319 }
 0x368   : > { %v1580_v37 = vadd.f32 %v1564_v29, %v1163_v5  ;;  %v1568_v29 = vmul.f32 %v3318_v59, %v1552_v47  ;;  %v1555_v5 = vld [vmem:[#allocation5 + $0x58] sm:$0xff]  ;;  %v3322_v54 = vpop.eup %3321 }
 0x369   : > { %1598 = vst.msk [vmem:[#allocation5 + $0x28] sm:$0xff] %vm4850_vm4, %v1581_v57  ;;  %v1658_v57 = vld [vmem:[#allocation7 + $0x8] sm:$0xff]  ;;  %v1571_v56 = vmul.f32 %v3320_v30, %v1555_v5  ;;  %v3324_v52 = vpop.eup %3323  ;;  %v1570_v42 = vmul.f32 %v3322_v54, %v1554_v0  ;;  %v1559_v30 = vld [vmem:[#allocation5 + $0x78] sm:$0xff]  ;;  %v1661_v5 = vld [vmem:[#allocation7 + $0x20] sm:$0xff] }
 0x36a   : > { %1597 = vst.msk [vmem:[#allocation5 + $0x20] sm:$0xff] %vm4850_vm4, %v1580_v37  ;;  %v1657_v37 = vld [vmem:[#allocation7] sm:$0xff]  ;;  %v3326_v62 = vpop.eup %3325  ;;  %v1573_v59 = vmul.f32 %v3324_v52, %v1557_v58  ;;  %v1558_v54 = vld [vmem:[#allocation5 + $0x70] sm:$0xff]  ;;  %v1610_v58 = vld [vmem:[#allocation6 + $0x8] sm:$0xff] }
 0x36e   : > { %v2933_v9 = vpop.f32.mrb[6].mxu1 }
 0x36f   : > { %v1583_v41 = vadd.f32 %v2933_v9, %v1567_v55  ;;  %v1173_v46 = vpop.f32.mrb[7].mxu1  ;;  %v1556_v55 = vld [vmem:[#allocation5 + $0x60] sm:$0xff] }
 0x370   : > { %v1582_v49 = vadd.f32 %v1566_v3, %v1173_v46 }
 0x371   : > { %1600 = vst.msk [vmem:[#allocation5 + $0x38] sm:$0xff] %vm4850_vm4, %v1583_v41  ;;  %v3328_v41 = vpop.eup %3327 }
 0x372   : > { %1599 = vst.msk [vmem:[#allocation5 + $0x30] sm:$0xff] %vm4850_vm4, %v1582_v49  ;;  %v2936_v44 = vpop.f32.mrb[8].mxu1  ;;  %v1572_v49 = vmul.f32 %v3326_v62, %v1556_v55 }
 0x373   : > { %v1585_v32 = vadd.f32 %v2936_v44, %v1569_v7  ;;  %v1183_v34 = vpop.f32.mrb[9].mxu1  ;;  %v1662_v7 = vld [vmem:[#allocation7 + $0x28] sm:$0xff]  ;;  %v3330_v44 = vpop.eup %3329 }
 0x374   : > { %v1584_v4 = vadd.f32 %v1568_v29, %v1183_v34  ;;  %v3036_v40 = vpop.f32.mrb[16].mxu0 }
 0x375   : > { %1602 = vst.msk [vmem:[#allocation5 + $0x48] sm:$0xff] %vm4850_vm4, %v1585_v32  ;;  %v1674_v33 = vadd.f32 %v3036_v40, %v1658_v57  ;;  %v1465_v51 = vpop.f32.mrb[17].mxu0 }
 0x376   : > { %1601 = vst.msk [vmem:[#allocation5 + $0x40] sm:$0xff] %vm4850_vm4, %v1584_v4  ;;  %v1673_v63 = vadd.f32 %v1657_v37, %v1465_v51  ;;  %v2939_v10 = vpop.f32.mrb[10].mxu1  ;;  %v1575_v4 = vmul.f32 %v3328_v41, %v1559_v30  ;;  %v1574_v51 = vmul.f32 %v3330_v44, %v1558_v54  ;;  %v1613_v30 = vld [vmem:[#allocation6 + $0x20] sm:$0xff]  ;;  %v1616_v54 = vld [vmem:[#allocation6 + $0x38] sm:$0xff] }
 0x377   : > { %1690 = vst.msk [vmem:[#allocation7 + $0x8] sm:$0xff] %vm4850_vm4, %v1674_v33  ;;  %v1587_v39 = vadd.f32 %v2939_v10, %v1571_v56  ;;  %v1193_v31 = vpop.f32.mrb[11].mxu1  ;;  %v1664_v56 = vld [vmem:[#allocation7 + $0x38] sm:$0xff]  ;;  %v1663_v10 = vld [vmem:[#allocation7 + $0x30] sm:$0xff] }
 0x378   : > { %1689 = vst.msk [vmem:[#allocation7] sm:$0xff] %vm4850_vm4, %v1673_v63  ;;  %v1586_v11 = vadd.f32 %v1570_v42, %v1193_v31  ;;  %v3039_v9 = vpop.f32.mrb[18].mxu0  ;;  %v1609_v31 = vld [vmem:[#allocation6] sm:$0xff] }
 0x379   : > { %1604 = vst.msk [vmem:[#allocation5 + $0x58] sm:$0xff] %vm4850_vm4, %v1587_v39  ;;  %v1676_v3 = vadd.f32 %v3039_v9, %v1660_v2  ;;  %v1475_v45 = vpop.f32.mrb[19].mxu0 }
 0x37a   : > { %1603 = vst.msk [vmem:[#allocation5 + $0x50] sm:$0xff] %vm4850_vm4, %v1586_v11  ;;  %v1675_v46 = vadd.f32 %v1659_v35, %v1475_v45  ;;  %v2942_v47 = vpop.f32.mrb[12].mxu1  ;;  %v1612_v45 = vld [vmem:[#allocation6 + $0x18] sm:$0xff] }
 0x37b   : > { %1692 = vst.msk [vmem:[#allocation7 + $0x18] sm:$0xff] %vm4850_vm4, %v1676_v3  ;;  %v1589_v29 = vadd.f32 %v2942_v47, %v1573_v59  ;;  %v1203_v57 = vpop.f32.mrb[13].mxu1  ;;  %v1611_v59 = vld [vmem:[#allocation6 + $0x10] sm:$0xff] }
 0x37c   : > { %1691 = vst.msk [vmem:[#allocation7 + $0x10] sm:$0xff] %vm4850_vm4, %v1675_v46  ;;  %v1588_v32 = vadd.f32 %v1572_v49, %v1203_v57  ;;  %v3042_v34 = vpop.f32.mrb[20].mxu0 }
 0x37d   : > { %1606 = vst.msk [vmem:[#allocation5 + $0x68] sm:$0xff] %vm4850_vm4, %v1589_v29  ;;  %v1678_v37 = vadd.f32 %v3042_v34, %v1662_v7  ;;  %v1485_v0 = vpop.f32.mrb[21].mxu0  ;;  %v1614_v7 = vld [vmem:[#allocation6 + $0x28] sm:$0xff] }
 0x37e   : > { %1605 = vst.msk [vmem:[#allocation5 + $0x60] sm:$0xff] %vm4850_vm4, %v1588_v32  ;;  %v1677_v40 = vadd.f32 %v1661_v5, %v1485_v0  ;;  %v2945_v33 = vpop.f32.mrb[14].mxu1  ;;  %v1615_v32 = vld [vmem:[#allocation6 + $0x30] sm:$0xff] }
 0x37f   : > { %1694 = vst.msk [vmem:[#allocation7 + $0x28] sm:$0xff] %vm4850_vm4, %v1678_v37  ;;  %v1591_v52 = vadd.f32 %v2945_v33, %v1575_v4  ;;  %v1213_v63 = vpop.f32.mrb[15].mxu1  ;;  %v1617_v33 = vld [vmem:[#allocation6 + $0x40] sm:$0xff] }
 0x380   : > { %1693 = vst.msk [vmem:[#allocation7 + $0x20] sm:$0xff] %vm4850_vm4, %v1677_v40  ;;  %v1590_v42 = vadd.f32 %v1574_v51, %v1213_v63  ;;  %v3045_v2 = vpop.f32.mrb[22].mxu0  ;;  %v1618_v40 = vld [vmem:[#allocation6 + $0x48] sm:$0xff] }
 0x381   : > { %1608 = vst.msk [vmem:[#allocation5 + $0x78] sm:$0xff] %vm4850_vm4, %v1591_v52  ;;  %v1680_v62 = vadd.f32 %v3045_v2, %v1664_v56  ;;  %v1495_v39 = vpop.f32.mrb[23].mxu0 }
 0x382   : > { %1607 = vst.msk [vmem:[#allocation5 + $0x70] sm:$0xff] %vm4850_vm4, %v1590_v42  ;;  %v1679_v35 = vadd.f32 %v1663_v10, %v1495_v39  ;;  %v2980_v55 = vpop.f32.mrb[16].mxu1  ;;  %v1620_v10 = vld [vmem:[#allocation6 + $0x58] sm:$0xff]  ;;  %v1619_v42 = vld [vmem:[#allocation6 + $0x50] sm:$0xff] }
 0x383   : > { %1696 = vst.msk [vmem:[#allocation7 + $0x38] sm:$0xff] %vm4850_vm4, %v1680_v62  ;;  %v1626_v11 = vadd.f32 %v2980_v55, %v1610_v58  ;;  %v1288_v9 = vpop.f32.mrb[17].mxu1 }
 0x384   : > { %1695 = vst.msk [vmem:[#allocation7 + $0x30] sm:$0xff] %vm4850_vm4, %v1679_v35  ;;  %v1625_v3 = vadd.f32 %v1609_v31, %v1288_v9  ;;  %v1622_v31 = vld [vmem:[#allocation6 + $0x68] sm:$0xff]  ;;  %v1621_v35 = vld [vmem:[#allocation6 + $0x60] sm:$0xff] }
 0x385   : > { %1642 = vst.msk [vmem:[#allocation6 + $0x8] sm:$0xff] %vm4850_vm4, %v1626_v11 }
 0x386   : > { %1641 = vst.msk [vmem:[#allocation6] sm:$0xff] %vm4850_vm4, %v1625_v3  ;;  %v2983_v41 = vpop.f32.mrb[18].mxu1 }
 0x387   : > { %v1628_v46 = vadd.f32 %v2983_v41, %v1612_v45  ;;  %v1298_v47 = vpop.f32.mrb[19].mxu1  ;;  %v1624_v45 = vld [vmem:[#allocation6 + $0x78] sm:$0xff] }
 0x388   : > { %v1627_v49 = vadd.f32 %v1611_v59, %v1298_v47  ;;  %v1623_v59 = vld [vmem:[#allocation6 + $0x70] sm:$0xff] }
 0x389   : > { %1644 = vst.msk [vmem:[#allocation6 + $0x18] sm:$0xff] %vm4850_vm4, %v1628_v46 }
 0x38a   : > { %1643 = vst.msk [vmem:[#allocation6 + $0x10] sm:$0xff] %vm4850_vm4, %v1627_v49  ;;  %v2986_v44 = vpop.f32.mrb[20].mxu1 }
 0x38b   : > { %v1630_v29 = vadd.f32 %v2986_v44, %v1614_v7  ;;  %v1308_v57 = vpop.f32.mrb[21].mxu1  ;;  %v1666_v7 = vld [vmem:[#allocation7 + $0x48] sm:$0xff] }
 0x38c   : > { %v1629_v5 = vadd.f32 %v1613_v30, %v1308_v57  ;;  %v1665_v30 = vld [vmem:[#allocation7 + $0x40] sm:$0xff] }
 0x38d   : > { %1646 = vst.msk [vmem:[#allocation6 + $0x28] sm:$0xff] %vm4850_vm4, %v1630_v29 }
 0x38e   : > { %1645 = vst.msk [vmem:[#allocation6 + $0x20] sm:$0xff] %vm4850_vm4, %v1629_v5  ;;  %v2989_v34 = vpop.f32.mrb[22].mxu1 }
 0x38f   : > { %v1632_v37 = vadd.f32 %v2989_v34, %v1616_v54  ;;  %v1318_v0 = vpop.f32.mrb[23].mxu1  ;;  %v1668_v54 = vld [vmem:[#allocation7 + $0x58] sm:$0xff] }
 0x390   : > { %v1631_v4 = vadd.f32 %v1615_v32, %v1318_v0  ;;  %v1667_v32 = vld [vmem:[#allocation7 + $0x50] sm:$0xff] }
 0x391   : > { %1648 = vst.msk [vmem:[#allocation6 + $0x38] sm:$0xff] %vm4850_vm4, %v1632_v37 }
 0x392   : > { %1647 = vst.msk [vmem:[#allocation6 + $0x30] sm:$0xff] %vm4850_vm4, %v1631_v4  ;;  %v2992_v51 = vpop.f32.mrb[24].mxu1 }
 0x393   : > { %v1634_v56 = vadd.f32 %v2992_v51, %v1618_v40  ;;  %v1328_v52 = vpop.f32.mrb[25].mxu1  ;;  %v1670_v40 = vld [vmem:[#allocation7 + $0x68] sm:$0xff] }
 0x394   : > { %v1633_v63 = vadd.f32 %v1617_v33, %v1328_v52  ;;  %v1669_v33 = vld [vmem:[#allocation7 + $0x60] sm:$0xff] }
 0x395   : > { %1650 = vst.msk [vmem:[#allocation6 + $0x48] sm:$0xff] %vm4850_vm4, %v1634_v56 }
 0x396   : > { %1649 = vst.msk [vmem:[#allocation6 + $0x40] sm:$0xff] %vm4850_vm4, %v1633_v63  ;;  %v2995_v2 = vpop.f32.mrb[26].mxu1 }
 0x397   : > { %v1636_v58 = vadd.f32 %v2995_v2, %v1620_v10  ;;  %v1338_v62 = vpop.f32.mrb[27].mxu1  ;;  %v1672_v10 = vld [vmem:[#allocation7 + $0x78] sm:$0xff] }
 0x398   : > { %v1635_v39 = vadd.f32 %v1619_v42, %v1338_v62  ;;  %v1671_v42 = vld [vmem:[#allocation7 + $0x70] sm:$0xff] }
 0x399   : > { %1652 = vst.msk [vmem:[#allocation6 + $0x58] sm:$0xff] %vm4850_vm4, %v1636_v58 }
 0x39a   : > { %1651 = vst.msk [vmem:[#allocation6 + $0x50] sm:$0xff] %vm4850_vm4, %v1635_v39  ;;  %v2998_v55 = vpop.f32.mrb[28].mxu1 }
 0x39b   : > { %v1638_v11 = vadd.f32 %v2998_v55, %v1622_v31  ;;  %v1348_v9 = vpop.f32.mrb[29].mxu1  ;;  %v1733_v31 = vlaneseq (!%p1729_p11)  ;;  %v1769_v55 = vstv (!%p1729_p11), %s4182_s7 }
 0x39c   : > { %v1637_v3 = vadd.f32 %v1621_v35, %v1348_v9  ;;  %v4305_v35 = vstv (!%p1729_p11), %s4185_s8 }
 0x39d   : > { %1654 = vst.msk [vmem:[#allocation6 + $0x68] sm:$0xff] %vm4850_vm4, %v1638_v11  ;;  %v1734_v11 = vshrl.u32 (!%p1729_p11), %v1733_v31, 7  ;;  %v1768_v9 = vand.u32 (!%p1729_p11), 127, %v1733_v31 }
 0x39e   : > { %1653 = vst.msk [vmem:[#allocation6 + $0x60] sm:$0xff] %vm4850_vm4, %v1637_v3  ;;  %v3001_v41 = vpop.f32.mrb[30].mxu1 }
 0x39f   : > { %v1640_v46 = vadd.f32 %v3001_v41, %v1624_v45  ;;  %v1358_v47 = vpop.f32.mrb[31].mxu1  ;;  %v4309_v3 = vadd.s32 (!%p1729_p11), %v4305_v35, %v1734_v11  ;;  %v4311_v45 = vadd.s32 (!%p1729_p11), %v1769_v55, %v1768_v9  ;;  %v1735_v41 = vadd.s32 (!%p1729_p11), 8, %v1734_v11 }
 0x3a0   : > { %v1639_v49 = vadd.f32 %v1623_v59, %v1358_v47  ;;  %v1736_v59 = vadd.s32 (!%p1729_p11), 16, %v1734_v11  ;;  %v1738_v47 = vadd.s32 (!%p1729_p11), 32, %v1734_v11  ;;  %v1749_v31 = vadd.s32 (!%p1729_p11), 120, %v1734_v11 }
 0x3a1   : > { %1656 = vst.msk [vmem:[#allocation6 + $0x78] sm:$0xff] %vm4850_vm4, %v1640_v46  ;;  %v1737_v46 = vadd.s32 (!%p1729_p11), 24, %v1734_v11  ;;  %vm1771_vm6 = vcmp.eq.s32.totalorder (!%p1729_p11), %v4309_v3, %v4311_v45 }
 0x3a2   : > { %1655 = vst.msk [vmem:[#allocation6 + $0x70] sm:$0xff] %vm4850_vm4, %v1639_v49  ;;  %v3048_v44 = vpop.f32.mrb[32].mxu1  ;;  %v1739_v49 = vadd.s32 (!%p1729_p11), 40, %v1734_v11 }
 0x3a3   : > { %v1682_v29 = vadd.f32 %v3048_v44, %v1666_v7  ;;  %v1505_v57 = vpop.f32.mrb[33].mxu1  ;;  %v4316_v7 = vadd.s32 (!%p1729_p11), %v4305_v35, %v1736_v59  ;;  %v1740_v44 = vadd.s32 (!%p1729_p11), 48, %v1734_v11 }
 0x3a4   : > { %v1681_v5 = vadd.f32 %v1665_v30, %v1505_v57  ;;  %v4319_v30 = vadd.s32 (!%p1729_p11), %v4305_v35, %v1735_v41  ;;  %v4326_v57 = vadd.s32 (!%p1729_p11), %v4305_v35, %v1737_v46 }
 0x3a5   : > { %1698 = vst.msk [vmem:[#allocation7 + $0x48] sm:$0xff] %vm4850_vm4, %v1682_v29  ;;  %v1851_v29 = vsel (!%p1729_p11), %vm1771_vm6, %v3751_v13, 0.0  ;;  %vm1773_vm7 = vcmp.eq.s32.totalorder (!%p1729_p11), %v4316_v7, %v4311_v45 }
 0x3a6   : > { %1697 = vst.msk [vmem:[#allocation7 + $0x40] sm:$0xff] %vm4850_vm4, %v1681_v5  ;;  %v3051_v34 = vpop.f32.mrb[34].mxu1  ;;  %v4329_v5 = vadd.s32 (!%p1729_p11), %v4305_v35, %v1738_v47  ;;  %1867 = vadd.xlane.f32.xlu0 (!%p1729_p11), %v1851_v29  ;;  %vm1772_vm8 = vcmp.eq.s32.totalorder (!%p1729_p11), %v4319_v30, %v4311_v45  ;;  %v1853_v13 = vsel (!%p1729_p11), %vm1773_vm7, %v3757_v15, 0.0  ;;  %vm1774_vm9 = vcmp.eq.s32.totalorder (!%p1729_p11), %v4326_v57, %v4311_v45 }
 0x3a7   : > { %v1684_v37 = vadd.f32 %v3051_v34, %v1668_v54  ;;  %v1515_v0 = vpop.f32.mrb[35].mxu1  ;;  %v4336_v54 = vadd.s32 (!%p1729_p11), %v4305_v35, %v1739_v49  ;;  %v1852_v34 = vsel (!%p1729_p11), %vm1772_vm8, %v3749_v12, 0.0  ;;  %1871 = vadd.xlane.f32.xlu1 (!%p1729_p11), %v1853_v13  ;;  %v1854_v15 = vsel (!%p1729_p11), %vm1774_vm9, %v3754_v14, 0.0 }
 0x3a8   : > { %v1683_v4 = vadd.f32 %v1667_v32, %v1515_v0  ;;  %v1741_v32 = vadd.s32 (!%p1729_p11), 56, %v1734_v11  ;;  %vm1775_vm10 = vcmp.eq.s32.totalorder (!%p1729_p11), %v4329_v5, %v4311_v45  ;;  %v1742_v0 = vadd.s32 (!%p1729_p11), 64, %v1734_v11 }
 0x3a9   : > { %1700 = vst.msk [vmem:[#allocation7 + $0x58] sm:$0xff] %vm4850_vm4, %v1684_v37  ;;  %v4351_v37 = vadd.s32 (!%p1729_p11), %v4305_v35, %v1740_v44  ;;  %vm1776_vm11 = vcmp.eq.s32.totalorder (!%p1729_p11), %v4336_v54, %v4311_v45 }
 0x3aa   : > { %1699 = vst.msk [vmem:[#allocation7 + $0x50] sm:$0xff] %vm4850_vm4, %v1683_v4  ;;  %v3054_v51 = vpop.f32.mrb[36].mxu1  ;;  %1869 = vadd.xlane.f32.xlu0 (!%p1729_p11), %v1852_v34  ;;  %v4360_v12 = vadd.s32 (!%p1729_p11), %v4305_v35, %v1741_v32  ;;  %v1743_v4 = vadd.s32 (!%p1729_p11), 72, %v1734_v11  ;;  %v4369_v14 = vadd.s32 (!%p1729_p11), %v4305_v35, %v1742_v0  ;;  %v2011_v32 = vld [vmem:[#allocation6] sm:$0xff] (!%p1729_p11)  ;;  %v2013_v34 = vld [vmem:[#allocation6 + $0x10] sm:$0xff] (!%p1729_p11)  ;;  %v2012_v0 = vld [vmem:[#allocation6 + $0x8] sm:$0xff] (!%p1729_p11) }
 0x3ab   : > { %v1686_v56 = vadd.f32 %v3054_v51, %v1670_v40  ;;  %v1525_v52 = vpop.f32.mrb[37].mxu1  ;;  %v1855_v40 = vsel (!%p1729_p11), %vm1775_vm10, %v3763_v17, 0.0  ;;  %1873 = vadd.xlane.f32.xlu1 (!%p1729_p11), %v1854_v15  ;;  %vm1777_vm12 = vcmp.eq.s32.totalorder (!%p1729_p11), %v4351_v37, %v4311_v45  ;;  %v1856_v51 = vsel (!%p1729_p11), %vm1776_vm11, %v3760_v16, 0.0 }
 0x3ac   : > { %v1685_v63 = vadd.f32 %v1669_v33, %v1525_v52  ;;  %1732 = sbr.rel (%p1729_p11) target bundleno = 1142 (0x476), region = 44  ;;  %v1744_v33 = vadd.s32 (!%p1729_p11), 80, %v1734_v11  ;;  %vm1778_vm13 = vcmp.eq.s32.totalorder (!%p1729_p11), %v4360_v12, %v4311_v45  ;;  %v1745_v17 = vadd.s32 (!%p1729_p11), 88, %v1734_v11 }
 0x3ad   : > { %1702 = vst.msk [vmem:[#allocation7 + $0x68] sm:$0xff] %vm4850_vm4, %v1686_v56  ;;  %v1760_v56 = vadd.s32 (!%p1729_p11), %v4305_v35, %v1743_v4  ;;  %v1857_v52 = vsel (!%p1729_p11), %vm1777_vm12, %v3769_v19, 0.0  ;;  %vm1779_vm14 = vcmp.eq.s32.totalorder (!%p1729_p11), %v4369_v14, %v4311_v45  ;;  %v1858_v16 = vsel (!%p1729_p11), %vm1778_vm13, %v3766_v18, 0.0 }
 0x3ae   : > { %1701 = vst.msk [vmem:[#allocation7 + $0x60] sm:$0xff] %vm4850_vm4, %v1685_v63  ;;  %v3057_v2 = vpop.f32.mrb[38].mxu1  ;;  %1875 = vadd.xlane.f32.xlu0 (!%p1729_p11), %v1855_v40  ;;  %v1761_v63 = vadd.s32 (!%p1729_p11), %v4305_v35, %v1744_v33  ;;  %v1859_v19 = vsel (!%p1729_p11), %vm1779_vm14, %v3775_v21, 0.0  ;;  %v2014_v40 = vld [vmem:[#allocation6 + $0x18] sm:$0xff] (!%p1729_p11) }
 0x3af   : > { %v1688_v58 = vadd.f32 %v3057_v2, %v1672_v10  ;;  %v1535_v62 = vpop.f32.mrb[39].mxu1  ;;  %1877 = vadd.xlane.f32.xlu1 (!%p1729_p11), %v1856_v51  ;;  %v1746_v10 = vadd.s32 (!%p1729_p11), 96, %v1734_v11  ;;  %vm1780_vm15 = vcmp.eq.s32.totalorder (!%p1729_p11), %v1760_v56, %v4311_v45  ;;  %v1747_v2 = vadd.s32 (!%p1729_p11), 104, %v1734_v11  ;;  %v2015_v51 = vld [vmem:[#allocation6 + $0x20] sm:$0xff] (!%p1729_p11) }
 0x3b0   : > { %v1687_v39 = vadd.f32 %v1671_v42, %v1535_v62  ;;  %v1762_v42 = vadd.s32 (!%p1729_p11), %v4305_v35, %v1745_v17  ;;  %vm1781_vm0 = vcmp.eq.s32.totalorder (!%p1729_p11), %v1761_v63, %v4311_v45  ;;  %v1748_v62 = vadd.s32 (!%p1729_p11), 112, %v1734_v11  ;;  %v2016_v17 = vld [vmem:[#allocation6 + $0x28] sm:$0xff] (!%p1729_p11) }
 0x3b1   : > { %1704 = vst.msk [vmem:[#allocation7 + $0x78] sm:$0xff] %vm4850_vm4, %v1688_v58  ;;  %v1763_v58 = vadd.s32 (!%p1729_p11), %v4305_v35, %v1746_v10  ;;  %v1860_v18 = vsel (!%p1729_p11), %vm1780_vm15, %v3772_v20, 0.0  ;;  %v1861_v21 = vsel (!%p1729_p11), %vm1781_vm0, %v3781_v24, 0.0  ;;  %v1766_v20 = vadd.s32 (!%p1729_p11), %v4305_v35, %v1749_v31  ;;  %v2017_v10 = vld [vmem:[#allocation6 + $0x30] sm:$0xff] (!%p1729_p11) }
 0x3b2   : > { %1703 = vst.msk [vmem:[#allocation7 + $0x70] sm:$0xff] %vm4850_vm4, %v1687_v39  ;;  %1879 = vadd.xlane.f32.xlu0 (!%p1729_p11), %v1857_v52  ;;  %vm1782_vm1 = vcmp.eq.s32.totalorder (!%p1729_p11), %v1762_v42, %v4311_v45  ;;  %v1764_v39 = vadd.s32 (!%p1729_p11), %v4305_v35, %v1747_v2  ;;  %v1765_v55 = vadd.s32 (!%p1729_p11), %v4305_v35, %v1748_v62  ;;  %v2018_v2 = vld [vmem:[#allocation6 + $0x38] sm:$0xff] (!%p1729_p11) }
 0x3b3   : > { %1881 = vadd.xlane.f32.xlu1 %v1858_v16  ;;  %vm1783_vm2 = vcmp.eq.s32.totalorder %v1763_v58, %v4311_v45  ;;  %v1862_v9 = vsel %vm1782_vm1, %v3778_v23, 0.0  ;;  %vm1786_vm4 = vcmp.eq.s32.totalorder %v1766_v20, %v4311_v45 }
 0x3b4   : > { %vm1784_vm3 = vcmp.eq.s32.totalorder %v1764_v39, %v4311_v45  ;;  %v1863_v11 = vsel %vm1783_vm2, %v3787_v26, 0.0  ;;  %vm1785_vm5 = vcmp.eq.s32.totalorder %v1765_v55, %v4311_v45  ;;  %v1866_v35 = vsel %vm1786_vm4, %v3790_v27, 0.0  ;;  %v2020_v55 = vld [vmem:[#allocation6 + $0x48] sm:$0xff] }
 0x3b5   : > { %v1864_v24 = vsel %vm1784_vm3, %v3784_v25, 0.0  ;;  %v1865_v23 = vsel %vm1785_vm5, %v3793_v28, 0.0  ;;  %v3472_v26 = vmov 0.0  }
 0x3b6   : > { %1883 = vadd.xlane.f32.xlu0 %v1859_v19  ;;  %v2667_v59 = vsel %vm1771_vm6, 1.0, %v3472_v26  ;;  %v2668_v25 = vsel %vm1772_vm8, 1.0, %v3472_v26  ;;  %v2669_v28 = vsel %vm1773_vm7, 1.0, %v3472_v26  ;;  %v2670_v27 = vsel %vm1774_vm9, 1.0, %v3472_v26 }
 0x3b7   : > { %1885 = vadd.xlane.f32.xlu1 %v1860_v18  ;;  %v2671_v3 = vsel %vm1775_vm10, 1.0, %v3472_v26  ;;  %v2672_v41 = vsel %vm1776_vm11, 1.0, %v3472_v26  ;;  %v2673_v46 = vsel %vm1777_vm12, 1.0, %v3472_v26  ;;  %v2674_v47 = vsel %vm1778_vm13, 1.0, %v3472_v26  ;;  %v2019_v18 = vld [vmem:[#allocation6 + $0x40] sm:$0xff] }
 0x3b8   : > { %v2675_v49 = vsel %vm1779_vm14, 1.0, %v3472_v26  ;;  %v2676_v7 = vsel %vm1780_vm15, 1.0, %v3472_v26  ;;  %v2677_v30 = vsel %vm1781_vm0, 1.0, %v3472_v26  ;;  %v2678_v44 = vsel %vm1782_vm1, 1.0, %v3472_v26 }
 0x3b9   : > { %v2679_v29 = vsel %vm1783_vm2, 1.0, %v3472_v26  ;;  %v2680_v57 = vsel %vm1784_vm3, 1.0, %v3472_v26  ;;  %v2681_v5 = vsel %vm1785_vm5, 1.0, %v3472_v26  ;;  %v2682_v54 = vsel %vm1786_vm4, 1.0, %v3472_v26 }
 0x3ba   : > { %1887 = vadd.xlane.f32.xlu0 %v1861_v21  ;;  %vm4885_vm6 = vcmask 7168  }
 0x3bb   : > { %1889 = vadd.xlane.f32.xlu1 %v1862_v9  ;;  %vm4886_vm7 = vmmov %vm4885_vm6 }
 0x3bc   : > { %vm4887_vm8 = vmmov %vm4885_vm6 }
 0x3bd   : > { %vm4888_vm4 = vmmov %vm4885_vm6 }
 0x3be   : > { %1891 = vadd.xlane.f32.xlu0 %v1863_v11  ;;  %vm4889_vm9 = vmmov %vm4888_vm4 }
 0x3bf   : > { %1893 = vadd.xlane.f32.xlu1 %v1864_v24  ;;  %vm4890_vm10 = vmmov %vm4888_vm4 }
 0x3c0   : > { %vm4891_vm11 = vmmov %vm4888_vm4 }
 0x3c1   : > { %vm4892_vm12 = vmmov %vm4888_vm4 }
 0x3c2   : > { %1895 = vadd.xlane.f32.xlu0 %v1865_v23  ;;  %vm4893_vm13 = vmmov %vm4888_vm4 }
 0x3c3   : > { %1897 = vadd.xlane.f32.xlu1 %v1866_v35  ;;  %vm4894_vm14 = vmmov %vm4888_vm4 }
 0x3c4   : > { %vm4895_vm15 = vmmov %vm4888_vm4 }
 0x3c5   : > { %vm4896_vm0 = vmmov %vm4888_vm4 }
 0x3c6   : > { %1819 = vadd.xlane.f32.xlu0 %v2667_v59  ;;  %v2022_v59 = vld [vmem:[#allocation6 + $0x58] sm:$0xff]  ;;  %vm4897_vm1 = vmmov %vm4896_vm0 }
 0x3c7   : > { %1821 = vadd.xlane.f32.xlu1 %v2668_v25  ;;  %vm4898_vm2 = vmmov %vm4896_vm0 }
 0x3c8   : > { %vm4899_vm3 = vmmov %vm4896_vm0 }
 0x3c9   : > { %vm4900_vm5 = vmmov %vm4896_vm0 }
 0x3ca   : > { %1823 = vadd.xlane.f32.xlu0 %v2669_v28 }
 0x3cb   : > { %1825 = vadd.xlane.f32.xlu1 %v2670_v27 }
 0x3ce   : > { %1827 = vadd.xlane.f32.xlu0 %v2671_v3  ;;  %v2023_v3 = vld [vmem:[#allocation6 + $0x60] sm:$0xff] }
 0x3cf   : > { %1829 = vadd.xlane.f32.xlu1 %v2672_v41 }
 0x3d2   : > { %1831 = vadd.xlane.f32.xlu0 %v2673_v46 }
 0x3d3   : > { %1833 = vadd.xlane.f32.xlu1 %v2674_v47 }
 0x3d6   : > { %1835 = vadd.xlane.f32.xlu0 %v2675_v49  ;;  %v2024_v49 = vld [vmem:[#allocation6 + $0x68] sm:$0xff] }
 0x3d7   : > { %1837 = vadd.xlane.f32.xlu1 %v2676_v7 }
 0x3da   : > { %1839 = vadd.xlane.f32.xlu0 %v2677_v30 }
 0x3db   : > { %1841 = vadd.xlane.f32.xlu1 %v2678_v44 }
 0x3de   : > { %1843 = vadd.xlane.f32.xlu0 %v2679_v29  ;;  %v2025_v29 = vld [vmem:[#allocation6 + $0x70] sm:$0xff] }
 0x3df   : > { %1845 = vadd.xlane.f32.xlu1 %v2680_v57 }
 0x3e2   : > { %1847 = vadd.xlane.f32.xlu0 %v2681_v5 }
 0x3e3   : > { %1849 = vadd.xlane.f32.xlu1 %v2682_v54 }
 0x433   : > { %v1868_v13 = vpop.xlane.xlu0 %1867 }
 0x434   : > { %v2027_v37 = vsub.f32 %v2011_v32, %v1868_v13  ;;  %v1872_v15 = vpop.xlane.xlu1 %1871  ;;  %v1915_v58 = vsub.f32 %v1868_v13, %v3824_v43  ;;  %v2021_v43 = vld [vmem:[#allocation6 + $0x50] sm:$0xff]  ;;  %v2026_v32 = vld [vmem:[#allocation6 + $0x78] sm:$0xff] }
 0x435   : > { %v2029_v12 = vsub.f32 %v2013_v34, %v1872_v15  ;;  %v1917_v11 = vsub.f32 %v1872_v15, %v3860_v61  ;;  %v2059_v15 = vld [vmem:[#allocation7] sm:$0xff] }
 0x436   : > { %2043 = vst.msk [vmem:[#allocation6] sm:$0xff] %vm4885_vm6, %v2027_v37  ;;  %v1931_v20 = vmul.f32 1.442695, %v1915_v58  ;;  %vm4901_vm6 = vmmov %vm4896_vm0 }
 0x437   : > { %v1870_v4 = vpop.xlane.xlu0 %1869  ;;  %2045 = vst.msk [vmem:[#allocation6 + $0x10] sm:$0xff] %vm4886_vm7, %v2029_v12  ;;  %v1935_v28 = vmul.f32 1.442695, %v1917_v11  ;;  %vm4902_vm7 = vmmov %vm4896_vm0 }
 0x438   : > { %v2028_v14 = vsub.f32 %v2012_v0, %v1870_v4  ;;  %v1874_v33 = vpop.xlane.xlu1 %1873  ;;  %v1916_v31 = vsub.f32 %v1870_v4, %v3841_v53  ;;  %3331 = vpow2.f32 %v1931_v20  ;;  %v4904_v20 = vld [vmem:[#allocation9_spill] sm:$0xff] }
 0x439   : > { %v2030_v45 = vsub.f32 %v2014_v40, %v1874_v33  ;;  %v1918_v53 = vsub.f32 %v1874_v33, %v3836_v50  ;;  %v1899_v40 = vld [vmem:[#allocation5] sm:$0xff]  ;;  %v2060_v33 = vld [vmem:[#allocation7 + $0x8] sm:$0xff] }
 0x43a   : > { %2044 = vst.msk [vmem:[#allocation6 + $0x8] sm:$0xff] %vm4887_vm8, %v2028_v14  ;;  %v1933_v35 = vmul.f32 1.442695, %v1916_v31  ;;  %vm4903_vm8 = vmmov %vm4896_vm0 }
 0x43b   : > { %v1876_v56 = vpop.xlane.xlu0 %1875  ;;  %2046 = vst.msk [vmem:[#allocation6 + $0x18] sm:$0xff] %vm4888_vm4, %v2030_v45  ;;  %v1937_v50 = vmul.f32 1.442695, %v1918_v53  ;;  %vm4905_vm4 = vmmov %vm4896_vm0 }
 0x43c   : > { %v2031_v52 = vsub.f32 %v2015_v51, %v1876_v56  ;;  %v1878_v63 = vpop.xlane.xlu1 %1877  ;;  %v1919_v61 = vsub.f32 %v1876_v56, %v3868_v1  ;;  %3333 = vpow2.f32 %v1933_v35 }
 0x43d   : > { %v2032_v16 = vsub.f32 %v2016_v17, %v1878_v63  ;;  %v1920_v46 = vsub.f32 %v1878_v63, %v3885_v8  ;;  %3335 = vpow2.f32 %v1935_v28 }
 0x43e   : > { %2047 = vst.msk [vmem:[#allocation6 + $0x20] sm:$0xff] %vm4889_vm9, %v2031_v52  ;;  %v1939_v1 = vmul.f32 1.442695, %v1919_v61  ;;  %3337 = vpow2.f32 %v1937_v50  ;;  %v1900_v52 = vld [vmem:[#allocation5 + $0x8] sm:$0xff]  ;;  %vm4906_vm9 = vmmov %vm4896_vm0  ;;  %v1903_v61 = vld [vmem:[#allocation5 + $0x20] sm:$0xff] }
 0x43f   : > { %v1880_v42 = vpop.xlane.xlu0 %1879  ;;  %2048 = vst.msk [vmem:[#allocation6 + $0x28] sm:$0xff] %vm4890_vm10, %v2032_v16  ;;  %v1941_v8 = vmul.f32 1.442695, %v1920_v46  ;;  %vm4908_vm10 = vmmov %vm4896_vm0 }
 0x440   : > { %v2033_v19 = vsub.f32 %v2017_v10, %v1880_v42  ;;  %v1882_v62 = vpop.xlane.xlu1 %1881  ;;  %v1921_v30 = vsub.f32 %v1880_v42, %v3893_v22  ;;  %3339 = vpow2.f32 %v1939_v1  ;;  %v2061_v10 = vld [vmem:[#allocation7 + $0x10] sm:$0xff] }
 0x441   : > { %v2034_v39 = vsub.f32 %v2018_v2, %v1882_v62  ;;  %v1922_v5 = vsub.f32 %v1882_v62, %v3910_v38  ;;  %3341 = vpow2.f32 %v1941_v8  ;;  %v1901_v62 = vld [vmem:[#allocation5 + $0x10] sm:$0xff] }
 0x442   : > { %2049 = vst.msk [vmem:[#allocation6 + $0x30] sm:$0xff] %vm4891_vm11, %v2033_v19  ;;  %v1943_v22 = vmul.f32 1.442695, %v1921_v30  ;;  %v3332_v38 = vpop.eup %3331  ;;  %vm4909_vm11 = vmmov %vm4896_vm0  ;;  %v1904_v30 = vld [vmem:[#allocation5 + $0x28] sm:$0xff] }
 0x443   : > { %v4476_v21 = vpop.xlane.xlu0 %1883  ;;  %2050 = vst.msk [vmem:[#allocation6 + $0x38] sm:$0xff] %vm4892_vm12, %v2034_v39  ;;  %v1945_v12 = vmul.f32 1.442695, %v1922_v5  ;;  %v2062_v39 = vld [vmem:[#allocation7 + $0x18] sm:$0xff]  ;;  %vm4911_vm12 = vmmov %vm4896_vm0 }
 0x444   : > { %v2035_v9 = vsub.f32 %v2019_v18, %v4476_v21  ;;  %v4481_v24 = vpop.xlane.xlu1 %1885  ;;  %v1923_v34 = vsub.f32 %v4476_v21, %v3918_v48  ;;  %3343 = vpow2.f32 %v1943_v22  ;;  %v4913_v22 = vld [vmem:[#allocation14_spill] sm:$0xff] }
 0x445   : > { %v2036_v23 = vsub.f32 %v2020_v55, %v4481_v24  ;;  %v1924_v4 = vsub.f32 %v4481_v24, %v3935_v60  ;;  %3345 = vpow2.f32 %v1945_v12  ;;  %v1902_v24 = vld [vmem:[#allocation5 + $0x18] sm:$0xff] }
 0x446   : > { %2051 = vst.msk [vmem:[#allocation6 + $0x40] sm:$0xff] %vm4893_vm13, %v2035_v9  ;;  %v3334_v45 = vpop.eup %3333  ;;  %v1947_v56 = vmul.f32 1.442695, %v1923_v34  ;;  %vm4912_vm13 = vmmov %vm4896_vm0 }
 0x447   : > { %v4486_v26 = vpop.xlane.xlu0 %1887  ;;  %2052 = vst.msk [vmem:[#allocation6 + $0x48] sm:$0xff] %vm4894_vm14, %v2036_v23  ;;  %v3336_v2 = vpop.eup %3335  ;;  %v1949_v19 = vmul.f32 1.442695, %v1924_v4  ;;  %v2063_v23 = vld [vmem:[#allocation7 + $0x20] sm:$0xff]  ;;  %vm4914_vm14 = vmmov %vm4896_vm0 }
 0x448   : > { %v2037_v25 = vsub.f32 %v2021_v43, %v4486_v26  ;;  %v4491_v27 = vpop.xlane.xlu1 %1889  ;;  %v1925_v17 = vsub.f32 %v4486_v26, %v3942_v6  ;;  %v3338_v55 = vpop.eup %3337  ;;  %3347 = vpow2.f32 %v1947_v56 }
 0x449   : > { %v2038_v41 = vsub.f32 %v2022_v59, %v4491_v27  ;;  %v1926_v58 = vsub.f32 %v4491_v27, %v3957_v36  ;;  %3349 = vpow2.f32 %v1949_v19 }
 0x44a   : > { %2053 = vst.msk [vmem:[#allocation6 + $0x50] sm:$0xff] %vm4895_vm15, %v2037_v25  ;;  %v1951_v9 = vmul.f32 1.442695, %v1925_v17  ;;  %v3340_v26 = vpop.eup %3339  ;;  %v4907_v25 = vld [vmem:[#allocation11_spill] sm:$0xff]  ;;  %vm4915_vm15 = vmmov %vm4896_vm0 }
 0x44b   : > { %v4496_v47 = vpop.xlane.xlu0 %1891  ;;  %2054 = vst.msk [vmem:[#allocation6 + $0x58] sm:$0xff] %vm4896_vm0, %v2038_v41  ;;  %v1953_v59 = vmul.f32 1.442695, %v1926_v58  ;;  %v1908_v58 = vld [vmem:[#allocation5 + $0x48] sm:$0xff] }
 0x44c   : > { %v2039_v7 = vsub.f32 %v2023_v3, %v4496_v47  ;;  %v4501_v44 = vpop.xlane.xlu1 %1893  ;;  %v1927_v11 = vsub.f32 %v4496_v47, %v4904_v20  ;;  %v2064_v3 = vld [vmem:[#allocation7 + $0x28] sm:$0xff]  ;;  %v3342_v47 = vpop.eup %3341  ;;  %3351 = vpow2.f32 %v1951_v9  ;;  %v2070_v20 = vld [vmem:[#allocation7 + $0x58] sm:$0xff] }
 0x44d   : > { %v2040_v57 = vsub.f32 %v2024_v49, %v4501_v44  ;;  %v1928_v28 = vsub.f32 %v4501_v44, %v4907_v25  ;;  %3353 = vpow2.f32 %v1953_v59 }
 0x44e   : > { %2055 = vst.msk [vmem:[#allocation6 + $0x60] sm:$0xff] %vm4897_vm1, %v2039_v7  ;;  %v1955_v49 = vmul.f32 1.442695, %v1927_v11  ;;  %v4910_v7 = vld [vmem:[#allocation13_spill] sm:$0xff]  ;;  %vm4916_vm1 = vmmov %vm4896_vm0 }
 0x44f   : > { %v4506_v54 = vpop.xlane.xlu0 %1895  ;;  %2056 = vst.msk [vmem:[#allocation6 + $0x68] sm:$0xff] %vm4898_vm2, %v2040_v57  ;;  %v2065_v57 = vld [vmem:[#allocation7 + $0x30] sm:$0xff]  ;;  %vm4917_vm2 = vmmov %vm4896_vm0 }
 0x450   : > { %v2041_v13 = vsub.f32 %v2025_v29, %v4506_v54  ;;  %v4512_v37 = vpop.xlane.xlu1 %1897  ;;  %v1929_v1 = vsub.f32 %v4506_v54, %v4910_v7  ;;  %3355 = vpow2.f32 %v1955_v49  ;;  %v1912_v49 = vld [vmem:[#allocation5 + $0x68] sm:$0xff] }
 0x451   : > { %v2042_v0 = vsub.f32 %v2026_v32, %v4512_v37  ;;  %v3344_v32 = vpop.eup %3343  ;;  %v1930_v34 = vsub.f32 %v4512_v37, %v4913_v22 }
 0x452   : > { %2057 = vst.msk [vmem:[#allocation6 + $0x70] sm:$0xff] %vm4899_vm3, %v2041_v13  ;;  %v1957_v13 = vmul.f32 1.442695, %v1928_v28  ;;  %vm4918_vm3 = vmmov %vm4896_vm0 }
 0x453   : > { %v1820_v14 = vpop.xlane.xlu0 %1819  ;;  %2058 = vst.msk [vmem:[#allocation6 + $0x78] sm:$0xff] %vm4900_vm5, %v2042_v0  ;;  %vm4919_vm5 = vmmov %vm4896_vm0 }
 0x454   : > { %v1963_v51 = vmul.f32 %v3332_v38, %v1820_v14  ;;  %v2075_v48 = vsub.f32 %v2059_v15, %v1820_v14  ;;  %v1822_v63 = vpop.xlane.xlu1 %1821  ;;  %v1905_v15 = vld [vmem:[#allocation5 + $0x30] sm:$0xff]  ;;  %v2066_v38 = vld [vmem:[#allocation7 + $0x38] sm:$0xff]  ;;  %v1959_v14 = vmul.f32 1.442695, %v1929_v1  ;;  %3357 = vpow2.f32 %v1957_v13 }
 0x455   : > { %v1964_v60 = vmul.f32 %v3334_v45, %v1822_v63  ;;  %v2076_v42 = vsub.f32 %v2060_v33, %v1822_v63  ;;  %v1906_v33 = vld [vmem:[#allocation5 + $0x38] sm:$0xff]  ;;  %v1907_v63 = vld [vmem:[#allocation5 + $0x40] sm:$0xff]  ;;  %v2073_v1 = vld [vmem:[#allocation7 + $0x70] sm:$0xff] }
 0x456   : > { %v1979_v16 = vsub.f32 %v1899_v40, %v1963_v51  ;;  %2091 = vst.msk [vmem:[#allocation7] sm:$0xff] %vm4901_vm6, %v2075_v48  ;;  %v3346_v40 = vpop.eup %3345  ;;  %v2067_v48 = vld [vmem:[#allocation7 + $0x40] sm:$0xff]  ;;  %3359 = vpow2.f32 %v1959_v14  ;;  %vm4920_vm6 = vmmov %vm4896_vm0 }
 0x457   : > { %v1824_v18 = vpop.xlane.xlu0 %1823  ;;  %v1980_v6 = vsub.f32 %v1900_v52, %v1964_v60  ;;  %2092 = vst.msk [vmem:[#allocation7 + $0x8] sm:$0xff] %vm4903_vm8, %v2076_v42  ;;  %v3348_v17 = vpop.eup %3347  ;;  %v1961_v52 = vmul.f32 1.442695, %v1930_v34  ;;  %vm4922_vm8 = vmmov %vm4896_vm0 }
 0x458   : > { %1995 = vst.msk [vmem:[#allocation5] sm:$0xff] %vm4902_vm7, %v1979_v16  ;;  %v1965_v31 = vmul.f32 %v3336_v2, %v1824_v18  ;;  %v2077_v21 = vsub.f32 %v2061_v10, %v1824_v18  ;;  %v1826_v43 = vpop.xlane.xlu1 %1825  ;;  %v2068_v16 = vld [vmem:[#allocation7 + $0x48] sm:$0xff]  ;;  %v3350_v19 = vpop.eup %3349  ;;  %v2069_v18 = vld [vmem:[#allocation7 + $0x50] sm:$0xff]  ;;  %vm4921_vm7 = vmmov %vm4896_vm0 }
 0x459   : > { %1996 = vst.msk [vmem:[#allocation5 + $0x8] sm:$0xff] %vm4905_vm4, %v1980_v6  ;;  %v1966_v35 = vmul.f32 %v3338_v55, %v1826_v43  ;;  %v2078_v53 = vsub.f32 %v2062_v39, %v1826_v43  ;;  %3361 = vpow2.f32 %v1961_v52  ;;  %v1909_v55 = vld [vmem:[#allocation5 + $0x50] sm:$0xff]  ;;  %vm4923_vm4 = vmmov %vm4896_vm0 }
 0x45a   : > { %v1981_v36 = vsub.f32 %v1901_v62, %v1965_v31  ;;  %2093 = vst.msk [vmem:[#allocation7 + $0x10] sm:$0xff] %vm4906_vm9, %v2077_v21  ;;  %v3352_v21 = vpop.eup %3351  ;;  %vm4924_vm9 = vmmov %vm4896_vm0 }
 0x45b   : > { %v1828_v27 = vpop.xlane.xlu0 %1827  ;;  %v1982_v41 = vsub.f32 %v1902_v24, %v1966_v35  ;;  %2094 = vst.msk [vmem:[#allocation7 + $0x18] sm:$0xff] %vm4909_vm11, %v2078_v53  ;;  %v2071_v53 = vld [vmem:[#allocation7 + $0x60] sm:$0xff]  ;;  %vm4926_vm11 = vmmov %vm4896_vm0 }
 0x45c   : > { %1997 = vst.msk [vmem:[#allocation5 + $0x10] sm:$0xff] %vm4908_vm10, %v1981_v36  ;;  %v1967_v50 = vmul.f32 %v3340_v26, %v1828_v27  ;;  %v2079_v46 = vsub.f32 %v2063_v23, %v1828_v27  ;;  %v1830_v29 = vpop.xlane.xlu1 %1829  ;;  %v3354_v23 = vpop.eup %3353  ;;  %v1910_v36 = vld [vmem:[#allocation5 + $0x58] sm:$0xff]  ;;  %vm4925_vm10 = vmmov %vm4896_vm0 }
 0x45d   : > { %1998 = vst.msk [vmem:[#allocation5 + $0x18] sm:$0xff] %vm4911_vm12, %v1982_v41  ;;  %v1968_v8 = vmul.f32 %v3342_v47, %v1830_v29  ;;  %v2080_v5 = vsub.f32 %v2064_v3, %v1830_v29  ;;  %v3356_v28 = vpop.eup %3355  ;;  %v2072_v3 = vld [vmem:[#allocation7 + $0x68] sm:$0xff]  ;;  %vm4927_vm12 = vmmov %vm4896_vm0 }
 0x45e   : > { %v1983_v44 = vsub.f32 %v1903_v61, %v1967_v50  ;;  %2095 = vst.msk [vmem:[#allocation7 + $0x20] sm:$0xff] %vm4912_vm13, %v2079_v46  ;;  %v1911_v61 = vld [vmem:[#allocation5 + $0x60] sm:$0xff]  ;;  %v3358_v47 = vpop.eup %3357  ;;  %vm4928_vm13 = vmmov %vm4896_vm0 }
 0x45f   : > { %v1832_v0 = vpop.xlane.xlu0 %1831  ;;  %v1984_v54 = vsub.f32 %v1904_v30, %v1968_v8  ;;  %2096 = vst.msk [vmem:[#allocation7 + $0x28] sm:$0xff] %vm4915_vm15, %v2080_v5  ;;  %v1913_v8 = vld [vmem:[#allocation5 + $0x70] sm:$0xff]  ;;  %vm4930_vm15 = vmmov %vm4896_vm0 }
 0x460   : > { %1999 = vst.msk [vmem:[#allocation5 + $0x20] sm:$0xff] %vm4914_vm14, %v1983_v44  ;;  %v1969_v12 = vmul.f32 %v3344_v32, %v1832_v0  ;;  %v2081_v4 = vsub.f32 %v2065_v57, %v1832_v0  ;;  %v1834_v51 = vpop.xlane.xlu1 %1833  ;;  %v3360_v44 = vpop.eup %3359  ;;  %v2074_v32 = vld [vmem:[#allocation7 + $0x78] sm:$0xff]  ;;  %vm4929_vm14 = vmmov %vm4896_vm0 }
 0x461   : > { %2000 = vst.msk [vmem:[#allocation5 + $0x28] sm:$0xff] %vm4896_vm0, %v1984_v54  ;;  %v1970_v37 = vmul.f32 %v3346_v40, %v1834_v51  ;;  %v2082_v56 = vsub.f32 %v2066_v38, %v1834_v51  ;;  %v1914_v0 = vld [vmem:[#allocation5 + $0x78] sm:$0xff] }
 0x462   : > { %v1985_v45 = vsub.f32 %v1905_v15, %v1969_v12  ;;  %2097 = vst.msk [vmem:[#allocation7 + $0x30] sm:$0xff] %vm4916_vm1, %v2081_v4  ;;  %vm4931_vm1 = vmmov %vm4896_vm0 }
 0x463   : > { %v1836_v10 = vpop.xlane.xlu0 %1835  ;;  %v1986_v60 = vsub.f32 %v1906_v33, %v1970_v37  ;;  %2098 = vst.msk [vmem:[#allocation7 + $0x38] sm:$0xff] %vm4918_vm3, %v2082_v56  ;;  %v3362_v15 = vpop.eup %3361  ;;  %vm4933_vm3 = vmmov %vm4896_vm0 }
 0x464   : > { %2001 = vst.msk [vmem:[#allocation5 + $0x30] sm:$0xff] %vm4917_vm2, %v1985_v45  ;;  %v1971_v42 = vmul.f32 %v3348_v17, %v1836_v10  ;;  %v2083_v2 = vsub.f32 %v2067_v48, %v1836_v10  ;;  %v1838_v62 = vpop.xlane.xlu1 %1837  ;;  %vm4932_vm2 = vmmov %vm4896_vm0 }
 0x465   : > { %2002 = vst.msk [vmem:[#allocation5 + $0x38] sm:$0xff] %vm4919_vm5, %v1986_v60  ;;  %v1972_v6 = vmul.f32 %v3350_v19, %v1838_v62  ;;  %v2084_v31 = vsub.f32 %v2068_v16, %v1838_v62  ;;  %vm4934_vm5 = vmmov %vm4896_vm0 }
 0x466   : > { %v1987_v39 = vsub.f32 %v1907_v63, %v1971_v42  ;;  %2099 = vst.msk [vmem:[#allocation7 + $0x40] sm:$0xff] %vm4920_vm6, %v2083_v2 }
 0x467   : > { %v1840_v9 = vpop.xlane.xlu0 %1839  ;;  %v1988_v11 = vsub.f32 %v1908_v58, %v1972_v6  ;;  %2100 = vst.msk [vmem:[#allocation7 + $0x48] sm:$0xff] %vm4922_vm8, %v2084_v31 }
 0x468   : > { %2003 = vst.msk [vmem:[#allocation5 + $0x40] sm:$0xff] %vm4921_vm7, %v1987_v39  ;;  %v1973_v24 = vmul.f32 %v3352_v21, %v1840_v9  ;;  %v2085_v43 = vsub.f32 %v2069_v18, %v1840_v9  ;;  %v1842_v35 = vpop.xlane.xlu1 %1841 }
 0x469   : > { %2004 = vst.msk [vmem:[#allocation5 + $0x48] sm:$0xff] %vm4923_vm4, %v1988_v11  ;;  %v1974_v59 = vmul.f32 %v3354_v23, %v1842_v35  ;;  %v2086_v25 = vsub.f32 %v2070_v20, %v1842_v35 }
 0x46a   : > { %v1989_v26 = vsub.f32 %v1909_v55, %v1973_v24  ;;  %2101 = vst.msk [vmem:[#allocation7 + $0x50] sm:$0xff] %vm4924_vm9, %v2085_v43 }
 0x46b   : > { %v1844_v27 = vpop.xlane.xlu0 %1843  ;;  %v1990_v41 = vsub.f32 %v1910_v36, %v1974_v59  ;;  %2102 = vst.msk [vmem:[#allocation7 + $0x58] sm:$0xff] %vm4926_vm11, %v2086_v25 }
 0x46c   : > { %2005 = vst.msk [vmem:[#allocation5 + $0x50] sm:$0xff] %vm4925_vm10, %v1989_v26  ;;  %v1975_v50 = vmul.f32 %v3356_v28, %v1844_v27  ;;  %v2087_v46 = vsub.f32 %v2071_v53, %v1844_v27  ;;  %v1846_v7 = vpop.xlane.xlu1 %1845 }
 0x46d   : > { %2006 = vst.msk [vmem:[#allocation5 + $0x58] sm:$0xff] %vm4927_vm12, %v1990_v41  ;;  %v1976_v29 = vmul.f32 %v3358_v47, %v1846_v7  ;;  %v2088_v57 = vsub.f32 %v2072_v3, %v1846_v7 }
 0x46e   : > { %v1991_v30 = vsub.f32 %v1911_v61, %v1975_v50  ;;  %2103 = vst.msk [vmem:[#allocation7 + $0x60] sm:$0xff] %vm4928_vm13, %v2087_v46 }
 0x46f   : > { %v1848_v5 = vpop.xlane.xlu0 %1847  ;;  %v1992_v13 = vsub.f32 %v1912_v49, %v1976_v29  ;;  %2104 = vst.msk [vmem:[#allocation7 + $0x68] sm:$0xff] %vm4930_vm15, %v2088_v57 }
 0x470   : > { %2007 = vst.msk [vmem:[#allocation5 + $0x60] sm:$0xff] %vm4929_vm14, %v1991_v30  ;;  %v1977_v22 = vmul.f32 %v3360_v44, %v1848_v5  ;;  %v2089_v34 = vsub.f32 %v2073_v1, %v1848_v5  ;;  %v1850_v38 = vpop.xlane.xlu1 %1849 }
 0x471   : > { %2008 = vst.msk [vmem:[#allocation5 + $0x68] sm:$0xff] %vm4896_vm0, %v1992_v13  ;;  %v1978_v12 = vmul.f32 %v3362_v15, %v1850_v38  ;;  %v2090_v4 = vsub.f32 %v2074_v32, %v1850_v38 }
 0x472   : > { %v1993_v54 = vsub.f32 %v1913_v8, %v1977_v22  ;;  %2105 = vst.msk [vmem:[#allocation7 + $0x70] sm:$0xff] %vm4931_vm1, %v2089_v34 }
 0x473   : > { %v1994_v40 = vsub.f32 %v1914_v0, %v1978_v12  ;;  %2106 = vst.msk [vmem:[#allocation7 + $0x78] sm:$0xff] %vm4933_vm3, %v2090_v4 }
 0x474   : > { %2009 = vst.msk [vmem:[#allocation5 + $0x70] sm:$0xff] %vm4932_vm2, %v1993_v54 }
 0x475   : > { %2010 = vst.msk [vmem:[#allocation5 + $0x78] sm:$0xff] %vm4934_vm5, %v1994_v40 }
 0x476 PF: > { %p2683_p12 = scmp.ne.s32.totalorder %s3449_s18, 1 }
 0x477   : > { %v4564_v14 = vld [vmem:[#allocation7] sm:$0xff] (!%p2683_p12)  ;;  %v4567_v51 = vld [vmem:[#allocation7 + $0x8] sm:$0xff] (!%p2683_p12)  ;;  %v3473_v45 = vmov (!%p2683_p12), 0.0   ;;  %v4573_v56 = vld [vmem:[#allocation7 + $0x10] sm:$0xff] (!%p2683_p12)  ;;  %vm4935_vm8 = vcmask (!%p2683_p12), 7168  }
 0x478   : > { %2110 = sbr.rel (%p2683_p12) target bundleno = 1213 (0x4bd), region = 48  ;;  %v2175_v33 = vld [vmem:[#allocation5] sm:$0xff] (!%p2683_p12)  ;;  %vm2127_vm6 = vcmp.eq.f32.partialorder (!%p2683_p12), %v4564_v14, 0.0  ;;  %v2176_v48 = vld [vmem:[#allocation5 + $0x8] sm:$0xff] (!%p2683_p12)  ;;  %vm2128_vm7 = vcmp.eq.f32.partialorder (!%p2683_p12), %v4567_v51, 0.0  ;;  %vm2129_vm4 = vcmp.eq.f32.partialorder (!%p2683_p12), %v4573_v56, 0.0  ;;  %vm4936_vm9 = vmmov (!%p2683_p12), %vm4935_vm8 }
 0x479   : > { %3363 = vlog2.f32 (!%p2683_p12), %v2175_v33  ;;  %v4570_v37 = vsel (!%p2683_p12), %vm2127_vm6, 1.0, %v3473_v45  ;;  %v4581_v52 = vsel (!%p2683_p12), %vm2128_vm7, 1.0, %v3473_v45  ;;  %v2177_v63 = vld [vmem:[#allocation5 + $0x10] sm:$0xff] (!%p2683_p12)  ;;  %v4590_v16 = vsel (!%p2683_p12), %vm2129_vm4, 1.0, %v3473_v45  ;;  %v4592_v60 = vld [vmem:[#allocation7 + $0x18] sm:$0xff] (!%p2683_p12)  ;;  %vm4937_vm10 = vmmov (!%p2683_p12), %vm4935_vm8 }
 0x47a   : > { %3365 = vlog2.f32 (!%p2683_p12), %v2176_v48  ;;  %v2303_v17 = vadd.f32 (!%p2683_p12), %v4570_v37, %v4564_v14  ;;  %2415 = vst.msk [vmem:[%s3567_s26] sm:$0xff] (!%p2683_p12), %vm4935_vm8, %v4570_v37  ;;  %v2304_v10 = vadd.f32 (!%p2683_p12), %v4581_v52, %v4567_v51  ;;  %v2305_v42 = vadd.f32 (!%p2683_p12), %v4590_v16, %v4573_v56  ;;  %v2178_v2 = vld [vmem:[#allocation5 + $0x18] sm:$0xff] (!%p2683_p12)  ;;  %v4600_v19 = vld [vmem:[#allocation7 + $0x20] sm:$0xff] (!%p2683_p12)  ;;  %v4606_v62 = vld [vmem:[#allocation7 + $0x28] sm:$0xff] (!%p2683_p12) }
 0x47b   : > { %2416 = vst.msk [vmem:[%s3567_s26 + $0x8] sm:$0xff] (!%p2683_p12), %vm4936_vm9, %v4581_v52  ;;  %3367 = vlog2.f32 (!%p2683_p12), %v2177_v63  ;;  %vm2130_vm11 = vcmp.eq.f32.partialorder (!%p2683_p12), %v4592_v60, 0.0  ;;  %vm2131_vm12 = vcmp.eq.f32.partialorder (!%p2683_p12), %v4600_v19, 0.0  ;;  %vm4938_vm13 = vmmov (!%p2683_p12), %vm4935_vm8  ;;  %v2179_v6 = vld [vmem:[#allocation5 + $0x20] sm:$0xff] (!%p2683_p12)  ;;  %vm2132_vm15 = vcmp.eq.f32.partialorder (!%p2683_p12), %v4606_v62, 0.0  ;;  %v4622_v21 = vld [vmem:[#allocation7 + $0x30] sm:$0xff] (!%p2683_p12) }
 0x47c   : > { %3369 = vrcp.f32 (!%p2683_p12), %v2303_v17  ;;  %2417 = vst.msk [vmem:[%s3567_s26 + $0x10] sm:$0xff] (!%p2683_p12), %vm4937_vm10, %v4590_v16  ;;  %v4603_v58 = vsel (!%p2683_p12), %vm2130_vm11, 1.0, %v3473_v45  ;;  %v4614_v39 = vsel (!%p2683_p12), %vm2131_vm12, 1.0, %v3473_v45  ;;  %vm4939_vm14 = vmmov (!%p2683_p12), %vm4935_vm8  ;;  %v2367_v55 = vsub.f32 (!%p2683_p12), 1.0, %v4570_v37  ;;  %v2180_v20 = vld [vmem:[#allocation5 + $0x28] sm:$0xff] (!%p2683_p12)  ;;  %v4629_v11 = vld [vmem:[#allocation7 + $0x38] sm:$0xff] (!%p2683_p12) }
 0x47d   : > { %3371 = vrcp.f32 (!%p2683_p12), %v2304_v10  ;;  %v2306_v18 = vadd.f32 (!%p2683_p12), %v4603_v58, %v4592_v60  ;;  %2418 = vst.msk [vmem:[%s3567_s26 + $0x18] sm:$0xff] (!%p2683_p12), %vm4938_vm13, %v4603_v58  ;;  %v2307_v31 = vadd.f32 (!%p2683_p12), %v4614_v39, %v4600_v19  ;;  %v4626_v9 = vsel (!%p2683_p12), %vm2132_vm15, 1.0, %v3473_v45  ;;  %vm4940_vm1 = vmmov (!%p2683_p12), %vm4935_vm8  ;;  %v4640_v36 = vld [vmem:[#allocation7 + $0x40] sm:$0xff] (!%p2683_p12)  ;;  %v2181_v59 = vld [vmem:[#allocation5 + $0x30] sm:$0xff] (!%p2683_p12) }
 0x47e   : > { %3373 = vrcp.f32 (!%p2683_p12), %v2305_v42  ;;  %2419 = vst.msk [vmem:[%s3567_s26 + $0x20] sm:$0xff] (!%p2683_p12), %vm4939_vm14, %v4614_v39  ;;  %vm2133_vm0 = vcmp.eq.f32.partialorder (!%p2683_p12), %v4622_v21, 0.0  ;;  %v2368_v24 = vsub.f32 (!%p2683_p12), 1.0, %v4581_v52  ;;  %v2308_v43 = vadd.f32 (!%p2683_p12), %v4626_v9, %v4606_v62  ;;  %v2239_v53 = vld [vmem:[#allocation4] sm:$0xff] (!%p2683_p12)  ;;  %vm4941_vm2 = vmmov (!%p2683_p12), %vm4940_vm1  ;;  %v2240_v27 = vld [vmem:[#allocation4 + $0x8] sm:$0xff] (!%p2683_p12) }
 0x47f   : > { %3375 = vlog2.f32 %v2178_v2  ;;  %2420 = vst.msk [vmem:[%s3567_s26 + $0x28] sm:$0xff] %vm4940_vm1, %v4626_v9  ;;  %v4638_v23 = vsel %vm2133_vm0, 1.0, %v3473_v45  ;;  %v2369_v26 = vsub.f32 1.0, %v4590_v16  ;;  %vm2134_vm3 = vcmp.eq.f32.partialorder %v4629_v11, 0.0  ;;  %v4653_v41 = vld [vmem:[#allocation7 + $0x48] sm:$0xff]  ;;  %v2182_v47 = vld [vmem:[#allocation5 + $0x38] sm:$0xff]  ;;  %vm4942_vm6 = vmmov %vm4940_vm1 }
 0x480   : > { %3377 = vrcp.f32 %v2306_v18  ;;  %v2309_v25 = vadd.f32 %v4638_v23, %v4622_v21  ;;  %2421 = vst.msk [vmem:[%s3567_s26 + $0x30] sm:$0xff] %vm4941_vm2, %v4638_v23  ;;  %v4650_v3 = vsel %vm2134_vm3, 1.0, %v3473_v45  ;;  %vm2135_vm5 = vcmp.eq.f32.partialorder %v4640_v36, 0.0  ;;  %v2241_v30 = vld [vmem:[#allocation4 + $0x10] sm:$0xff]  ;;  %v2223_v44 = vld [vmem:[#allocation6] sm:$0xff]  ;;  %vm4943_vm8 = vmmov %vm4940_vm1 }
 0x481   : > { %3379 = vlog2.f32 %v2179_v6  ;;  %v2370_v46 = vsub.f32 1.0, %v4603_v58  ;;  %v2310_v49 = vadd.f32 %v4650_v3, %v4629_v11  ;;  %2422 = vst.msk [vmem:[%s3567_s26 + $0x38] sm:$0xff] %vm4942_vm6, %v4650_v3  ;;  %v4662_v29 = vsel %vm2135_vm5, 1.0, %v3473_v45  ;;  %v2183_v32 = vld [vmem:[#allocation5 + $0x40] sm:$0xff]  ;;  %v4670_v22 = vld [vmem:[#allocation7 + $0x50] sm:$0xff]  ;;  %v2224_v0 = vld [vmem:[#allocation6 + $0x8] sm:$0xff] }
 0x482   : > { %3381 = vrcp.f32 %v2307_v31  ;;  %vm2136_vm7 = vcmp.eq.f32.partialorder %v4653_v41, 0.0  ;;  %v2311_v13 = vadd.f32 %v4662_v29, %v4640_v36  ;;  %2423 = vst.msk [vmem:[%s3567_s26 + $0x40] sm:$0xff] %vm4943_vm8, %v4662_v29  ;;  %v2371_v38 = vsub.f32 1.0, %v4614_v39  ;;  %v2184_v48 = vld [vmem:[#allocation5 + $0x48] sm:$0xff]  ;;  %vm4944_vm4 = vmmov %vm4940_vm1  ;;  %v4682_v17 = vld [vmem:[#allocation7 + $0x58] sm:$0xff] }
 0x483   : > { %v3364_v35 = vpop.eup %3363  ;;  %3383 = vlog2.f32 %v2180_v20  ;;  %v4675_v54 = vsel %vm2136_vm7, 1.0, %v3473_v45  ;;  %v2372_v33 = vsub.f32 1.0, %v4626_v9  ;;  %v2225_v10 = vld [vmem:[#allocation6 + $0x10] sm:$0xff]  ;;  %v2242_v42 = vld [vmem:[#allocation4 + $0x18] sm:$0xff]  ;;  %vm2137_vm9 = vcmp.eq.f32.partialorder %v4670_v22, 0.0  ;;  %vm4945_vm11 = vmmov %vm4940_vm1 }
 0x484   : > { %v3366_v28 = vpop.eup %3365  ;;  %v2192_v61 = vmul.f32 0.6931472, %v3364_v35  ;;  %3385 = vrcp.f32 %v2308_v43  ;;  %2424 = vst.msk [vmem:[%s3567_s26 + $0x48] sm:$0xff] %vm4944_vm4, %v4675_v54  ;;  %v2312_v2 = vadd.f32 %v4675_v54, %v4653_v41  ;;  %v2243_v35 = vld [vmem:[#allocation4 + $0x20] sm:$0xff]  ;;  %vm2138_vm10 = vcmp.eq.f32.partialorder %v4682_v17, 0.0  ;;  %v2186_v37 = vld [vmem:[#allocation5 + $0x58] sm:$0xff]  ;;  %vm4946_vm12 = vmmov %vm4940_vm1 }
 0x485   : > { %v2194_v50 = vmul.f32 0.6931472, %v3366_v28  ;;  %v3368_v7 = vpop.eup %3367  ;;  %3387 = vlog2.f32 %v2181_v59  ;;  %vm4947_vm13 = vmmov %vm4940_vm1 }
 0x486   : > { %v2255_v1 = vadd.f32 %v2239_v53, %v2192_v61  ;;  %v3370_v57 = vpop.eup %3369  ;;  %v2196_v5 = vmul.f32 0.6931472, %v3368_v7  ;;  %3389 = vrcp.f32 %v2309_v25  ;;  %v4689_v53 = vsel %vm2137_vm9, 1.0, %v3473_v45  ;;  %vm4948_vm14 = vmmov %vm4940_vm1 }
 0x487   : > { %v2256_v8 = vadd.f32 %v2240_v27, %v2194_v50  ;;  %v3372_v34 = vpop.eup %3371  ;;  %3391 = vlog2.f32 %v2182_v47  ;;  %v2185_v50 = vld [vmem:[#allocation5 + $0x50] sm:$0xff]  ;;  %2425 = vst.msk [vmem:[%s3567_s26 + $0x50] sm:$0xff] %vm4945_vm11, %v4689_v53  ;;  %v2373_v7 = vsub.f32 1.0, %v4638_v23  ;;  %vm4949_vm15 = vmmov %vm4940_vm1 }
 0x488   : > { %v2271_v15 = vmul.f32 %v2255_v1, %v4564_v14  ;;  %v3374_v12 = vpop.eup %3373  ;;  %v2257_v40 = vadd.f32 %v2241_v30, %v2196_v5  ;;  %3393 = vrcp.f32 %v2310_v49  ;;  %v2226_v49 = vld [vmem:[#allocation6 + $0x18] sm:$0xff]  ;;  %v2313_v1 = vadd.f32 %v4689_v53, %v4670_v22  ;;  %vm4950_vm2 = vmmov %vm4940_vm1 }
 0x489   : > { %v2272_v4 = vmul.f32 %v2256_v8, %v4567_v51  ;;  %v3376_v14 = vpop.eup %3375  ;;  %3395 = vlog2.f32 %v2183_v32  ;;  %v2244_v32 = vld [vmem:[#allocation4 + $0x28] sm:$0xff]  ;;  %vm4951_vm3 = vmmov %vm4940_vm1 }
 0x48a   : > { %v2287_v63 = vsub.f32 %v2223_v44, %v2271_v15  ;;  %v3378_v51 = vpop.eup %3377  ;;  %v2273_v6 = vmul.f32 %v2257_v40, %v4573_v56  ;;  %v2198_v31 = vmul.f32 0.6931472, %v3376_v14  ;;  %3397 = vrcp.f32 %v2311_v13  ;;  %v2227_v15 = vld [vmem:[#allocation6 + $0x20] sm:$0xff]  ;;  %vm4952_vm6 = vmmov %vm4940_vm1 }
 0x48b   : > { %v2288_v18 = vsub.f32 %v2224_v0, %v2272_v4  ;;  %v3380_v20 = vpop.eup %3379  ;;  %3399 = vlog2.f32 %v2184_v48  ;;  %v4704_v4 = vsel %vm2138_vm10, 1.0, %v3473_v45  ;;  %vm4953_vm7 = vmmov %vm4940_vm1 }
 0x48c   : > { %v2320_v43 = vmul.f32 %v3370_v57, %v2287_v63  ;;  %v3382_v59 = vpop.eup %3381  ;;  %v2289_v28 = vsub.f32 %v2225_v10, %v2273_v6  ;;  %v2258_v61 = vadd.f32 %v2242_v42, %v2198_v31  ;;  %v2200_v27 = vmul.f32 0.6931472, %v3380_v20  ;;  %v2245_v63 = vld [vmem:[#allocation4 + $0x30] sm:$0xff]  ;;  %2426 = vst.msk [vmem:[%s3567_s26 + $0x58] sm:$0xff] %vm4946_vm12, %v4704_v4  ;;  %v2228_v31 = vld [vmem:[#allocation6 + $0x28] sm:$0xff]  ;;  %vm4954_vm8 = vmmov %vm4940_vm1 }
 0x48d   : > { %v2322_v25 = vmul.f32 %v3372_v34, %v2288_v18  ;;  %v3384_v56 = vpop.eup %3383  ;;  %3401 = vrcp.f32 %v2312_v2  ;;  %v2246_v2 = vld [vmem:[#allocation4 + $0x38] sm:$0xff]  ;;  %v2314_v52 = vadd.f32 %v4704_v4, %v4682_v17  ;;  %vm4955_vm9 = vmmov %vm4940_vm1 }
 0x48e   : > { %v2351_v47 = vsub.f32 0.0, %v2320_v43  ;;  %v3386_v30 = vpop.eup %3385  ;;  %v2324_v44 = vmul.f32 %v3374_v12, %v2289_v28  ;;  %v2274_v8 = vmul.f32 %v2258_v61, %v4592_v60  ;;  %v2259_v5 = vadd.f32 %v2243_v35, %v2200_v27  ;;  %v4720_v43 = vld [vmem:[#allocation7 + $0x60] sm:$0xff]  ;;  %vm4956_vm10 = vmmov %vm4940_vm1 }
 0x48f   : > { %v2352_v57 = vsub.f32 0.0, %v2322_v25  ;;  %v3388_v13 = vpop.eup %3387  ;;  %v2202_v0 = vmul.f32 0.6931472, %v3384_v56  ;;  %3403 = vlog2.f32 %v2185_v50  ;;  %v2374_v61 = vsub.f32 1.0, %v4650_v3  ;;  %v2247_v27 = vld [vmem:[#allocation4 + $0x40] sm:$0xff]  ;;  %v2189_v3 = vld [vmem:[#allocation5 + $0x70] sm:$0xff]  ;;  %vm4957_vm11 = vmmov %vm4940_vm1 }
 0x490   : > { %v2383_v34 = vmul.f32 %v2367_v55, %v2351_v47  ;;  %v3390_v40 = vpop.eup %3389  ;;  %v2353_v12 = vsub.f32 0.0, %v2324_v44  ;;  %v2290_v48 = vsub.f32 %v2226_v49, %v2274_v8  ;;  %v2275_v14 = vmul.f32 %v2259_v5, %v4600_v19  ;;  %v2230_v44 = vld [vmem:[#allocation6 + $0x38] sm:$0xff] }
 0x491   : > { %v2384_v60 = vmul.f32 %v2368_v24, %v2352_v57  ;;  %v3392_v55 = vpop.eup %3391  ;;  %v2260_v10 = vadd.f32 %v2244_v32, %v2202_v0  ;;  %v2204_v42 = vmul.f32 0.6931472, %v3388_v13  ;;  %3405 = vrcp.f32 %v2313_v1  ;;  %v2248_v13 = vld [vmem:[#allocation4 + $0x48] sm:$0xff] }
 0x492   : > { %2399 = vst.msk [vmem:[%s3562_s16] sm:$0xff] %vm4947_vm13, %v2383_v34  ;;  %v3394_v24 = vpop.eup %3393  ;;  %v2385_v19 = vmul.f32 %v2369_v26, %v2353_v12  ;;  %v2326_v18 = vmul.f32 %v3378_v51, %v2290_v48  ;;  %v2291_v6 = vsub.f32 %v2227_v15, %v2275_v14  ;;  %v2206_v20 = vmul.f32 0.6931472, %v3392_v55  ;;  %v2229_v26 = vld [vmem:[#allocation6 + $0x30] sm:$0xff]  ;;  %vm4958_vm13 = vmmov %vm4940_vm1 }
 0x493   : > { %2400 = vst.msk [vmem:[%s3562_s16 + $0x8] sm:$0xff] %vm4948_vm14, %v2384_v60  ;;  %v3396_v35 = vpop.eup %3395  ;;  %v2276_v25 = vmul.f32 %v2260_v10, %v4606_v62  ;;  %v2261_v28 = vadd.f32 %v2245_v63, %v2204_v42  ;;  %3407 = vlog2.f32 %v2186_v37  ;;  %vm2139_vm0 = vcmp.eq.f32.partialorder %v4720_v43, 0.0  ;;  %v2187_v62 = vld [vmem:[#allocation5 + $0x60] sm:$0xff]  ;;  %v2249_v37 = vld [vmem:[#allocation4 + $0x50] sm:$0xff]  ;;  %v4744_v10 = vld [vmem:[#allocation7 + $0x68] sm:$0xff] }
 0x494   : > { %v3398_v50 = vpop.eup %3397  ;;  %2401 = vst.msk [vmem:[%s3562_s16 + $0x10] sm:$0xff] %vm4949_vm15, %v2385_v19  ;;  %v2354_v56 = vsub.f32 0.0, %v2326_v18  ;;  %v2328_v16 = vmul.f32 %v3382_v59, %v2291_v6  ;;  %v2262_v51 = vadd.f32 %v2246_v2, %v2206_v20  ;;  %v2208_v47 = vmul.f32 0.6931472, %v3396_v35  ;;  %v2231_v60 = vld [vmem:[#allocation6 + $0x40] sm:$0xff]  ;;  %v2232_v42 = vld [vmem:[#allocation6 + $0x48] sm:$0xff]  ;;  %vm4959_vm14 = vmmov %vm4940_vm1 }
 0x495   : > { %v3400_v49 = vpop.eup %3399  ;;  %v2292_v1 = vsub.f32 %v2228_v31, %v2276_v25  ;;  %v2277_v57 = vmul.f32 %v2261_v28, %v4622_v21  ;;  %3409 = vrcp.f32 %v2314_v52  ;;  %v4732_v12 = vsel %vm2139_vm0, 1.0, %v3473_v45  ;;  %v2188_v52 = vld [vmem:[#allocation5 + $0x68] sm:$0xff]  ;;  %v2233_v25 = vld [vmem:[#allocation6 + $0x50] sm:$0xff]  ;;  %v2250_v28 = vld [vmem:[#allocation4 + $0x58] sm:$0xff] }
 0x496   : > { %v2386_v8 = vmul.f32 %v2370_v46, %v2354_v56  ;;  %v2355_v5 = vsub.f32 0.0, %v2328_v16  ;;  %v2278_v59 = vmul.f32 %v2262_v51, %v4629_v11  ;;  %v2263_v32 = vadd.f32 %v2247_v27, %v2208_v47  ;;  %2427 = vst.msk [vmem:[%s3567_s26 + $0x60] sm:$0xff] %vm4950_vm2, %v4732_v12  ;;  %vm4960_vm15 = vmmov %vm4940_vm1 }
 0x497   : > { %v3402_v34 = vpop.eup %3401  ;;  %v2330_v15 = vmul.f32 %v3386_v30, %v2292_v1  ;;  %v2293_v0 = vsub.f32 %v2229_v26, %v2277_v57  ;;  %v2210_v21 = vmul.f32 0.6931472, %v3400_v49  ;;  %3411 = vlog2.f32 %v2187_v62  ;;  %v2190_v62 = vld [vmem:[#allocation5 + $0x78] sm:$0xff]  ;;  %vm4961_vm0 = vmmov %vm4940_vm1 }
 0x498   : > { %2402 = vst.msk [vmem:[%s3562_s16 + $0x18] sm:$0xff] %vm4940_vm1, %v2386_v8  ;;  %v2387_v58 = vmul.f32 %v2371_v38, %v2355_v5  ;;  %v2294_v46 = vsub.f32 %v2230_v44, %v2278_v59  ;;  %v2279_v48 = vmul.f32 %v2263_v32, %v4640_v36  ;;  %v2315_v55 = vadd.f32 %v4732_v12, %v4720_v43  ;;  %v2234_v44 = vld [vmem:[#allocation6 + $0x58] sm:$0xff]  ;;  %v2251_v32 = vld [vmem:[#allocation4 + $0x60] sm:$0xff]  ;;  %vm4962_vm1 = vmmov %vm4961_vm0 }
 0x499   : > { %v3404_v11 = vpop.eup %3403  ;;  %v2356_v30 = vsub.f32 0.0, %v2330_v15  ;;  %v2332_v14 = vmul.f32 %v3390_v40, %v2293_v0  ;;  %v2264_v63 = vadd.f32 %v2248_v13, %v2210_v21  ;;  %v2375_v36 = vsub.f32 1.0, %v4662_v29  ;;  %vm4963_vm2 = vmmov %vm4961_vm0 }
 0x49a   : > { %2403 = vst.msk [vmem:[%s3562_s16 + $0x20] sm:$0xff] %vm4951_vm3, %v2387_v58  ;;  %v2334_v39 = vmul.f32 %v3394_v24, %v2294_v46  ;;  %v2295_v38 = vsub.f32 %v2231_v60, %v2279_v48  ;;  %v2212_v2 = vmul.f32 0.6931472, %v3404_v11  ;;  %3413 = vrcp.f32 %v2315_v55  ;;  %v4753_v24 = vld [vmem:[#allocation7 + $0x70] sm:$0xff]  ;;  %vm4964_vm3 = vmmov %vm4961_vm0 }
 0x49b   : > { %v3406_v19 = vpop.eup %3405  ;;  %v2388_v40 = vmul.f32 %v2372_v33, %v2356_v30  ;;  %v2357_v18 = vsub.f32 0.0, %v2332_v14  ;;  %v2280_v6 = vmul.f32 %v2264_v63, %v4653_v41  ;;  %vm2140_vm5 = vcmp.eq.f32.partialorder %v4744_v10, 0.0  ;;  %v2252_v63 = vld [vmem:[#allocation4 + $0x68] sm:$0xff] }
 0x49c   : > { %v2358_v31 = vsub.f32 0.0, %v2334_v39  ;;  %v2336_v20 = vmul.f32 %v3398_v50, %v2295_v38  ;;  %v2265_v35 = vadd.f32 %v2249_v37, %v2212_v2  ;;  %v4760_v41 = vsel %vm2140_vm5, 1.0, %v3473_v45  ;;  %v2236_v2 = vld [vmem:[#allocation6 + $0x68] sm:$0xff]  ;;  %vm4965_vm5 = vmmov %vm4961_vm0 }
 0x49d   : > { %v3408_v29 = vpop.eup %3407  ;;  %2404 = vst.msk [vmem:[%s3562_s16 + $0x28] sm:$0xff] %vm4952_vm6, %v2388_v40  ;;  %v2389_v9 = vmul.f32 %v2373_v7, %v2357_v18  ;;  %v2296_v33 = vsub.f32 %v2232_v42, %v2280_v6  ;;  %3415 = vlog2.f32 %v2188_v52  ;;  %v2376_v26 = vsub.f32 1.0, %v4675_v54 }
 0x49e   : > { %v2390_v27 = vmul.f32 %v2374_v61, %v2358_v31  ;;  %v2359_v50 = vsub.f32 0.0, %v2336_v20  ;;  %v2281_v56 = vmul.f32 %v2265_v35, %v4670_v22  ;;  %v2214_v16 = vmul.f32 0.6931472, %v3408_v29  ;;  %2428 = vst.msk [vmem:[%s3567_s26 + $0x68] sm:$0xff] %vm4953_vm7, %v4760_v41  ;;  %v4774_v61 = vld [vmem:[#allocation7 + $0x78] sm:$0xff] }
 0x49f   : > { %v3410_v23 = vpop.eup %3409  ;;  %2405 = vst.msk [vmem:[%s3562_s16 + $0x30] sm:$0xff] %vm4954_vm8, %v2389_v9  ;;  %v2338_v7 = vmul.f32 %v3402_v34, %v2296_v33  ;;  %v2316_v51 = vadd.f32 %v4760_v41, %v4744_v10  ;;  %vm2141_vm4 = vcmp.eq.f32.partialorder %v4753_v24, 0.0  ;;  %v2377_v54 = vsub.f32 1.0, %v4689_v53  ;;  %v2254_v35 = vld [vmem:[#allocation4 + $0x78] sm:$0xff] }
 0x4a0   : > { %2406 = vst.msk [vmem:[%s3562_s16 + $0x38] sm:$0xff] %vm4955_vm9, %v2390_v27  ;;  %v2391_v22 = vmul.f32 %v2375_v36, %v2359_v50  ;;  %v2297_v47 = vsub.f32 %v2233_v25, %v2281_v56  ;;  %v2266_v49 = vadd.f32 %v2250_v28, %v2214_v16  ;;  %v4779_v1 = vsel %vm2141_vm4, 1.0, %v3473_v45  ;;  %v2237_v28 = vld [vmem:[#allocation6 + $0x70] sm:$0xff]  ;;  %v2238_v16 = vld [vmem:[#allocation6 + $0x78] sm:$0xff] }
 0x4a1   : > { %v2360_v57 = vsub.f32 0.0, %v2338_v7  ;;  %2429 = vst.msk [vmem:[%s3567_s26 + $0x70] sm:$0xff] %vm4956_vm10, %v4779_v1  ;;  %v3412_v8 = vpop.eup %3411  ;;  %3417 = vlog2.f32 %v2189_v3  ;;  %vm2142_vm12 = vcmp.eq.f32.partialorder %v4774_v61, 0.0  ;;  %v2317_v60 = vadd.f32 %v4779_v1, %v4753_v24 }
 0x4a2   : > { %2407 = vst.msk [vmem:[%s3562_s16 + $0x40] sm:$0xff] %vm4957_vm11, %v2391_v22  ;;  %v2340_v5 = vmul.f32 %v3406_v19, %v2297_v47  ;;  %v2282_v59 = vmul.f32 %v2266_v49, %v4682_v17  ;;  %v2216_v34 = vmul.f32 0.6931472, %v3412_v8  ;;  %3419 = vrcp.f32 %v2316_v51  ;;  %v2253_v19 = vld [vmem:[#allocation4 + $0x70] sm:$0xff] }
 0x4a3   : > { %v2392_v13 = vmul.f32 %v2376_v26, %v2360_v57  ;;  %v4790_v53 = vsel %vm2142_vm12, 1.0, %v3473_v45  ;;  %3421 = vlog2.f32 %v2190_v62  ;;  %v2378_v48 = vsub.f32 1.0, %v4704_v4  ;;  %v2235_v45 = vld [vmem:[#allocation6 + $0x60] sm:$0xff] }
 0x4a4   : > { %v2361_v15 = vsub.f32 0.0, %v2340_v5  ;;  %v2298_v0 = vsub.f32 %v2234_v44, %v2282_v59  ;;  %2430 = vst.msk [vmem:[%s3567_s26 + $0x78] sm:$0xff] %vm4958_vm13, %v4790_v53  ;;  %v3414_v17 = vpop.eup %3413  ;;  %v2267_v21 = vadd.f32 %v2251_v32, %v2216_v34  ;;  %v2318_v11 = vadd.f32 %v4790_v53, %v4774_v61 }
 0x4a5   : > { %2408 = vst.msk [vmem:[%s3562_s16 + $0x48] sm:$0xff] %vm4959_vm14, %v2392_v13  ;;  %3423 = vrcp.f32 %v2317_v60  ;;  %v2379_v4 = vsub.f32 1.0, %v4732_v12  ;;  %v2380_v12 = vsub.f32 1.0, %v4760_v41  ;;  %v2381_v22 = vsub.f32 1.0, %v4779_v1 }
 0x4a6   : > { %v2393_v58 = vmul.f32 %v2377_v54, %v2361_v15  ;;  %v2342_v46 = vmul.f32 %v3410_v23, %v2298_v0  ;;  %v2283_v14 = vmul.f32 %v2267_v21, %v4720_v43  ;;  %3425 = vrcp.f32 %v2318_v11 }
 0x4a7   : > { %v3416_v30 = vpop.eup %3415 }
 0x4a8   : > { %2409 = vst.msk [vmem:[%s3562_s16 + $0x50] sm:$0xff] %vm4960_vm15, %v2393_v58  ;;  %v2362_v37 = vsub.f32 0.0, %v2342_v46  ;;  %v2218_v55 = vmul.f32 0.6931472, %v3416_v30  ;;  %v2299_v39 = vsub.f32 %v2235_v45, %v2283_v14 }
 0x4aa   : > { %v2394_v38 = vmul.f32 %v2378_v48, %v2362_v37  ;;  %v2268_v36 = vadd.f32 %v2252_v63, %v2218_v55  ;;  %v2344_v42 = vmul.f32 %v3414_v17, %v2299_v39 }
 0x4ab   : > { %v3418_v52 = vpop.eup %3417 }
 0x4ac   : > { %2410 = vst.msk [vmem:[%s3562_s16 + $0x58] sm:$0xff] %vm4961_vm0, %v2394_v38  ;;  %v2284_v43 = vmul.f32 %v2268_v36, %v4744_v10  ;;  %v3420_v40 = vpop.eup %3419  ;;  %v2363_v18 = vsub.f32 0.0, %v2344_v42  ;;  %v2220_v6 = vmul.f32 0.6931472, %v3418_v52 }
 0x4ad   : > { %v3422_v31 = vpop.eup %3421 }
 0x4ae   : > { %v2300_v20 = vsub.f32 %v2236_v2, %v2284_v43  ;;  %v2395_v29 = vmul.f32 %v2379_v4, %v2363_v18  ;;  %v2269_v9 = vadd.f32 %v2253_v19, %v2220_v6  ;;  %v2222_v33 = vmul.f32 0.6931472, %v3422_v31 }
 0x4af   : > { %v3424_v50 = vpop.eup %3423 }
 0x4b0   : > { %v2346_v25 = vmul.f32 %v3420_v40, %v2300_v20  ;;  %2411 = vst.msk [vmem:[%s3562_s16 + $0x60] sm:$0xff] %vm4962_vm1, %v2395_v29  ;;  %v2285_v27 = vmul.f32 %v2269_v9, %v4753_v24  ;;  %v2270_v10 = vadd.f32 %v2254_v35, %v2222_v33  ;;  %v3426_v26 = vpop.eup %3425  ;;  %v2382_v24 = vsub.f32 1.0, %v4790_v53 }
 0x4b2   : > { %v2364_v56 = vsub.f32 0.0, %v2346_v25  ;;  %v2301_v23 = vsub.f32 %v2237_v28, %v2285_v27  ;;  %v2286_v7 = vmul.f32 %v2270_v10, %v4774_v61 }
 0x4b4   : > { %v2396_v51 = vmul.f32 %v2380_v12, %v2364_v56  ;;  %v2348_v3 = vmul.f32 %v3424_v50, %v2301_v23  ;;  %v2302_v41 = vsub.f32 %v2238_v16, %v2286_v7 }
 0x4b6   : > { %2412 = vst.msk [vmem:[%s3562_s16 + $0x68] sm:$0xff] %vm4963_vm2, %v2396_v51  ;;  %v2365_v47 = vsub.f32 0.0, %v2348_v3  ;;  %v2350_v49 = vmul.f32 %v3426_v26, %v2302_v41 }
 0x4b8   : > { %v2397_v57 = vmul.f32 %v2381_v22, %v2365_v47  ;;  %v2366_v54 = vsub.f32 0.0, %v2350_v49 }
 0x4ba   : > { %2413 = vst.msk [vmem:[%s3562_s16 + $0x70] sm:$0xff] %vm4964_vm3, %v2397_v57  ;;  %v2398_v44 = vmul.f32 %v2382_v24, %v2366_v54 }
 0x4bc   : > { %2414 = vst.msk [vmem:[%s3562_s16 + $0x78] sm:$0xff] %vm4965_vm5, %v2398_v44 }
 0x4bd PF: > { %s16_s22 = sadd.s32 1, %s3465_s22   ;;  %s4966_s18 = smov %s3457_s20 }
 0x4be   : > { %p13_p13 = scmp.ge.s32.totalorder %s16_s22, 6   ;;  %s4967_s19 = smov %s3461_s21 }
 0x4bf   : > { %s4968_s20 = smov %s4971_s23  ;;  %s4969_s21 = smov %s4975_s24 }
 0x4c0   :  { %15 = sbr.rel (!%p13_p13) target bundleno = 3 (0x3), region = 99 }

</bundles_post_ra>
